<compile_context>
chip_gen: v7x
topology: tpu7x:2x2x1
jax: 0.10.0
libtpu: 0.0.40
codegen_flags: <defaults>
</compile_context>

<pallas_src>
import math

import jax
import jax.numpy as jnp
import numpy as np
from jax import lax
from jax.experimental import pallas as pl
from jax.experimental.pallas import tpu as pltpu

_INV_SQRT2 = 0.7071067811865476


def _erf_approx(z):
    # Abramowitz & Stegun 7.1.26, |err| <= 1.5e-7.  Uses only abs/mul/add/exp/
    # where, all of which have guaranteed Mosaic lowerings (lax.erf may not).
    a = jnp.abs(z)
    t = 1.0 / (1.0 + 0.3275911 * a)
    poly = t * (0.254829592 + t * (-0.284496736 + t * (1.421413741
             + t * (-1.453152027 + t * 1.061405429))))
    y = 1.0 - poly * jnp.exp(-a * a)
    return jnp.where(z < 0.0, -y, y)


def _gelu_kernel(x):
    # exact-GELU via the erf approximation above (matches torch.nn.GELU()).
    return 0.5 * x * (1.0 + _erf_approx(x * _INV_SQRT2))


def _gelu_exact(x):
    return 0.5 * x * (1.0 + jax.lax.erf(x * _INV_SQRT2))


# --------------------------------------------------------------------------
# Fused kernel:
#   one concatenated Linear+GELU (proj1 | proj2) -> L2-normalize -> chunk
#   -> per-batch spatial/spectral similarity dots
#   -> Conv2d(1->H2,3x3,SAME)+GELU+Conv2d(H2->1,3x3,SAME)  (all in registers)
#   -> symmetrize -> zero-diag + threshold (one select)
# --------------------------------------------------------------------------
def _make_fused_kernel(n, g_batches, h0, h1, hidden_c, threshold, mxu_dtype):
    dn_bt = (((1,), (1,)), ((), ()))          # A @ B^T over the feature axis
    f32 = jnp.float32

    def kernel(x_ref, w_ref, b_ref, c1w_ref, c1b_ref, c2w_ref, c2b_ref,
               out_ref, spatial_ref, spectral_ref):
        # ---- fused projections: single (G*N, T+NF) @ (T+NF, H0+H1) matmul --
        xin = x_ref[...]
        w = w_ref[...]
        if mxu_dtype is not None:             # accuracy/speed toggle
            xin = xin.astype(mxu_dtype)
            w = w.astype(mxu_dtype)
        act = jnp.dot(xin, w, preferred_element_type=f32) + b_ref[...]
        act = _gelu_kernel(act)               # (G*N, H0+H1)

        x = act[:, :h0]
        s = act[:, h0:h0 + h1]
        # torch F.normalize(p=2, dim=-1, eps=1e-12)
        xn = jnp.sqrt(jnp.sum(x * x, axis=-1, keepdims=True))
        x = x / jnp.maximum(xn, 1e-12)
        sn = jnp.sqrt(jnp.sum(s * s, axis=-1, keepdims=True))
        s = s / jnp.maximum(sn, 1e-12)

        x1, x2 = x[:, :h0 // 2], x[:, h0 // 2:]
        s1, s2 = s[:, :h1 // 2], s[:, h1 // 2:]
        if mxu_dtype is not None:
            x1, x2 = x1.astype(mxu_dtype), x2.astype(mxu_dtype)
            s1, s2 = s1.astype(mxu_dtype), s2.astype(mxu_dtype)

        # ---- hoisted, grid/g-invariant constants ---------------------------
        row = lax.broadcasted_iota(jnp.int32, (n, n), 0)
        col = lax.broadcasted_iota(jnp.int32, (n, n), 1)
        # 0/1 shift matrices implementing SAME (zero-pad) 3x3 shifts:
        #   (R[d] @ p)[i, j] = p[i + d - 1, j]   (zero outside)
        #   (p @ C[d])[i, j] = p[i, j + d - 1]   (zero outside)
        R = {0: jnp.where(col == row - 1, 1.0, 0.0),
             2: jnp.where(col == row + 1, 1.0, 0.0)}
        C = {0: jnp.where(row == col - 1, 1.0, 0.0),
             2: jnp.where(row == col + 1, 1.0, 0.0)}
        eye = jnp.where(row == col, 1.0, 0.0)
        off_diag = row != col

        def rshift(p, d):
            return p if d == 1 else jnp.dot(R[d], p, preferred_element_type=f32)

        def cshift(p, d):
            return p if d == 1 else jnp.dot(p, C[d], preferred_element_type=f32)

        # conv weights/biases live in SMEM; read scalars / build bias planes
        # ONCE (not per batch in the g loop).
        c1w = [[c1w_ref[c * 9 + k] for k in range(9)] for c in range(hidden_c)]
        c2w = [[c2w_ref[c * 9 + k] for k in range(9)] for c in range(hidden_c)]
        c1b_plane = [jnp.full((n, n), c1b_ref[c], dtype=f32)
                     for c in range(hidden_c)]
        c2b_plane = jnp.full((n, n), c2b_ref[0], dtype=f32)

        for g in range(g_batches):
            lo, hi = g * n, (g + 1) * n
            spatial = lax.dot_general(x1[lo:hi], x2[lo:hi], dn_bt,
                                      preferred_element_type=f32)
            spectral = lax.dot_general(s1[lo:hi], s2[lo:hi], dn_bt,
                                       preferred_element_type=f32)
            sim = spatial + spectral
            spatial_ref[g] = spatial
            spectral_ref[g] = spectral

            # ---- Conv2d(1->H2, 3x3, SAME): the 9 shifted planes of sim,
            #      produced by 8 tiny shift-matrix matmuls (no VMEM scratch).
            rows = {d: rshift(sim, d) for d in (0, 1, 2)}
            planes = [cshift(rows[di], dj)
                      for di in (0, 1, 2) for dj in (0, 1, 2)]

            # ---- fuse conv1-channel production with conv2-tap accumulation:
            #      only 9 planes + 9 tap accumulators + one hidden channel are
            #      live at any time (no (H2, n, n) hidden tensor -> no spills).
            q = [None] * 9
            for c in range(hidden_c):
                hsum = c1b_plane[c]
                for k in range(9):
                    hsum = hsum + c1w[c][k] * planes[k]
                hc = _gelu_kernel(hsum)
                for k in range(9):
                    contrib = c2w[c][k] * hc
                    q[k] = contrib if q[k] is None else q[k] + contrib

            # ---- Conv2d(H2->1, 3x3, SAME): apply the 9 output shifts to the
            #      channel-contracted taps (linearity) -> 8 more tiny matmuls.
            acc = c2b_plane
            for di in (0, 1, 2):
                d_di = (cshift(q[di * 3 + 0], 0) + q[di * 3 + 1]
                        + cshift(q[di * 3 + 2], 2))
                acc = acc + rshift(d_di, di)

            # ---- symmetrize (transpose expressed as an A @ B^T dot so it
            #      stays on the well-supported matmul path), then zero-diag +
            #      threshold fused into a single select.
            acc_t = lax.dot_general(eye, acc, dn_bt, preferred_element_type=f32)
            y = acc + acc_t
            keep = jnp.logical_and(off_diag, y >= threshold)
            out_ref[g] = jnp.where(keep, y, 0.0)

    return kernel


def _pick_batch_block(b, n, min_grid_steps=2, max_rows=1024):
    """Batches per grid step.  Constraints: (g*n) % 8 == 0 (sublane tiling),
    g*n <= max_rows, and at least `min_grid_steps` grid steps whenever the
    batch allows it (so both v7x TensorCores get work; harmless on v5e/v6e)."""
    g_unit = 8 // math.gcd(n, 8)
    best = g_unit
    g = g_unit
    while g <= b and g * n <= max_rows:
        if -(-b // g) >= min_grid_steps:
            best = g
        g += g_unit
    return best


def s2cg_fused(ts_filt, f_t, params, threshold, *, mxu_dtype=None,
               batch_block=None, min_grid_steps=2):
    b, n, t = ts_filt.shape
    nf = f_t.shape[-1]
    h0 = params["w1"].shape[1]
    h1 = params["w2"].shape[1]
    h2 = params["c1w"].shape[0]
    k_in = t + nf
    h_out = h0 + h1

    g = _pick_batch_block(b, n, min_grid_steps) if batch_block is None else batch_block
    b_pad = -(-b // g) * g                       # pad batch so g divides it
    grid = (b_pad // g,)

    # Fuse the two projections into ONE matmul: concatenated inputs + a
    # block-diagonal weight (better MXU fill, one fewer input DMA stream).
    xcat = jnp.concatenate([ts_filt, f_t], axis=-1)            # (b, n, t+nf)
    if b_pad != b:
        pad = jnp.zeros((b_pad - b, n, k_in), xcat.dtype)
        xcat = jnp.concatenate([xcat, pad], axis=0)
    xcat = xcat.reshape(b_pad * n, k_in)

    wcat = jnp.zeros((k_in, h_out), jnp.float32)
    wcat = wcat.at[:t, :h0].set(params["w1"])
    wcat = wcat.at[t:, h0:].set(params["w2"])
    bcat = jnp.concatenate([params["b1"], params["b2"]]).reshape(1, h_out)

    kernel = _make_fused_kernel(n, g, h0, h1, h2, float(threshold), mxu_dtype)
    smem = pl.BlockSpec(memory_space=pltpu.MemorySpace.SMEM)
    f32 = jnp.float32
    out_shape = tuple(jax.ShapeDtypeStruct((b_pad, n, n), f32) for _ in range(3))
    out_spec = pl.BlockSpec((g, n, n), lambda i: (i, 0, 0))

    outs = pl.pallas_call(
        kernel,
        out_shape=out_shape,
        grid=grid,
        in_specs=[
            pl.BlockSpec((g * n, k_in), lambda i: (i, 0)),
            # grid-invariant weights: constant index_map -> fetched once
            pl.BlockSpec((k_in, h_out), lambda i: (0, 0)),
            pl.BlockSpec((1, h_out), lambda i: (0, 0)),
            smem, smem, smem, smem,              # conv weights/biases in SMEM
        ],
        out_specs=(out_spec, out_spec, out_spec),
        compiler_params=pltpu.CompilerParams(
            dimension_semantics=("parallel",),   # independent batch blocks
        ),
    )(xcat, wcat, bcat,
      params["c1w"].reshape(-1), params["c1b"].reshape(-1),
      params["c2w"].reshape(-1), params["c2b"].reshape(-1))

    sim_out, spatial, spectral = (o[:b] for o in outs)
    return sim_out, spatial, spectral


# --------------------------------------------------------------------------
# Plain-JAX glue: FFT band selection (no Pallas FFT / top-k primitive)
# --------------------------------------------------------------------------
def spectral_filter(ts, cutoff):
    b, n, t = ts.shape
    nfreq = t // 2 + 1
    x_f = jnp.fft.rfft(ts, axis=-1)
    x_f = x_f.at[:, :, 0].set(0.0 + 0.0j)
    f_t = jnp.abs(x_f).astype(jnp.float32)
    _, idx = jax.lax.top_k(f_t, cutoff)                    # (b, n, cutoff)
    mask = jnp.sum(jax.nn.one_hot(idx, nfreq, dtype=jnp.float32), axis=-2) > 0
    result = jnp.where(mask, x_f, 0.0 + 0.0j)
    ts_filt = jnp.fft.irfft(result, n=t, axis=-1).astype(jnp.float32)
    return ts_filt, f_t


def s2cg_forward(ts, params, cutoff, threshold, *, mxu_dtype=None):
    # TODO(synk): torch.fft.rfft/irfft + top-k spectral masking have no Pallas
    # TPU primitive; they run in plain JAX before the fused kernel.
    ts_filt, f_t = spectral_filter(ts, cutoff)
    return s2cg_fused(ts_filt, f_t, params, threshold, mxu_dtype=mxu_dtype)


# --------------------------------------------------------------------------
# Pure-JAX reference (for the sanity check)
# --------------------------------------------------------------------------
def s2cg_reference(ts, params, cutoff, threshold, mxu_dtype=None):
    def cast(*xs):
        if mxu_dtype is None:
            return xs
        return tuple(v.astype(mxu_dtype) for v in xs)

    ts_filt, f_t = spectral_filter(ts, cutoff)
    a1, w1 = cast(ts_filt, params["w1"])
    a2, w2 = cast(f_t, params["w2"])
    x = _gelu_exact(jnp.einsum("bnt,th->bnh", a1, w1,
                               preferred_element_type=jnp.float32) + params["b1"])
    s = _gelu_exact(jnp.einsum("bnt,th->bnh", a2, w2,
                               preferred_element_type=jnp.float32) + params["b2"])
    xn = jnp.sqrt(jnp.sum(x * x, -1, keepdims=True))
    x = x / jnp.maximum(xn, 1e-12)
    sn = jnp.sqrt(jnp.sum(s * s, -1, keepdims=True))
    s = s / jnp.maximum(sn, 1e-12)
    x1, x2 = jnp.split(x, 2, -1)
    s1, s2 = jnp.split(s, 2, -1)
    x1, x2, s1, s2 = cast(x1, x2, s1, s2)
    spatial = jnp.einsum("bnk,bmk->bnm", x1, x2, preferred_element_type=jnp.float32)
    spectral = jnp.einsum("bnk,bmk->bnm", s1, s2, preferred_element_type=jnp.float32)
    sim = spatial + spectral
    dn = ("NCHW", "OIHW", "NCHW")
    h = jax.lax.conv_general_dilated(sim[:, None], params["c1w"], (1, 1), "SAME",
                                     dimension_numbers=dn)
    h = _gelu_exact(h + params["c1b"][None, :, None, None])
    y = jax.lax.conv_general_dilated(h, params["c2w"], (1, 1), "SAME",
                                     dimension_numbers=dn)
    y = (y + params["c2b"][None, :, None, None])[:, 0]
    y = jnp.transpose(y, (0, 2, 1)) + y
    n = y.shape[-1]
    y = y * (1.0 - jnp.eye(n)[None])
    y = jnp.where(y < threshold, 0.0, y)
    return y, spatial, spectral


if __name__ == "__main__":
    # Make the plain-JAX reference matmuls/convs run in true f32 on TPU so the
    # strict comparison against the kernel's f32 MXU path is meaningful.
    jax.config.update("jax_default_matmul_precision", "highest")

    # small shapes consistent with the module: length=16, hidden_dim=(32,16,8)
    B, N, T = 2, 8, 16
    NFREQ = T // 2 + 1
    H0, H1, H2 = 32, 16, 8
    CUTOFF, THRESH = 4, 0.0

    key = jax.random.PRNGKey(0)
    ks = jax.random.split(key, 8)
    params = dict(
        w1=jax.random.normal(ks[0], (T, H0), jnp.float32) / math.sqrt(T),
        b1=jax.random.normal(ks[1], (H0,), jnp.float32) * 0.02,
        w2=jax.random.normal(ks[2], (NFREQ, H1), jnp.float32) / math.sqrt(NFREQ),
        b2=jax.random.normal(ks[3], (H1,), jnp.float32) * 0.02,
        # conv weights: kaiming_normal(mode='fan_out', relu) -> std=sqrt(2/fan_out)
        c1w=jax.random.normal(ks[4], (H2, 1, 3, 3), jnp.float32) * math.sqrt(2.0 / (H2 * 9)),
        c1b=jnp.zeros((H2,), jnp.float32),
        c2w=jax.random.normal(ks[5], (1, H2, 3, 3), jnp.float32) * math.sqrt(2.0 / 9),
        c2b=jnp.zeros((1,), jnp.float32),
    )
    ts = jax.random.normal(ks[6], (B, N, T), jnp.float32)

    # 1) f32 MXU operands: strict correctness check.
    got_f32 = s2cg_forward(ts, params, CUTOFF, THRESH, mxu_dtype=None)
    jax.block_until_ready(got_f32)
    want_f32 = s2cg_reference(ts, params, CUTOFF, THRESH, mxu_dtype=None)
    for got, want in zip(got_f32, want_f32):
        assert got.shape == want.shape
        assert np.allclose(np.asarray(got), np.asarray(want), atol=1e-3, rtol=1e-3)

    # 2) bf16 MXU-operand toggle (accuracy vs speed); compared against a
    #    reference that applies the same operand casts (f32 accumulation).
    got_bf16 = s2cg_forward(ts, params, CUTOFF, THRESH, mxu_dtype=jnp.bfloat16)
    jax.block_until_ready(got_bf16)
    want_bf16 = s2cg_reference(ts, params, CUTOFF, THRESH, mxu_dtype=jnp.bfloat16)
    for got, want in zip(got_bf16, want_bf16):
        assert got.shape == want.shape
        assert np.allclose(np.asarray(got), np.asarray(want), atol=5e-3, rtol=5e-3)

    print("KERNEL_OK")
</pallas_src>

<mosaic_0001>
module attributes {stable_mosaic.version = 11 : i64} {
  func.func @kernel(%arg0: i32, %arg1: memref<8x25xf32, #tpu.memory_space<vmem>>, %arg2: memref<25x48xf32, #tpu.memory_space<vmem>>, %arg3: memref<1x48xf32, #tpu.memory_space<vmem>>, %arg4: memref<72xf32, #tpu.memory_space<smem>>, %arg5: memref<8xf32, #tpu.memory_space<smem>>, %arg6: memref<72xf32, #tpu.memory_space<smem>>, %arg7: memref<1xf32, #tpu.memory_space<smem>>, %arg8: memref<1x8x8xf32, #tpu.memory_space<vmem>>, %arg9: memref<1x8x8xf32, #tpu.memory_space<vmem>>, %arg10: memref<1x8x8xf32, #tpu.memory_space<vmem>>) attributes {dimension_semantics = [#tpu.dimension_semantics<parallel>], iteration_bounds = array<i64: 2>, scalar_prefetch = 0 : i64, scratch_operands = 0 : i64, tpu.core_type = #tpu.core_type<tc>, window_params = [{transform_indices = @transform_0, window_bounds = array<i64: 8, 25>}, {pipeline_mode = #tpu.pipeline_mode<synchronous>, transform_indices = @transform_1, window_bounds = array<i64: 25, 48>}, {pipeline_mode = #tpu.pipeline_mode<synchronous>, transform_indices = @transform_2, window_bounds = array<i64: 1, 48>}, {transform_indices = @transform_3, window_bounds = array<i64: 72>}, {transform_indices = @transform_4, window_bounds = array<i64: 8>}, {transform_indices = @transform_5, window_bounds = array<i64: 72>}, {transform_indices = @transform_6, window_bounds = array<i64: 1>}, {transform_indices = @transform_7, window_bounds = array<i64: 1, 8, 8>}, {transform_indices = @transform_8, window_bounds = array<i64: 1, 8, 8>}, {transform_indices = @transform_9, window_bounds = array<i64: 1, 8, 8>}]} {
    %c0 = arith.constant 0 : index
    %c0_0 = arith.constant 0 : index
    %0 = vector.load %arg1[%c0, %c0_0] : memref<8x25xf32, #tpu.memory_space<vmem>>, vector<8x25xf32>
    %c0_1 = arith.constant 0 : index
    %c0_2 = arith.constant 0 : index
    %1 = vector.load %arg2[%c0_1, %c0_2] : memref<25x48xf32, #tpu.memory_space<vmem>>, vector<25x48xf32>
    %cst = arith.constant dense<0.000000e+00> : vector<8x48xf32>
    %2 = tpu.matmul %0, %1, %cst {dimension_numbers = #tpu.dot_dimension_numbers<[1], [0], [0], [1], [0, 0, 1, 1], [], []>, precision = #tpu.contract_precision<fp32>} : vector<8x25xf32>, vector<25x48xf32>, vector<8x48xf32> -> vector<8x48xf32>
    %c0_3 = arith.constant 0 : index
    %c0_4 = arith.constant 0 : index
    %3 = vector.load %arg3[%c0_3, %c0_4] : memref<1x48xf32, #tpu.memory_space<vmem>>, vector<1x48xf32>
    %4 = vector.broadcast %3 : vector<1x48xf32> to vector<8x48xf32>
    %5 = arith.addf %2, %4 : vector<8x48xf32>
    %cst_5 = arith.constant 5.000000e-01 : f32
    %6 = vector.broadcast %cst_5 : f32 to vector<8x48xf32>
    %7 = arith.mulf %6, %5 : vector<8x48xf32>
    %cst_6 = arith.constant 0.707106769 : f32
    %8 = vector.broadcast %cst_6 : f32 to vector<8x48xf32>
    %9 = arith.mulf %5, %8 : vector<8x48xf32>
    %10 = math.absf %9 : vector<8x48xf32>
    %cst_7 = arith.constant 0.327591091 : f32
    %11 = vector.broadcast %cst_7 : f32 to vector<8x48xf32>
    %12 = arith.mulf %11, %10 : vector<8x48xf32>
    %cst_8 = arith.constant 1.000000e+00 : f32
    %13 = vector.broadcast %cst_8 : f32 to vector<8x48xf32>
    %14 = arith.addf %13, %12 : vector<8x48xf32>
    %cst_9 = arith.constant 1.000000e+00 : f32
    %15 = vector.broadcast %cst_9 : f32 to vector<8x48xf32>
    %16 = arith.divf %15, %14 : vector<8x48xf32>
    %cst_10 = arith.constant 1.06140542 : f32
    %17 = vector.broadcast %cst_10 : f32 to vector<8x48xf32>
    %18 = arith.mulf %16, %17 : vector<8x48xf32>
    %cst_11 = arith.constant -1.45315206 : f32
    %19 = vector.broadcast %cst_11 : f32 to vector<8x48xf32>
    %20 = arith.addf %19, %18 : vector<8x48xf32>
    %21 = arith.mulf %16, %20 : vector<8x48xf32>
    %cst_12 = arith.constant 1.42141378 : f32
    %22 = vector.broadcast %cst_12 : f32 to vector<8x48xf32>
    %23 = arith.addf %22, %21 : vector<8x48xf32>
    %24 = arith.mulf %16, %23 : vector<8x48xf32>
    %cst_13 = arith.constant -0.284496725 : f32
    %25 = vector.broadcast %cst_13 : f32 to vector<8x48xf32>
    %26 = arith.addf %25, %24 : vector<8x48xf32>
    %27 = arith.mulf %16, %26 : vector<8x48xf32>
    %cst_14 = arith.constant 0.254829586 : f32
    %28 = vector.broadcast %cst_14 : f32 to vector<8x48xf32>
    %29 = arith.addf %28, %27 : vector<8x48xf32>
    %30 = arith.mulf %16, %29 : vector<8x48xf32>
    %cst_15 = arith.constant 0.000000e+00 : f32
    %31 = vector.broadcast %cst_15 : f32 to vector<8x48xf32>
    %32 = arith.subf %31, %10 : vector<8x48xf32>
    %33 = arith.mulf %32, %10 : vector<8x48xf32>
    %34 = math.exp %33 : vector<8x48xf32>
    %35 = arith.mulf %30, %34 : vector<8x48xf32>
    %cst_16 = arith.constant 1.000000e+00 : f32
    %36 = vector.broadcast %cst_16 : f32 to vector<8x48xf32>
    %37 = arith.subf %36, %35 : vector<8x48xf32>
    %cst_17 = arith.constant 0.000000e+00 : f32
    %38 = vector.broadcast %cst_17 : f32 to vector<8x48xf32>
    %39 = arith.cmpf olt, %9, %38 : vector<8x48xf32>
    %cst_18 = arith.constant 0.000000e+00 : f32
    %40 = vector.broadcast %cst_18 : f32 to vector<8x48xf32>
    %41 = arith.subf %40, %37 : vector<8x48xf32>
    %42 = arith.select %39, %41, %37 : vector<8x48xi1>, vector<8x48xf32>
    %cst_19 = arith.constant 1.000000e+00 : f32
    %43 = vector.broadcast %cst_19 : f32 to vector<8x48xf32>
    %44 = arith.addf %43, %42 : vector<8x48xf32>
    %45 = arith.mulf %7, %44 : vector<8x48xf32>
    %46 = vector.extract_strided_slice %45 {offsets = [0, 0], sizes = [8, 32], strides = [1, 1]} : vector<8x48xf32> to vector<8x32xf32>
    %47 = vector.extract_strided_slice %45 {offsets = [0, 32], sizes = [8, 16], strides = [1, 1]} : vector<8x48xf32> to vector<8x16xf32>
    %48 = arith.mulf %46, %46 : vector<8x32xf32>
    %cst_20 = arith.constant dense<0.000000e+00> : vector<8xf32>
    %49 = vector.multi_reduction <add>, %48, %cst_20 [1] : vector<8x32xf32> to vector<8xf32>
    %50 = vector.shape_cast %49 : vector<8xf32> to vector<8x1xf32>
    %51 = math.sqrt %50 : vector<8x1xf32>
    %cst_21 = arith.constant 9.99999996E-13 : f32
    %52 = vector.broadcast %cst_21 : f32 to vector<8x1xf32>
    %53 = arith.maximumf %51, %52 : vector<8x1xf32>
    %54 = vector.broadcast %53 : vector<8x1xf32> to vector<8x32xf32>
    %55 = arith.divf %46, %54 : vector<8x32xf32>
    %56 = arith.mulf %47, %47 : vector<8x16xf32>
    %cst_22 = arith.constant dense<0.000000e+00> : vector<8xf32>
    %57 = vector.multi_reduction <add>, %56, %cst_22 [1] : vector<8x16xf32> to vector<8xf32>
    %58 = vector.shape_cast %57 : vector<8xf32> to vector<8x1xf32>
    %59 = math.sqrt %58 : vector<8x1xf32>
    %cst_23 = arith.constant 9.99999996E-13 : f32
    %60 = vector.broadcast %cst_23 : f32 to vector<8x1xf32>
    %61 = arith.maximumf %59, %60 : vector<8x1xf32>
    %62 = vector.broadcast %61 : vector<8x1xf32> to vector<8x16xf32>
    %63 = arith.divf %47, %62 : vector<8x16xf32>
    %64 = vector.extract_strided_slice %55 {offsets = [0, 0], sizes = [8, 16], strides = [1, 1]} : vector<8x32xf32> to vector<8x16xf32>
    %65 = vector.extract_strided_slice %55 {offsets = [0, 16], sizes = [8, 16], strides = [1, 1]} : vector<8x32xf32> to vector<8x16xf32>
    %66 = vector.extract_strided_slice %63 {offsets = [0, 0], sizes = [8, 8], strides = [1, 1]} : vector<8x16xf32> to vector<8x8xf32>
    %67 = vector.extract_strided_slice %63 {offsets = [0, 8], sizes = [8, 8], strides = [1, 1]} : vector<8x16xf32> to vector<8x8xf32>
    %68 = tpu.iota {dimensions = array<i32: 0>} : vector<8x8xi32>
    %69 = tpu.iota {dimensions = array<i32: 1>} : vector<8x8xi32>
    %c1_i32 = arith.constant 1 : i32
    %70 = vector.broadcast %c1_i32 : i32 to vector<8x8xi32>
    %71 = arith.subi %68, %70 : vector<8x8xi32>
    %72 = arith.cmpi eq, %69, %71 : vector<8x8xi32>
    %cst_24 = arith.constant 1.000000e+00 : f32
    %cst_25 = arith.constant 0.000000e+00 : f32
    %73 = vector.broadcast %cst_24 : f32 to vector<8x8xf32>
    %74 = vector.broadcast %cst_25 : f32 to vector<8x8xf32>
    %75 = arith.select %72, %73, %74 : vector<8x8xi1>, vector<8x8xf32>
    %c1_i32_26 = arith.constant 1 : i32
    %76 = vector.broadcast %c1_i32_26 : i32 to vector<8x8xi32>
    %77 = arith.addi %68, %76 : vector<8x8xi32>
    %78 = arith.cmpi eq, %69, %77 : vector<8x8xi32>
    %cst_27 = arith.constant 1.000000e+00 : f32
    %cst_28 = arith.constant 0.000000e+00 : f32
    %79 = vector.broadcast %cst_27 : f32 to vector<8x8xf32>
    %80 = vector.broadcast %cst_28 : f32 to vector<8x8xf32>
    %81 = arith.select %78, %79, %80 : vector<8x8xi1>, vector<8x8xf32>
    %c1_i32_29 = arith.constant 1 : i32
    %82 = vector.broadcast %c1_i32_29 : i32 to vector<8x8xi32>
    %83 = arith.subi %69, %82 : vector<8x8xi32>
    %84 = arith.cmpi eq, %68, %83 : vector<8x8xi32>
    %cst_30 = arith.constant 1.000000e+00 : f32
    %cst_31 = arith.constant 0.000000e+00 : f32
    %85 = vector.broadcast %cst_30 : f32 to vector<8x8xf32>
    %86 = vector.broadcast %cst_31 : f32 to vector<8x8xf32>
    %87 = arith.select %84, %85, %86 : vector<8x8xi1>, vector<8x8xf32>
    %c1_i32_32 = arith.constant 1 : i32
    %88 = vector.broadcast %c1_i32_32 : i32 to vector<8x8xi32>
    %89 = arith.addi %69, %88 : vector<8x8xi32>
    %90 = arith.cmpi eq, %68, %89 : vector<8x8xi32>
    %cst_33 = arith.constant 1.000000e+00 : f32
    %cst_34 = arith.constant 0.000000e+00 : f32
    %91 = vector.broadcast %cst_33 : f32 to vector<8x8xf32>
    %92 = vector.broadcast %cst_34 : f32 to vector<8x8xf32>
    %93 = arith.select %90, %91, %92 : vector<8x8xi1>, vector<8x8xf32>
    %94 = arith.cmpi eq, %68, %69 : vector<8x8xi32>
    %cst_35 = arith.constant 1.000000e+00 : f32
    %cst_36 = arith.constant 0.000000e+00 : f32
    %95 = vector.broadcast %cst_35 : f32 to vector<8x8xf32>
    %96 = vector.broadcast %cst_36 : f32 to vector<8x8xf32>
    %97 = arith.select %94, %95, %96 : vector<8x8xi1>, vector<8x8xf32>
    %98 = arith.cmpi ne, %68, %69 : vector<8x8xi32>
    %c0_37 = arith.constant 0 : index
    %99 = memref.load %arg4[%c0_37] : memref<72xf32, #tpu.memory_space<smem>>
    %c1 = arith.constant 1 : index
    %100 = memref.load %arg4[%c1] : memref<72xf32, #tpu.memory_space<smem>>
    %c2 = arith.constant 2 : index
    %101 = memref.load %arg4[%c2] : memref<72xf32, #tpu.memory_space<smem>>
    %c3 = arith.constant 3 : index
    %102 = memref.load %arg4[%c3] : memref<72xf32, #tpu.memory_space<smem>>
    %c4 = arith.constant 4 : index
    %103 = memref.load %arg4[%c4] : memref<72xf32, #tpu.memory_space<smem>>
    %c5 = arith.constant 5 : index
    %104 = memref.load %arg4[%c5] : memref<72xf32, #tpu.memory_space<smem>>
    %c6 = arith.constant 6 : index
    %105 = memref.load %arg4[%c6] : memref<72xf32, #tpu.memory_space<smem>>
    %c7 = arith.constant 7 : index
    %106 = memref.load %arg4[%c7] : memref<72xf32, #tpu.memory_space<smem>>
    %c8 = arith.constant 8 : index
    %107 = memref.load %arg4[%c8] : memref<72xf32, #tpu.memory_space<smem>>
    %c9 = arith.constant 9 : index
    %108 = memref.load %arg4[%c9] : memref<72xf32, #tpu.memory_space<smem>>
    %c10 = arith.constant 10 : index
    %109 = memref.load %arg4[%c10] : memref<72xf32, #tpu.memory_space<smem>>
    %c11 = arith.constant 11 : index
    %110 = memref.load %arg4[%c11] : memref<72xf32, #tpu.memory_space<smem>>
    %c12 = arith.constant 12 : index
    %111 = memref.load %arg4[%c12] : memref<72xf32, #tpu.memory_space<smem>>
    %c13 = arith.constant 13 : index
    %112 = memref.load %arg4[%c13] : memref<72xf32, #tpu.memory_space<smem>>
    %c14 = arith.constant 14 : index
    %113 = memref.load %arg4[%c14] : memref<72xf32, #tpu.memory_space<smem>>
    %c15 = arith.constant 15 : index
    %114 = memref.load %arg4[%c15] : memref<72xf32, #tpu.memory_space<smem>>
    %c16 = arith.constant 16 : index
    %115 = memref.load %arg4[%c16] : memref<72xf32, #tpu.memory_space<smem>>
    %c17 = arith.constant 17 : index
    %116 = memref.load %arg4[%c17] : memref<72xf32, #tpu.memory_space<smem>>
    %c18 = arith.constant 18 : index
    %117 = memref.load %arg4[%c18] : memref<72xf32, #tpu.memory_space<smem>>
    %c19 = arith.constant 19 : index
    %118 = memref.load %arg4[%c19] : memref<72xf32, #tpu.memory_space<smem>>
    %c20 = arith.constant 20 : index
    %119 = memref.load %arg4[%c20] : memref<72xf32, #tpu.memory_space<smem>>
    %c21 = arith.constant 21 : index
    %120 = memref.load %arg4[%c21] : memref<72xf32, #tpu.memory_space<smem>>
    %c22 = arith.constant 22 : index
    %121 = memref.load %arg4[%c22] : memref<72xf32, #tpu.memory_space<smem>>
    %c23 = arith.constant 23 : index
    %122 = memref.load %arg4[%c23] : memref<72xf32, #tpu.memory_space<smem>>
    %c24 = arith.constant 24 : index
    %123 = memref.load %arg4[%c24] : memref<72xf32, #tpu.memory_space<smem>>
    %c25 = arith.constant 25 : index
    %124 = memref.load %arg4[%c25] : memref<72xf32, #tpu.memory_space<smem>>
    %c26 = arith.constant 26 : index
    %125 = memref.load %arg4[%c26] : memref<72xf32, #tpu.memory_space<smem>>
    %c27 = arith.constant 27 : index
    %126 = memref.load %arg4[%c27] : memref<72xf32, #tpu.memory_space<smem>>
    %c28 = arith.constant 28 : index
    %127 = memref.load %arg4[%c28] : memref<72xf32, #tpu.memory_space<smem>>
    %c29 = arith.constant 29 : index
    %128 = memref.load %arg4[%c29] : memref<72xf32, #tpu.memory_space<smem>>
    %c30 = arith.constant 30 : index
    %129 = memref.load %arg4[%c30] : memref<72xf32, #tpu.memory_space<smem>>
    %c31 = arith.constant 31 : index
    %130 = memref.load %arg4[%c31] : memref<72xf32, #tpu.memory_space<smem>>
    %c32 = arith.constant 32 : index
    %131 = memref.load %arg4[%c32] : memref<72xf32, #tpu.memory_space<smem>>
    %c33 = arith.constant 33 : index
    %132 = memref.load %arg4[%c33] : memref<72xf32, #tpu.memory_space<smem>>
    %c34 = arith.constant 34 : index
    %133 = memref.load %arg4[%c34] : memref<72xf32, #tpu.memory_space<smem>>
    %c35 = arith.constant 35 : index
    %134 = memref.load %arg4[%c35] : memref<72xf32, #tpu.memory_space<smem>>
    %c36 = arith.constant 36 : index
    %135 = memref.load %arg4[%c36] : memref<72xf32, #tpu.memory_space<smem>>
    %c37 = arith.constant 37 : index
    %136 = memref.load %arg4[%c37] : memref<72xf32, #tpu.memory_space<smem>>
    %c38 = arith.constant 38 : index
    %137 = memref.load %arg4[%c38] : memref<72xf32, #tpu.memory_space<smem>>
    %c39 = arith.constant 39 : index
    %138 = memref.load %arg4[%c39] : memref<72xf32, #tpu.memory_space<smem>>
    %c40 = arith.constant 40 : index
    %139 = memref.load %arg4[%c40] : memref<72xf32, #tpu.memory_space<smem>>
    %c41 = arith.constant 41 : index
    %140 = memref.load %arg4[%c41] : memref<72xf32, #tpu.memory_space<smem>>
    %c42 = arith.constant 42 : index
    %141 = memref.load %arg4[%c42] : memref<72xf32, #tpu.memory_space<smem>>
    %c43 = arith.constant 43 : index
    %142 = memref.load %arg4[%c43] : memref<72xf32, #tpu.memory_space<smem>>
    %c44 = arith.constant 44 : index
    %143 = memref.load %arg4[%c44] : memref<72xf32, #tpu.memory_space<smem>>
    %c45 = arith.constant 45 : index
    %144 = memref.load %arg4[%c45] : memref<72xf32, #tpu.memory_space<smem>>
    %c46 = arith.constant 46 : index
    %145 = memref.load %arg4[%c46] : memref<72xf32, #tpu.memory_space<smem>>
    %c47 = arith.constant 47 : index
    %146 = memref.load %arg4[%c47] : memref<72xf32, #tpu.memory_space<smem>>
    %c48 = arith.constant 48 : index
    %147 = memref.load %arg4[%c48] : memref<72xf32, #tpu.memory_space<smem>>
    %c49 = arith.constant 49 : index
    %148 = memref.load %arg4[%c49] : memref<72xf32, #tpu.memory_space<smem>>
    %c50 = arith.constant 50 : index
    %149 = memref.load %arg4[%c50] : memref<72xf32, #tpu.memory_space<smem>>
    %c51 = arith.constant 51 : index
    %150 = memref.load %arg4[%c51] : memref<72xf32, #tpu.memory_space<smem>>
    %c52 = arith.constant 52 : index
    %151 = memref.load %arg4[%c52] : memref<72xf32, #tpu.memory_space<smem>>
    %c53 = arith.constant 53 : index
    %152 = memref.load %arg4[%c53] : memref<72xf32, #tpu.memory_space<smem>>
    %c54 = arith.constant 54 : index
    %153 = memref.load %arg4[%c54] : memref<72xf32, #tpu.memory_space<smem>>
    %c55 = arith.constant 55 : index
    %154 = memref.load %arg4[%c55] : memref<72xf32, #tpu.memory_space<smem>>
    %c56 = arith.constant 56 : index
    %155 = memref.load %arg4[%c56] : memref<72xf32, #tpu.memory_space<smem>>
    %c57 = arith.constant 57 : index
    %156 = memref.load %arg4[%c57] : memref<72xf32, #tpu.memory_space<smem>>
    %c58 = arith.constant 58 : index
    %157 = memref.load %arg4[%c58] : memref<72xf32, #tpu.memory_space<smem>>
    %c59 = arith.constant 59 : index
    %158 = memref.load %arg4[%c59] : memref<72xf32, #tpu.memory_space<smem>>
    %c60 = arith.constant 60 : index
    %159 = memref.load %arg4[%c60] : memref<72xf32, #tpu.memory_space<smem>>
    %c61 = arith.constant 61 : index
    %160 = memref.load %arg4[%c61] : memref<72xf32, #tpu.memory_space<smem>>
    %c62 = arith.constant 62 : index
    %161 = memref.load %arg4[%c62] : memref<72xf32, #tpu.memory_space<smem>>
    %c63 = arith.constant 63 : index
    %162 = memref.load %arg4[%c63] : memref<72xf32, #tpu.memory_space<smem>>
    %c64 = arith.constant 64 : index
    %163 = memref.load %arg4[%c64] : memref<72xf32, #tpu.memory_space<smem>>
    %c65 = arith.constant 65 : index
    %164 = memref.load %arg4[%c65] : memref<72xf32, #tpu.memory_space<smem>>
    %c66 = arith.constant 66 : index
    %165 = memref.load %arg4[%c66] : memref<72xf32, #tpu.memory_space<smem>>
    %c67 = arith.constant 67 : index
    %166 = memref.load %arg4[%c67] : memref<72xf32, #tpu.memory_space<smem>>
    %c68 = arith.constant 68 : index
    %167 = memref.load %arg4[%c68] : memref<72xf32, #tpu.memory_space<smem>>
    %c69 = arith.constant 69 : index
    %168 = memref.load %arg4[%c69] : memref<72xf32, #tpu.memory_space<smem>>
    %c70 = arith.constant 70 : index
    %169 = memref.load %arg4[%c70] : memref<72xf32, #tpu.memory_space<smem>>
    %c71 = arith.constant 71 : index
    %170 = memref.load %arg4[%c71] : memref<72xf32, #tpu.memory_space<smem>>
    %c0_38 = arith.constant 0 : index
    %171 = memref.load %arg6[%c0_38] : memref<72xf32, #tpu.memory_space<smem>>
    %c1_39 = arith.constant 1 : index
    %172 = memref.load %arg6[%c1_39] : memref<72xf32, #tpu.memory_space<smem>>
    %c2_40 = arith.constant 2 : index
    %173 = memref.load %arg6[%c2_40] : memref<72xf32, #tpu.memory_space<smem>>
    %c3_41 = arith.constant 3 : index
    %174 = memref.load %arg6[%c3_41] : memref<72xf32, #tpu.memory_space<smem>>
    %c4_42 = arith.constant 4 : index
    %175 = memref.load %arg6[%c4_42] : memref<72xf32, #tpu.memory_space<smem>>
    %c5_43 = arith.constant 5 : index
    %176 = memref.load %arg6[%c5_43] : memref<72xf32, #tpu.memory_space<smem>>
    %c6_44 = arith.constant 6 : index
    %177 = memref.load %arg6[%c6_44] : memref<72xf32, #tpu.memory_space<smem>>
    %c7_45 = arith.constant 7 : index
    %178 = memref.load %arg6[%c7_45] : memref<72xf32, #tpu.memory_space<smem>>
    %c8_46 = arith.constant 8 : index
    %179 = memref.load %arg6[%c8_46] : memref<72xf32, #tpu.memory_space<smem>>
    %c9_47 = arith.constant 9 : index
    %180 = memref.load %arg6[%c9_47] : memref<72xf32, #tpu.memory_space<smem>>
    %c10_48 = arith.constant 10 : index
    %181 = memref.load %arg6[%c10_48] : memref<72xf32, #tpu.memory_space<smem>>
    %c11_49 = arith.constant 11 : index
    %182 = memref.load %arg6[%c11_49] : memref<72xf32, #tpu.memory_space<smem>>
    %c12_50 = arith.constant 12 : index
    %183 = memref.load %arg6[%c12_50] : memref<72xf32, #tpu.memory_space<smem>>
    %c13_51 = arith.constant 13 : index
    %184 = memref.load %arg6[%c13_51] : memref<72xf32, #tpu.memory_space<smem>>
    %c14_52 = arith.constant 14 : index
    %185 = memref.load %arg6[%c14_52] : memref<72xf32, #tpu.memory_space<smem>>
    %c15_53 = arith.constant 15 : index
    %186 = memref.load %arg6[%c15_53] : memref<72xf32, #tpu.memory_space<smem>>
    %c16_54 = arith.constant 16 : index
    %187 = memref.load %arg6[%c16_54] : memref<72xf32, #tpu.memory_space<smem>>
    %c17_55 = arith.constant 17 : index
    %188 = memref.load %arg6[%c17_55] : memref<72xf32, #tpu.memory_space<smem>>
    %c18_56 = arith.constant 18 : index
    %189 = memref.load %arg6[%c18_56] : memref<72xf32, #tpu.memory_space<smem>>
    %c19_57 = arith.constant 19 : index
    %190 = memref.load %arg6[%c19_57] : memref<72xf32, #tpu.memory_space<smem>>
    %c20_58 = arith.constant 20 : index
    %191 = memref.load %arg6[%c20_58] : memref<72xf32, #tpu.memory_space<smem>>
    %c21_59 = arith.constant 21 : index
    %192 = memref.load %arg6[%c21_59] : memref<72xf32, #tpu.memory_space<smem>>
    %c22_60 = arith.constant 22 : index
    %193 = memref.load %arg6[%c22_60] : memref<72xf32, #tpu.memory_space<smem>>
    %c23_61 = arith.constant 23 : index
    %194 = memref.load %arg6[%c23_61] : memref<72xf32, #tpu.memory_space<smem>>
    %c24_62 = arith.constant 24 : index
    %195 = memref.load %arg6[%c24_62] : memref<72xf32, #tpu.memory_space<smem>>
    %c25_63 = arith.constant 25 : index
    %196 = memref.load %arg6[%c25_63] : memref<72xf32, #tpu.memory_space<smem>>
    %c26_64 = arith.constant 26 : index
    %197 = memref.load %arg6[%c26_64] : memref<72xf32, #tpu.memory_space<smem>>
    %c27_65 = arith.constant 27 : index
    %198 = memref.load %arg6[%c27_65] : memref<72xf32, #tpu.memory_space<smem>>
    %c28_66 = arith.constant 28 : index
    %199 = memref.load %arg6[%c28_66] : memref<72xf32, #tpu.memory_space<smem>>
    %c29_67 = arith.constant 29 : index
    %200 = memref.load %arg6[%c29_67] : memref<72xf32, #tpu.memory_space<smem>>
    %c30_68 = arith.constant 30 : index
    %201 = memref.load %arg6[%c30_68] : memref<72xf32, #tpu.memory_space<smem>>
    %c31_69 = arith.constant 31 : index
    %202 = memref.load %arg6[%c31_69] : memref<72xf32, #tpu.memory_space<smem>>
    %c32_70 = arith.constant 32 : index
    %203 = memref.load %arg6[%c32_70] : memref<72xf32, #tpu.memory_space<smem>>
    %c33_71 = arith.constant 33 : index
    %204 = memref.load %arg6[%c33_71] : memref<72xf32, #tpu.memory_space<smem>>
    %c34_72 = arith.constant 34 : index
    %205 = memref.load %arg6[%c34_72] : memref<72xf32, #tpu.memory_space<smem>>
    %c35_73 = arith.constant 35 : index
    %206 = memref.load %arg6[%c35_73] : memref<72xf32, #tpu.memory_space<smem>>
    %c36_74 = arith.constant 36 : index
    %207 = memref.load %arg6[%c36_74] : memref<72xf32, #tpu.memory_space<smem>>
    %c37_75 = arith.constant 37 : index
    %208 = memref.load %arg6[%c37_75] : memref<72xf32, #tpu.memory_space<smem>>
    %c38_76 = arith.constant 38 : index
    %209 = memref.load %arg6[%c38_76] : memref<72xf32, #tpu.memory_space<smem>>
    %c39_77 = arith.constant 39 : index
    %210 = memref.load %arg6[%c39_77] : memref<72xf32, #tpu.memory_space<smem>>
    %c40_78 = arith.constant 40 : index
    %211 = memref.load %arg6[%c40_78] : memref<72xf32, #tpu.memory_space<smem>>
    %c41_79 = arith.constant 41 : index
    %212 = memref.load %arg6[%c41_79] : memref<72xf32, #tpu.memory_space<smem>>
    %c42_80 = arith.constant 42 : index
    %213 = memref.load %arg6[%c42_80] : memref<72xf32, #tpu.memory_space<smem>>
    %c43_81 = arith.constant 43 : index
    %214 = memref.load %arg6[%c43_81] : memref<72xf32, #tpu.memory_space<smem>>
    %c44_82 = arith.constant 44 : index
    %215 = memref.load %arg6[%c44_82] : memref<72xf32, #tpu.memory_space<smem>>
    %c45_83 = arith.constant 45 : index
    %216 = memref.load %arg6[%c45_83] : memref<72xf32, #tpu.memory_space<smem>>
    %c46_84 = arith.constant 46 : index
    %217 = memref.load %arg6[%c46_84] : memref<72xf32, #tpu.memory_space<smem>>
    %c47_85 = arith.constant 47 : index
    %218 = memref.load %arg6[%c47_85] : memref<72xf32, #tpu.memory_space<smem>>
    %c48_86 = arith.constant 48 : index
    %219 = memref.load %arg6[%c48_86] : memref<72xf32, #tpu.memory_space<smem>>
    %c49_87 = arith.constant 49 : index
    %220 = memref.load %arg6[%c49_87] : memref<72xf32, #tpu.memory_space<smem>>
    %c50_88 = arith.constant 50 : index
    %221 = memref.load %arg6[%c50_88] : memref<72xf32, #tpu.memory_space<smem>>
    %c51_89 = arith.constant 51 : index
    %222 = memref.load %arg6[%c51_89] : memref<72xf32, #tpu.memory_space<smem>>
    %c52_90 = arith.constant 52 : index
    %223 = memref.load %arg6[%c52_90] : memref<72xf32, #tpu.memory_space<smem>>
    %c53_91 = arith.constant 53 : index
    %224 = memref.load %arg6[%c53_91] : memref<72xf32, #tpu.memory_space<smem>>
    %c54_92 = arith.constant 54 : index
    %225 = memref.load %arg6[%c54_92] : memref<72xf32, #tpu.memory_space<smem>>
    %c55_93 = arith.constant 55 : index
    %226 = memref.load %arg6[%c55_93] : memref<72xf32, #tpu.memory_space<smem>>
    %c56_94 = arith.constant 56 : index
    %227 = memref.load %arg6[%c56_94] : memref<72xf32, #tpu.memory_space<smem>>
    %c57_95 = arith.constant 57 : index
    %228 = memref.load %arg6[%c57_95] : memref<72xf32, #tpu.memory_space<smem>>
    %c58_96 = arith.constant 58 : index
    %229 = memref.load %arg6[%c58_96] : memref<72xf32, #tpu.memory_space<smem>>
    %c59_97 = arith.constant 59 : index
    %230 = memref.load %arg6[%c59_97] : memref<72xf32, #tpu.memory_space<smem>>
    %c60_98 = arith.constant 60 : index
    %231 = memref.load %arg6[%c60_98] : memref<72xf32, #tpu.memory_space<smem>>
    %c61_99 = arith.constant 61 : index
    %232 = memref.load %arg6[%c61_99] : memref<72xf32, #tpu.memory_space<smem>>
    %c62_100 = arith.constant 62 : index
    %233 = memref.load %arg6[%c62_100] : memref<72xf32, #tpu.memory_space<smem>>
    %c63_101 = arith.constant 63 : index
    %234 = memref.load %arg6[%c63_101] : memref<72xf32, #tpu.memory_space<smem>>
    %c64_102 = arith.constant 64 : index
    %235 = memref.load %arg6[%c64_102] : memref<72xf32, #tpu.memory_space<smem>>
    %c65_103 = arith.constant 65 : index
    %236 = memref.load %arg6[%c65_103] : memref<72xf32, #tpu.memory_space<smem>>
    %c66_104 = arith.constant 66 : index
    %237 = memref.load %arg6[%c66_104] : memref<72xf32, #tpu.memory_space<smem>>
    %c67_105 = arith.constant 67 : index
    %238 = memref.load %arg6[%c67_105] : memref<72xf32, #tpu.memory_space<smem>>
    %c68_106 = arith.constant 68 : index
    %239 = memref.load %arg6[%c68_106] : memref<72xf32, #tpu.memory_space<smem>>
    %c69_107 = arith.constant 69 : index
    %240 = memref.load %arg6[%c69_107] : memref<72xf32, #tpu.memory_space<smem>>
    %c70_108 = arith.constant 70 : index
    %241 = memref.load %arg6[%c70_108] : memref<72xf32, #tpu.memory_space<smem>>
    %c71_109 = arith.constant 71 : index
    %242 = memref.load %arg6[%c71_109] : memref<72xf32, #tpu.memory_space<smem>>
    %c0_110 = arith.constant 0 : index
    %243 = memref.load %arg5[%c0_110] : memref<8xf32, #tpu.memory_space<smem>>
    %244 = vector.broadcast %243 : f32 to vector<8x8xf32>
    %c1_111 = arith.constant 1 : index
    %245 = memref.load %arg5[%c1_111] : memref<8xf32, #tpu.memory_space<smem>>
    %246 = vector.broadcast %245 : f32 to vector<8x8xf32>
    %c2_112 = arith.constant 2 : index
    %247 = memref.load %arg5[%c2_112] : memref<8xf32, #tpu.memory_space<smem>>
    %248 = vector.broadcast %247 : f32 to vector<8x8xf32>
    %c3_113 = arith.constant 3 : index
    %249 = memref.load %arg5[%c3_113] : memref<8xf32, #tpu.memory_space<smem>>
    %250 = vector.broadcast %249 : f32 to vector<8x8xf32>
    %c4_114 = arith.constant 4 : index
    %251 = memref.load %arg5[%c4_114] : memref<8xf32, #tpu.memory_space<smem>>
    %252 = vector.broadcast %251 : f32 to vector<8x8xf32>
    %c5_115 = arith.constant 5 : index
    %253 = memref.load %arg5[%c5_115] : memref<8xf32, #tpu.memory_space<smem>>
    %254 = vector.broadcast %253 : f32 to vector<8x8xf32>
    %c6_116 = arith.constant 6 : index
    %255 = memref.load %arg5[%c6_116] : memref<8xf32, #tpu.memory_space<smem>>
    %256 = vector.broadcast %255 : f32 to vector<8x8xf32>
    %c7_117 = arith.constant 7 : index
    %257 = memref.load %arg5[%c7_117] : memref<8xf32, #tpu.memory_space<smem>>
    %258 = vector.broadcast %257 : f32 to vector<8x8xf32>
    %c0_118 = arith.constant 0 : index
    %259 = memref.load %arg7[%c0_118] : memref<1xf32, #tpu.memory_space<smem>>
    %260 = vector.broadcast %259 : f32 to vector<8x8xf32>
    %cst_119 = arith.constant dense<0.000000e+00> : vector<8x8xf32>
    %261 = tpu.matmul %64, %65, %cst_119 {dimension_numbers = #tpu.dot_dimension_numbers<[1], [1], [0], [0], [0, 0, 1, 0], [], []>, precision = #tpu.contract_precision<fp32>} : vector<8x16xf32>, vector<8x16xf32>, vector<8x8xf32> -> vector<8x8xf32>
    %cst_120 = arith.constant dense<0.000000e+00> : vector<8x8xf32>
    %262 = tpu.matmul %66, %67, %cst_120 {dimension_numbers = #tpu.dot_dimension_numbers<[1], [1], [0], [0], [0, 0, 1, 0], [], []>, precision = #tpu.contract_precision<fp32>} : vector<8x8xf32>, vector<8x8xf32>, vector<8x8xf32> -> vector<8x8xf32>
    %263 = arith.addf %261, %262 : vector<8x8xf32>
    %c0_121 = arith.constant 0 : index
    %c0_122 = arith.constant 0 : index
    %c0_123 = arith.constant 0 : index
    %264 = vector.load %arg9[%c0_121, %c0_122, %c0_123] : memref<1x8x8xf32, #tpu.memory_space<vmem>>, vector<1x8x8xf32>
    %265 = vector.shape_cast %264 : vector<1x8x8xf32> to vector<8x8xf32>
    %266 = vector.shape_cast %261 : vector<8x8xf32> to vector<1x8x8xf32>
    tpu.vector_store %arg9[%c0_121, %c0_122, %c0_123], %266 {strides = array<i32>} : memref<1x8x8xf32, #tpu.memory_space<vmem>>, vector<1x8x8xf32>,
    %c0_124 = arith.constant 0 : index
    %c0_125 = arith.constant 0 : index
    %c0_126 = arith.constant 0 : index
    %267 = vector.load %arg10[%c0_124, %c0_125, %c0_126] : memref<1x8x8xf32, #tpu.memory_space<vmem>>, vector<1x8x8xf32>
    %268 = vector.shape_cast %267 : vector<1x8x8xf32> to vector<8x8xf32>
    %269 = vector.shape_cast %262 : vector<8x8xf32> to vector<1x8x8xf32>
    tpu.vector_store %arg10[%c0_124, %c0_125, %c0_126], %269 {strides = array<i32>} : memref<1x8x8xf32, #tpu.memory_space<vmem>>, vector<1x8x8xf32>,
    %cst_127 = arith.constant dense<0.000000e+00> : vector<8x8xf32>
    %270 = tpu.matmul %75, %263, %cst_127 {dimension_numbers = #tpu.dot_dimension_numbers<[1], [0], [0], [1], [0, 0, 1, 1], [], []>, precision = #tpu.contract_precision<fp32>} : vector<8x8xf32>, vector<8x8xf32>, vector<8x8xf32> -> vector<8x8xf32>
    %cst_128 = arith.constant dense<0.000000e+00> : vector<8x8xf32>
    %271 = tpu.matmul %81, %263, %cst_128 {dimension_numbers = #tpu.dot_dimension_numbers<[1], [0], [0], [1], [0, 0, 1, 1], [], []>, precision = #tpu.contract_precision<fp32>} : vector<8x8xf32>, vector<8x8xf32>, vector<8x8xf32> -> vector<8x8xf32>
    %cst_129 = arith.constant dense<0.000000e+00> : vector<8x8xf32>
    %272 = tpu.matmul %270, %87, %cst_129 {dimension_numbers = #tpu.dot_dimension_numbers<[1], [0], [0], [1], [0, 0, 1, 1], [], []>, precision = #tpu.contract_precision<fp32>} : vector<8x8xf32>, vector<8x8xf32>, vector<8x8xf32> -> vector<8x8xf32>
    %cst_130 = arith.constant dense<0.000000e+00> : vector<8x8xf32>
    %273 = tpu.matmul %270, %93, %cst_130 {dimension_numbers = #tpu.dot_dimension_numbers<[1], [0], [0], [1], [0, 0, 1, 1], [], []>, precision = #tpu.contract_precision<fp32>} : vector<8x8xf32>, vector<8x8xf32>, vector<8x8xf32> -> vector<8x8xf32>
    %cst_131 = arith.constant dense<0.000000e+00> : vector<8x8xf32>
    %274 = tpu.matmul %263, %87, %cst_131 {dimension_numbers = #tpu.dot_dimension_numbers<[1], [0], [0], [1], [0, 0, 1, 1], [], []>, precision = #tpu.contract_precision<fp32>} : vector<8x8xf32>, vector<8x8xf32>, vector<8x8xf32> -> vector<8x8xf32>
    %cst_132 = arith.constant dense<0.000000e+00> : vector<8x8xf32>
    %275 = tpu.matmul %263, %93, %cst_132 {dimension_numbers = #tpu.dot_dimension_numbers<[1], [0], [0], [1], [0, 0, 1, 1], [], []>, precision = #tpu.contract_precision<fp32>} : vector<8x8xf32>, vector<8x8xf32>, vector<8x8xf32> -> vector<8x8xf32>
    %cst_133 = arith.constant dense<0.000000e+00> : vector<8x8xf32>
    %276 = tpu.matmul %271, %87, %cst_133 {dimension_numbers = #tpu.dot_dimension_numbers<[1], [0], [0], [1], [0, 0, 1, 1], [], []>, precision = #tpu.contract_precision<fp32>} : vector<8x8xf32>, vector<8x8xf32>, vector<8x8xf32> -> vector<8x8xf32>
    %cst_134 = arith.constant dense<0.000000e+00> : vector<8x8xf32>
    %277 = tpu.matmul %271, %93, %cst_134 {dimension_numbers = #tpu.dot_dimension_numbers<[1], [0], [0], [1], [0, 0, 1, 1], [], []>, precision = #tpu.contract_precision<fp32>} : vector<8x8xf32>, vector<8x8xf32>, vector<8x8xf32> -> vector<8x8xf32>
    %278 = vector.broadcast %99 : f32 to vector<8x8xf32>
    %279 = arith.mulf %278, %272 : vector<8x8xf32>
    %280 = arith.addf %244, %279 : vector<8x8xf32>
    %281 = vector.broadcast %100 : f32 to vector<8x8xf32>
    %282 = arith.mulf %281, %270 : vector<8x8xf32>
    %283 = arith.addf %280, %282 : vector<8x8xf32>
    %284 = vector.broadcast %101 : f32 to vector<8x8xf32>
    %285 = arith.mulf %284, %273 : vector<8x8xf32>
    %286 = arith.addf %283, %285 : vector<8x8xf32>
    %287 = vector.broadcast %102 : f32 to vector<8x8xf32>
    %288 = arith.mulf %287, %274 : vector<8x8xf32>
    %289 = arith.addf %286, %288 : vector<8x8xf32>
    %290 = vector.broadcast %103 : f32 to vector<8x8xf32>
    %291 = arith.mulf %290, %263 : vector<8x8xf32>
    %292 = arith.addf %289, %291 : vector<8x8xf32>
    %293 = vector.broadcast %104 : f32 to vector<8x8xf32>
    %294 = arith.mulf %293, %275 : vector<8x8xf32>
    %295 = arith.addf %292, %294 : vector<8x8xf32>
    %296 = vector.broadcast %105 : f32 to vector<8x8xf32>
    %297 = arith.mulf %296, %276 : vector<8x8xf32>
    %298 = arith.addf %295, %297 : vector<8x8xf32>
    %299 = vector.broadcast %106 : f32 to vector<8x8xf32>
    %300 = arith.mulf %299, %271 : vector<8x8xf32>
    %301 = arith.addf %298, %300 : vector<8x8xf32>
    %302 = vector.broadcast %107 : f32 to vector<8x8xf32>
    %303 = arith.mulf %302, %277 : vector<8x8xf32>
    %304 = arith.addf %301, %303 : vector<8x8xf32>
    %cst_135 = arith.constant 5.000000e-01 : f32
    %305 = vector.broadcast %cst_135 : f32 to vector<8x8xf32>
    %306 = arith.mulf %305, %304 : vector<8x8xf32>
    %cst_136 = arith.constant 0.707106769 : f32
    %307 = vector.broadcast %cst_136 : f32 to vector<8x8xf32>
    %308 = arith.mulf %304, %307 : vector<8x8xf32>
    %309 = math.absf %308 : vector<8x8xf32>
    %cst_137 = arith.constant 0.327591091 : f32
    %310 = vector.broadcast %cst_137 : f32 to vector<8x8xf32>
    %311 = arith.mulf %310, %309 : vector<8x8xf32>
    %cst_138 = arith.constant 1.000000e+00 : f32
    %312 = vector.broadcast %cst_138 : f32 to vector<8x8xf32>
    %313 = arith.addf %312, %311 : vector<8x8xf32>
    %cst_139 = arith.constant 1.000000e+00 : f32
    %314 = vector.broadcast %cst_139 : f32 to vector<8x8xf32>
    %315 = arith.divf %314, %313 : vector<8x8xf32>
    %cst_140 = arith.constant 1.06140542 : f32
    %316 = vector.broadcast %cst_140 : f32 to vector<8x8xf32>
    %317 = arith.mulf %315, %316 : vector<8x8xf32>
    %cst_141 = arith.constant -1.45315206 : f32
    %318 = vector.broadcast %cst_141 : f32 to vector<8x8xf32>
    %319 = arith.addf %318, %317 : vector<8x8xf32>
    %320 = arith.mulf %315, %319 : vector<8x8xf32>
    %cst_142 = arith.constant 1.42141378 : f32
    %321 = vector.broadcast %cst_142 : f32 to vector<8x8xf32>
    %322 = arith.addf %321, %320 : vector<8x8xf32>
    %323 = arith.mulf %315, %322 : vector<8x8xf32>
    %cst_143 = arith.constant -0.284496725 : f32
    %324 = vector.broadcast %cst_143 : f32 to vector<8x8xf32>
    %325 = arith.addf %324, %323 : vector<8x8xf32>
    %326 = arith.mulf %315, %325 : vector<8x8xf32>
    %cst_144 = arith.constant 0.254829586 : f32
    %327 = vector.broadcast %cst_144 : f32 to vector<8x8xf32>
    %328 = arith.addf %327, %326 : vector<8x8xf32>
    %329 = arith.mulf %315, %328 : vector<8x8xf32>
    %cst_145 = arith.constant 0.000000e+00 : f32
    %330 = vector.broadcast %cst_145 : f32 to vector<8x8xf32>
    %331 = arith.subf %330, %309 : vector<8x8xf32>
    %332 = arith.mulf %331, %309 : vector<8x8xf32>
    %333 = math.exp %332 : vector<8x8xf32>
    %334 = arith.mulf %329, %333 : vector<8x8xf32>
    %cst_146 = arith.constant 1.000000e+00 : f32
    %335 = vector.broadcast %cst_146 : f32 to vector<8x8xf32>
    %336 = arith.subf %335, %334 : vector<8x8xf32>
    %cst_147 = arith.constant 0.000000e+00 : f32
    %337 = vector.broadcast %cst_147 : f32 to vector<8x8xf32>
    %338 = arith.cmpf olt, %308, %337 : vector<8x8xf32>
    %cst_148 = arith.constant 0.000000e+00 : f32
    %339 = vector.broadcast %cst_148 : f32 to vector<8x8xf32>
    %340 = arith.subf %339, %336 : vector<8x8xf32>
    %341 = arith.select %338, %340, %336 : vector<8x8xi1>, vector<8x8xf32>
    %cst_149 = arith.constant 1.000000e+00 : f32
    %342 = vector.broadcast %cst_149 : f32 to vector<8x8xf32>
    %343 = arith.addf %342, %341 : vector<8x8xf32>
    %344 = arith.mulf %306, %343 : vector<8x8xf32>
    %345 = vector.broadcast %171 : f32 to vector<8x8xf32>
    %346 = arith.mulf %345, %344 : vector<8x8xf32>
    %347 = vector.broadcast %172 : f32 to vector<8x8xf32>
    %348 = arith.mulf %347, %344 : vector<8x8xf32>
    %349 = vector.broadcast %173 : f32 to vector<8x8xf32>
    %350 = arith.mulf %349, %344 : vector<8x8xf32>
    %351 = vector.broadcast %174 : f32 to vector<8x8xf32>
    %352 = arith.mulf %351, %344 : vector<8x8xf32>
    %353 = vector.broadcast %175 : f32 to vector<8x8xf32>
    %354 = arith.mulf %353, %344 : vector<8x8xf32>
    %355 = vector.broadcast %176 : f32 to vector<8x8xf32>
    %356 = arith.mulf %355, %344 : vector<8x8xf32>
    %357 = vector.broadcast %177 : f32 to vector<8x8xf32>
    %358 = arith.mulf %357, %344 : vector<8x8xf32>
    %359 = vector.broadcast %178 : f32 to vector<8x8xf32>
    %360 = arith.mulf %359, %344 : vector<8x8xf32>
    %361 = vector.broadcast %179 : f32 to vector<8x8xf32>
    %362 = arith.mulf %361, %344 : vector<8x8xf32>
    %363 = vector.broadcast %108 : f32 to vector<8x8xf32>
    %364 = arith.mulf %363, %272 : vector<8x8xf32>
    %365 = arith.addf %246, %364 : vector<8x8xf32>
    %366 = vector.broadcast %109 : f32 to vector<8x8xf32>
    %367 = arith.mulf %366, %270 : vector<8x8xf32>
    %368 = arith.addf %365, %367 : vector<8x8xf32>
    %369 = vector.broadcast %110 : f32 to vector<8x8xf32>
    %370 = arith.mulf %369, %273 : vector<8x8xf32>
    %371 = arith.addf %368, %370 : vector<8x8xf32>
    %372 = vector.broadcast %111 : f32 to vector<8x8xf32>
    %373 = arith.mulf %372, %274 : vector<8x8xf32>
    %374 = arith.addf %371, %373 : vector<8x8xf32>
    %375 = vector.broadcast %112 : f32 to vector<8x8xf32>
    %376 = arith.mulf %375, %263 : vector<8x8xf32>
    %377 = arith.addf %374, %376 : vector<8x8xf32>
    %378 = vector.broadcast %113 : f32 to vector<8x8xf32>
    %379 = arith.mulf %378, %275 : vector<8x8xf32>
    %380 = arith.addf %377, %379 : vector<8x8xf32>
    %381 = vector.broadcast %114 : f32 to vector<8x8xf32>
    %382 = arith.mulf %381, %276 : vector<8x8xf32>
    %383 = arith.addf %380, %382 : vector<8x8xf32>
    %384 = vector.broadcast %115 : f32 to vector<8x8xf32>
    %385 = arith.mulf %384, %271 : vector<8x8xf32>
    %386 = arith.addf %383, %385 : vector<8x8xf32>
    %387 = vector.broadcast %116 : f32 to vector<8x8xf32>
    %388 = arith.mulf %387, %277 : vector<8x8xf32>
    %389 = arith.addf %386, %388 : vector<8x8xf32>
    %cst_150 = arith.constant 5.000000e-01 : f32
    %390 = vector.broadcast %cst_150 : f32 to vector<8x8xf32>
    %391 = arith.mulf %390, %389 : vector<8x8xf32>
    %cst_151 = arith.constant 0.707106769 : f32
    %392 = vector.broadcast %cst_151 : f32 to vector<8x8xf32>
    %393 = arith.mulf %389, %392 : vector<8x8xf32>
    %394 = math.absf %393 : vector<8x8xf32>
    %cst_152 = arith.constant 0.327591091 : f32
    %395 = vector.broadcast %cst_152 : f32 to vector<8x8xf32>
    %396 = arith.mulf %395, %394 : vector<8x8xf32>
    %cst_153 = arith.constant 1.000000e+00 : f32
    %397 = vector.broadcast %cst_153 : f32 to vector<8x8xf32>
    %398 = arith.addf %397, %396 : vector<8x8xf32>
    %cst_154 = arith.constant 1.000000e+00 : f32
    %399 = vector.broadcast %cst_154 : f32 to vector<8x8xf32>
    %400 = arith.divf %399, %398 : vector<8x8xf32>
    %cst_155 = arith.constant 1.06140542 : f32
    %401 = vector.broadcast %cst_155 : f32 to vector<8x8xf32>
    %402 = arith.mulf %400, %401 : vector<8x8xf32>
    %cst_156 = arith.constant -1.45315206 : f32
    %403 = vector.broadcast %cst_156 : f32 to vector<8x8xf32>
    %404 = arith.addf %403, %402 : vector<8x8xf32>
    %405 = arith.mulf %400, %404 : vector<8x8xf32>
    %cst_157 = arith.constant 1.42141378 : f32
    %406 = vector.broadcast %cst_157 : f32 to vector<8x8xf32>
    %407 = arith.addf %406, %405 : vector<8x8xf32>
    %408 = arith.mulf %400, %407 : vector<8x8xf32>
    %cst_158 = arith.constant -0.284496725 : f32
    %409 = vector.broadcast %cst_158 : f32 to vector<8x8xf32>
    %410 = arith.addf %409, %408 : vector<8x8xf32>
    %411 = arith.mulf %400, %410 : vector<8x8xf32>
    %cst_159 = arith.constant 0.254829586 : f32
    %412 = vector.broadcast %cst_159 : f32 to vector<8x8xf32>
    %413 = arith.addf %412, %411 : vector<8x8xf32>
    %414 = arith.mulf %400, %413 : vector<8x8xf32>
    %cst_160 = arith.constant 0.000000e+00 : f32
    %415 = vector.broadcast %cst_160 : f32 to vector<8x8xf32>
    %416 = arith.subf %415, %394 : vector<8x8xf32>
    %417 = arith.mulf %416, %394 : vector<8x8xf32>
    %418 = math.exp %417 : vector<8x8xf32>
    %419 = arith.mulf %414, %418 : vector<8x8xf32>
    %cst_161 = arith.constant 1.000000e+00 : f32
    %420 = vector.broadcast %cst_161 : f32 to vector<8x8xf32>
    %421 = arith.subf %420, %419 : vector<8x8xf32>
    %cst_162 = arith.constant 0.000000e+00 : f32
    %422 = vector.broadcast %cst_162 : f32 to vector<8x8xf32>
    %423 = arith.cmpf olt, %393, %422 : vector<8x8xf32>
    %cst_163 = arith.constant 0.000000e+00 : f32
    %424 = vector.broadcast %cst_163 : f32 to vector<8x8xf32>
    %425 = arith.subf %424, %421 : vector<8x8xf32>
    %426 = arith.select %423, %425, %421 : vector<8x8xi1>, vector<8x8xf32>
    %cst_164 = arith.constant 1.000000e+00 : f32
    %427 = vector.broadcast %cst_164 : f32 to vector<8x8xf32>
    %428 = arith.addf %427, %426 : vector<8x8xf32>
    %429 = arith.mulf %391, %428 : vector<8x8xf32>
    %430 = vector.broadcast %180 : f32 to vector<8x8xf32>
    %431 = arith.mulf %430, %429 : vector<8x8xf32>
    %432 = arith.addf %346, %431 : vector<8x8xf32>
    %433 = vector.broadcast %181 : f32 to vector<8x8xf32>
    %434 = arith.mulf %433, %429 : vector<8x8xf32>
    %435 = arith.addf %348, %434 : vector<8x8xf32>
    %436 = vector.broadcast %182 : f32 to vector<8x8xf32>
    %437 = arith.mulf %436, %429 : vector<8x8xf32>
    %438 = arith.addf %350, %437 : vector<8x8xf32>
    %439 = vector.broadcast %183 : f32 to vector<8x8xf32>
    %440 = arith.mulf %439, %429 : vector<8x8xf32>
    %441 = arith.addf %352, %440 : vector<8x8xf32>
    %442 = vector.broadcast %184 : f32 to vector<8x8xf32>
    %443 = arith.mulf %442, %429 : vector<8x8xf32>
    %444 = arith.addf %354, %443 : vector<8x8xf32>
    %445 = vector.broadcast %185 : f32 to vector<8x8xf32>
    %446 = arith.mulf %445, %429 : vector<8x8xf32>
    %447 = arith.addf %356, %446 : vector<8x8xf32>
    %448 = vector.broadcast %186 : f32 to vector<8x8xf32>
    %449 = arith.mulf %448, %429 : vector<8x8xf32>
    %450 = arith.addf %358, %449 : vector<8x8xf32>
    %451 = vector.broadcast %187 : f32 to vector<8x8xf32>
    %452 = arith.mulf %451, %429 : vector<8x8xf32>
    %453 = arith.addf %360, %452 : vector<8x8xf32>
    %454 = vector.broadcast %188 : f32 to vector<8x8xf32>
    %455 = arith.mulf %454, %429 : vector<8x8xf32>
    %456 = arith.addf %362, %455 : vector<8x8xf32>
    %457 = vector.broadcast %117 : f32 to vector<8x8xf32>
    %458 = arith.mulf %457, %272 : vector<8x8xf32>
    %459 = arith.addf %248, %458 : vector<8x8xf32>
    %460 = vector.broadcast %118 : f32 to vector<8x8xf32>
    %461 = arith.mulf %460, %270 : vector<8x8xf32>
    %462 = arith.addf %459, %461 : vector<8x8xf32>
    %463 = vector.broadcast %119 : f32 to vector<8x8xf32>
    %464 = arith.mulf %463, %273 : vector<8x8xf32>
    %465 = arith.addf %462, %464 : vector<8x8xf32>
    %466 = vector.broadcast %120 : f32 to vector<8x8xf32>
    %467 = arith.mulf %466, %274 : vector<8x8xf32>
    %468 = arith.addf %465, %467 : vector<8x8xf32>
    %469 = vector.broadcast %121 : f32 to vector<8x8xf32>
    %470 = arith.mulf %469, %263 : vector<8x8xf32>
    %471 = arith.addf %468, %470 : vector<8x8xf32>
    %472 = vector.broadcast %122 : f32 to vector<8x8xf32>
    %473 = arith.mulf %472, %275 : vector<8x8xf32>
    %474 = arith.addf %471, %473 : vector<8x8xf32>
    %475 = vector.broadcast %123 : f32 to vector<8x8xf32>
    %476 = arith.mulf %475, %276 : vector<8x8xf32>
    %477 = arith.addf %474, %476 : vector<8x8xf32>
    %478 = vector.broadcast %124 : f32 to vector<8x8xf32>
    %479 = arith.mulf %478, %271 : vector<8x8xf32>
    %480 = arith.addf %477, %479 : vector<8x8xf32>
    %481 = vector.broadcast %125 : f32 to vector<8x8xf32>
    %482 = arith.mulf %481, %277 : vector<8x8xf32>
    %483 = arith.addf %480, %482 : vector<8x8xf32>
    %cst_165 = arith.constant 5.000000e-01 : f32
    %484 = vector.broadcast %cst_165 : f32 to vector<8x8xf32>
    %485 = arith.mulf %484, %483 : vector<8x8xf32>
    %cst_166 = arith.constant 0.707106769 : f32
    %486 = vector.broadcast %cst_166 : f32 to vector<8x8xf32>
    %487 = arith.mulf %483, %486 : vector<8x8xf32>
    %488 = math.absf %487 : vector<8x8xf32>
    %cst_167 = arith.constant 0.327591091 : f32
    %489 = vector.broadcast %cst_167 : f32 to vector<8x8xf32>
    %490 = arith.mulf %489, %488 : vector<8x8xf32>
    %cst_168 = arith.constant 1.000000e+00 : f32
    %491 = vector.broadcast %cst_168 : f32 to vector<8x8xf32>
    %492 = arith.addf %491, %490 : vector<8x8xf32>
    %cst_169 = arith.constant 1.000000e+00 : f32
    %493 = vector.broadcast %cst_169 : f32 to vector<8x8xf32>
    %494 = arith.divf %493, %492 : vector<8x8xf32>
    %cst_170 = arith.constant 1.06140542 : f32
    %495 = vector.broadcast %cst_170 : f32 to vector<8x8xf32>
    %496 = arith.mulf %494, %495 : vector<8x8xf32>
    %cst_171 = arith.constant -1.45315206 : f32
    %497 = vector.broadcast %cst_171 : f32 to vector<8x8xf32>
    %498 = arith.addf %497, %496 : vector<8x8xf32>
    %499 = arith.mulf %494, %498 : vector<8x8xf32>
    %cst_172 = arith.constant 1.42141378 : f32
    %500 = vector.broadcast %cst_172 : f32 to vector<8x8xf32>
    %501 = arith.addf %500, %499 : vector<8x8xf32>
    %502 = arith.mulf %494, %501 : vector<8x8xf32>
    %cst_173 = arith.constant -0.284496725 : f32
    %503 = vector.broadcast %cst_173 : f32 to vector<8x8xf32>
    %504 = arith.addf %503, %502 : vector<8x8xf32>
    %505 = arith.mulf %494, %504 : vector<8x8xf32>
    %cst_174 = arith.constant 0.254829586 : f32
    %506 = vector.broadcast %cst_174 : f32 to vector<8x8xf32>
    %507 = arith.addf %506, %505 : vector<8x8xf32>
    %508 = arith.mulf %494, %507 : vector<8x8xf32>
    %cst_175 = arith.constant 0.000000e+00 : f32
    %509 = vector.broadcast %cst_175 : f32 to vector<8x8xf32>
    %510 = arith.subf %509, %488 : vector<8x8xf32>
    %511 = arith.mulf %510, %488 : vector<8x8xf32>
    %512 = math.exp %511 : vector<8x8xf32>
    %513 = arith.mulf %508, %512 : vector<8x8xf32>
    %cst_176 = arith.constant 1.000000e+00 : f32
    %514 = vector.broadcast %cst_176 : f32 to vector<8x8xf32>
    %515 = arith.subf %514, %513 : vector<8x8xf32>
    %cst_177 = arith.constant 0.000000e+00 : f32
    %516 = vector.broadcast %cst_177 : f32 to vector<8x8xf32>
    %517 = arith.cmpf olt, %487, %516 : vector<8x8xf32>
    %cst_178 = arith.constant 0.000000e+00 : f32
    %518 = vector.broadcast %cst_178 : f32 to vector<8x8xf32>
    %519 = arith.subf %518, %515 : vector<8x8xf32>
    %520 = arith.select %517, %519, %515 : vector<8x8xi1>, vector<8x8xf32>
    %cst_179 = arith.constant 1.000000e+00 : f32
    %521 = vector.broadcast %cst_179 : f32 to vector<8x8xf32>
    %522 = arith.addf %521, %520 : vector<8x8xf32>
    %523 = arith.mulf %485, %522 : vector<8x8xf32>
    %524 = vector.broadcast %189 : f32 to vector<8x8xf32>
    %525 = arith.mulf %524, %523 : vector<8x8xf32>
    %526 = arith.addf %432, %525 : vector<8x8xf32>
    %527 = vector.broadcast %190 : f32 to vector<8x8xf32>
    %528 = arith.mulf %527, %523 : vector<8x8xf32>
    %529 = arith.addf %435, %528 : vector<8x8xf32>
    %530 = vector.broadcast %191 : f32 to vector<8x8xf32>
    %531 = arith.mulf %530, %523 : vector<8x8xf32>
    %532 = arith.addf %438, %531 : vector<8x8xf32>
    %533 = vector.broadcast %192 : f32 to vector<8x8xf32>
    %534 = arith.mulf %533, %523 : vector<8x8xf32>
    %535 = arith.addf %441, %534 : vector<8x8xf32>
    %536 = vector.broadcast %193 : f32 to vector<8x8xf32>
    %537 = arith.mulf %536, %523 : vector<8x8xf32>
    %538 = arith.addf %444, %537 : vector<8x8xf32>
    %539 = vector.broadcast %194 : f32 to vector<8x8xf32>
    %540 = arith.mulf %539, %523 : vector<8x8xf32>
    %541 = arith.addf %447, %540 : vector<8x8xf32>
    %542 = vector.broadcast %195 : f32 to vector<8x8xf32>
    %543 = arith.mulf %542, %523 : vector<8x8xf32>
    %544 = arith.addf %450, %543 : vector<8x8xf32>
    %545 = vector.broadcast %196 : f32 to vector<8x8xf32>
    %546 = arith.mulf %545, %523 : vector<8x8xf32>
    %547 = arith.addf %453, %546 : vector<8x8xf32>
    %548 = vector.broadcast %197 : f32 to vector<8x8xf32>
    %549 = arith.mulf %548, %523 : vector<8x8xf32>
    %550 = arith.addf %456, %549 : vector<8x8xf32>
    %551 = vector.broadcast %126 : f32 to vector<8x8xf32>
    %552 = arith.mulf %551, %272 : vector<8x8xf32>
    %553 = arith.addf %250, %552 : vector<8x8xf32>
    %554 = vector.broadcast %127 : f32 to vector<8x8xf32>
    %555 = arith.mulf %554, %270 : vector<8x8xf32>
    %556 = arith.addf %553, %555 : vector<8x8xf32>
    %557 = vector.broadcast %128 : f32 to vector<8x8xf32>
    %558 = arith.mulf %557, %273 : vector<8x8xf32>
    %559 = arith.addf %556, %558 : vector<8x8xf32>
    %560 = vector.broadcast %129 : f32 to vector<8x8xf32>
    %561 = arith.mulf %560, %274 : vector<8x8xf32>
    %562 = arith.addf %559, %561 : vector<8x8xf32>
    %563 = vector.broadcast %130 : f32 to vector<8x8xf32>
    %564 = arith.mulf %563, %263 : vector<8x8xf32>
    %565 = arith.addf %562, %564 : vector<8x8xf32>
    %566 = vector.broadcast %131 : f32 to vector<8x8xf32>
    %567 = arith.mulf %566, %275 : vector<8x8xf32>
    %568 = arith.addf %565, %567 : vector<8x8xf32>
    %569 = vector.broadcast %132 : f32 to vector<8x8xf32>
    %570 = arith.mulf %569, %276 : vector<8x8xf32>
    %571 = arith.addf %568, %570 : vector<8x8xf32>
    %572 = vector.broadcast %133 : f32 to vector<8x8xf32>
    %573 = arith.mulf %572, %271 : vector<8x8xf32>
    %574 = arith.addf %571, %573 : vector<8x8xf32>
    %575 = vector.broadcast %134 : f32 to vector<8x8xf32>
    %576 = arith.mulf %575, %277 : vector<8x8xf32>
    %577 = arith.addf %574, %576 : vector<8x8xf32>
    %cst_180 = arith.constant 5.000000e-01 : f32
    %578 = vector.broadcast %cst_180 : f32 to vector<8x8xf32>
    %579 = arith.mulf %578, %577 : vector<8x8xf32>
    %cst_181 = arith.constant 0.707106769 : f32
    %580 = vector.broadcast %cst_181 : f32 to vector<8x8xf32>
    %581 = arith.mulf %577, %580 : vector<8x8xf32>
    %582 = math.absf %581 : vector<8x8xf32>
    %cst_182 = arith.constant 0.327591091 : f32
    %583 = vector.broadcast %cst_182 : f32 to vector<8x8xf32>
    %584 = arith.mulf %583, %582 : vector<8x8xf32>
    %cst_183 = arith.constant 1.000000e+00 : f32
    %585 = vector.broadcast %cst_183 : f32 to vector<8x8xf32>
    %586 = arith.addf %585, %584 : vector<8x8xf32>
    %cst_184 = arith.constant 1.000000e+00 : f32
    %587 = vector.broadcast %cst_184 : f32 to vector<8x8xf32>
    %588 = arith.divf %587, %586 : vector<8x8xf32>
    %cst_185 = arith.constant 1.06140542 : f32
    %589 = vector.broadcast %cst_185 : f32 to vector<8x8xf32>
    %590 = arith.mulf %588, %589 : vector<8x8xf32>
    %cst_186 = arith.constant -1.45315206 : f32
    %591 = vector.broadcast %cst_186 : f32 to vector<8x8xf32>
    %592 = arith.addf %591, %590 : vector<8x8xf32>
    %593 = arith.mulf %588, %592 : vector<8x8xf32>
    %cst_187 = arith.constant 1.42141378 : f32
    %594 = vector.broadcast %cst_187 : f32 to vector<8x8xf32>
    %595 = arith.addf %594, %593 : vector<8x8xf32>
    %596 = arith.mulf %588, %595 : vector<8x8xf32>
    %cst_188 = arith.constant -0.284496725 : f32
    %597 = vector.broadcast %cst_188 : f32 to vector<8x8xf32>
    %598 = arith.addf %597, %596 : vector<8x8xf32>
    %599 = arith.mulf %588, %598 : vector<8x8xf32>
    %cst_189 = arith.constant 0.254829586 : f32
    %600 = vector.broadcast %cst_189 : f32 to vector<8x8xf32>
    %601 = arith.addf %600, %599 : vector<8x8xf32>
    %602 = arith.mulf %588, %601 : vector<8x8xf32>
    %cst_190 = arith.constant 0.000000e+00 : f32
    %603 = vector.broadcast %cst_190 : f32 to vector<8x8xf32>
    %604 = arith.subf %603, %582 : vector<8x8xf32>
    %605 = arith.mulf %604, %582 : vector<8x8xf32>
    %606 = math.exp %605 : vector<8x8xf32>
    %607 = arith.mulf %602, %606 : vector<8x8xf32>
    %cst_191 = arith.constant 1.000000e+00 : f32
    %608 = vector.broadcast %cst_191 : f32 to vector<8x8xf32>
    %609 = arith.subf %608, %607 : vector<8x8xf32>
    %cst_192 = arith.constant 0.000000e+00 : f32
    %610 = vector.broadcast %cst_192 : f32 to vector<8x8xf32>
    %611 = arith.cmpf olt, %581, %610 : vector<8x8xf32>
    %cst_193 = arith.constant 0.000000e+00 : f32
    %612 = vector.broadcast %cst_193 : f32 to vector<8x8xf32>
    %613 = arith.subf %612, %609 : vector<8x8xf32>
    %614 = arith.select %611, %613, %609 : vector<8x8xi1>, vector<8x8xf32>
    %cst_194 = arith.constant 1.000000e+00 : f32
    %615 = vector.broadcast %cst_194 : f32 to vector<8x8xf32>
    %616 = arith.addf %615, %614 : vector<8x8xf32>
    %617 = arith.mulf %579, %616 : vector<8x8xf32>
    %618 = vector.broadcast %198 : f32 to vector<8x8xf32>
    %619 = arith.mulf %618, %617 : vector<8x8xf32>
    %620 = arith.addf %526, %619 : vector<8x8xf32>
    %621 = vector.broadcast %199 : f32 to vector<8x8xf32>
    %622 = arith.mulf %621, %617 : vector<8x8xf32>
    %623 = arith.addf %529, %622 : vector<8x8xf32>
    %624 = vector.broadcast %200 : f32 to vector<8x8xf32>
    %625 = arith.mulf %624, %617 : vector<8x8xf32>
    %626 = arith.addf %532, %625 : vector<8x8xf32>
    %627 = vector.broadcast %201 : f32 to vector<8x8xf32>
    %628 = arith.mulf %627, %617 : vector<8x8xf32>
    %629 = arith.addf %535, %628 : vector<8x8xf32>
    %630 = vector.broadcast %202 : f32 to vector<8x8xf32>
    %631 = arith.mulf %630, %617 : vector<8x8xf32>
    %632 = arith.addf %538, %631 : vector<8x8xf32>
    %633 = vector.broadcast %203 : f32 to vector<8x8xf32>
    %634 = arith.mulf %633, %617 : vector<8x8xf32>
    %635 = arith.addf %541, %634 : vector<8x8xf32>
    %636 = vector.broadcast %204 : f32 to vector<8x8xf32>
    %637 = arith.mulf %636, %617 : vector<8x8xf32>
    %638 = arith.addf %544, %637 : vector<8x8xf32>
    %639 = vector.broadcast %205 : f32 to vector<8x8xf32>
    %640 = arith.mulf %639, %617 : vector<8x8xf32>
    %641 = arith.addf %547, %640 : vector<8x8xf32>
    %642 = vector.broadcast %206 : f32 to vector<8x8xf32>
    %643 = arith.mulf %642, %617 : vector<8x8xf32>
    %644 = arith.addf %550, %643 : vector<8x8xf32>
    %645 = vector.broadcast %135 : f32 to vector<8x8xf32>
    %646 = arith.mulf %645, %272 : vector<8x8xf32>
    %647 = arith.addf %252, %646 : vector<8x8xf32>
    %648 = vector.broadcast %136 : f32 to vector<8x8xf32>
    %649 = arith.mulf %648, %270 : vector<8x8xf32>
    %650 = arith.addf %647, %649 : vector<8x8xf32>
    %651 = vector.broadcast %137 : f32 to vector<8x8xf32>
    %652 = arith.mulf %651, %273 : vector<8x8xf32>
    %653 = arith.addf %650, %652 : vector<8x8xf32>
    %654 = vector.broadcast %138 : f32 to vector<8x8xf32>
    %655 = arith.mulf %654, %274 : vector<8x8xf32>
    %656 = arith.addf %653, %655 : vector<8x8xf32>
    %657 = vector.broadcast %139 : f32 to vector<8x8xf32>
    %658 = arith.mulf %657, %263 : vector<8x8xf32>
    %659 = arith.addf %656, %658 : vector<8x8xf32>
    %660 = vector.broadcast %140 : f32 to vector<8x8xf32>
    %661 = arith.mulf %660, %275 : vector<8x8xf32>
    %662 = arith.addf %659, %661 : vector<8x8xf32>
    %663 = vector.broadcast %141 : f32 to vector<8x8xf32>
    %664 = arith.mulf %663, %276 : vector<8x8xf32>
    %665 = arith.addf %662, %664 : vector<8x8xf32>
    %666 = vector.broadcast %142 : f32 to vector<8x8xf32>
    %667 = arith.mulf %666, %271 : vector<8x8xf32>
    %668 = arith.addf %665, %667 : vector<8x8xf32>
    %669 = vector.broadcast %143 : f32 to vector<8x8xf32>
    %670 = arith.mulf %669, %277 : vector<8x8xf32>
    %671 = arith.addf %668, %670 : vector<8x8xf32>
    %cst_195 = arith.constant 5.000000e-01 : f32
    %672 = vector.broadcast %cst_195 : f32 to vector<8x8xf32>
    %673 = arith.mulf %672, %671 : vector<8x8xf32>
    %cst_196 = arith.constant 0.707106769 : f32
    %674 = vector.broadcast %cst_196 : f32 to vector<8x8xf32>
    %675 = arith.mulf %671, %674 : vector<8x8xf32>
    %676 = math.absf %675 : vector<8x8xf32>
    %cst_197 = arith.constant 0.327591091 : f32
    %677 = vector.broadcast %cst_197 : f32 to vector<8x8xf32>
    %678 = arith.mulf %677, %676 : vector<8x8xf32>
    %cst_198 = arith.constant 1.000000e+00 : f32
    %679 = vector.broadcast %cst_198 : f32 to vector<8x8xf32>
    %680 = arith.addf %679, %678 : vector<8x8xf32>
    %cst_199 = arith.constant 1.000000e+00 : f32
    %681 = vector.broadcast %cst_199 : f32 to vector<8x8xf32>
    %682 = arith.divf %681, %680 : vector<8x8xf32>
    %cst_200 = arith.constant 1.06140542 : f32
    %683 = vector.broadcast %cst_200 : f32 to vector<8x8xf32>
    %684 = arith.mulf %682, %683 : vector<8x8xf32>
    %cst_201 = arith.constant -1.45315206 : f32
    %685 = vector.broadcast %cst_201 : f32 to vector<8x8xf32>
    %686 = arith.addf %685, %684 : vector<8x8xf32>
    %687 = arith.mulf %682, %686 : vector<8x8xf32>
    %cst_202 = arith.constant 1.42141378 : f32
    %688 = vector.broadcast %cst_202 : f32 to vector<8x8xf32>
    %689 = arith.addf %688, %687 : vector<8x8xf32>
    %690 = arith.mulf %682, %689 : vector<8x8xf32>
    %cst_203 = arith.constant -0.284496725 : f32
    %691 = vector.broadcast %cst_203 : f32 to vector<8x8xf32>
    %692 = arith.addf %691, %690 : vector<8x8xf32>
    %693 = arith.mulf %682, %692 : vector<8x8xf32>
    %cst_204 = arith.constant 0.254829586 : f32
    %694 = vector.broadcast %cst_204 : f32 to vector<8x8xf32>
    %695 = arith.addf %694, %693 : vector<8x8xf32>
    %696 = arith.mulf %682, %695 : vector<8x8xf32>
    %cst_205 = arith.constant 0.000000e+00 : f32
    %697 = vector.broadcast %cst_205 : f32 to vector<8x8xf32>
    %698 = arith.subf %697, %676 : vector<8x8xf32>
    %699 = arith.mulf %698, %676 : vector<8x8xf32>
    %700 = math.exp %699 : vector<8x8xf32>
    %701 = arith.mulf %696, %700 : vector<8x8xf32>
    %cst_206 = arith.constant 1.000000e+00 : f32
    %702 = vector.broadcast %cst_206 : f32 to vector<8x8xf32>
    %703 = arith.subf %702, %701 : vector<8x8xf32>
    %cst_207 = arith.constant 0.000000e+00 : f32
    %704 = vector.broadcast %cst_207 : f32 to vector<8x8xf32>
    %705 = arith.cmpf olt, %675, %704 : vector<8x8xf32>
    %cst_208 = arith.constant 0.000000e+00 : f32
    %706 = vector.broadcast %cst_208 : f32 to vector<8x8xf32>
    %707 = arith.subf %706, %703 : vector<8x8xf32>
    %708 = arith.select %705, %707, %703 : vector<8x8xi1>, vector<8x8xf32>
    %cst_209 = arith.constant 1.000000e+00 : f32
    %709 = vector.broadcast %cst_209 : f32 to vector<8x8xf32>
    %710 = arith.addf %709, %708 : vector<8x8xf32>
    %711 = arith.mulf %673, %710 : vector<8x8xf32>
    %712 = vector.broadcast %207 : f32 to vector<8x8xf32>
    %713 = arith.mulf %712, %711 : vector<8x8xf32>
    %714 = arith.addf %620, %713 : vector<8x8xf32>
    %715 = vector.broadcast %208 : f32 to vector<8x8xf32>
    %716 = arith.mulf %715, %711 : vector<8x8xf32>
    %717 = arith.addf %623, %716 : vector<8x8xf32>
    %718 = vector.broadcast %209 : f32 to vector<8x8xf32>
    %719 = arith.mulf %718, %711 : vector<8x8xf32>
    %720 = arith.addf %626, %719 : vector<8x8xf32>
    %721 = vector.broadcast %210 : f32 to vector<8x8xf32>
    %722 = arith.mulf %721, %711 : vector<8x8xf32>
    %723 = arith.addf %629, %722 : vector<8x8xf32>
    %724 = vector.broadcast %211 : f32 to vector<8x8xf32>
    %725 = arith.mulf %724, %711 : vector<8x8xf32>
    %726 = arith.addf %632, %725 : vector<8x8xf32>
    %727 = vector.broadcast %212 : f32 to vector<8x8xf32>
    %728 = arith.mulf %727, %711 : vector<8x8xf32>
    %729 = arith.addf %635, %728 : vector<8x8xf32>
    %730 = vector.broadcast %213 : f32 to vector<8x8xf32>
    %731 = arith.mulf %730, %711 : vector<8x8xf32>
    %732 = arith.addf %638, %731 : vector<8x8xf32>
    %733 = vector.broadcast %214 : f32 to vector<8x8xf32>
    %734 = arith.mulf %733, %711 : vector<8x8xf32>
    %735 = arith.addf %641, %734 : vector<8x8xf32>
    %736 = vector.broadcast %215 : f32 to vector<8x8xf32>
    %737 = arith.mulf %736, %711 : vector<8x8xf32>
    %738 = arith.addf %644, %737 : vector<8x8xf32>
    %739 = vector.broadcast %144 : f32 to vector<8x8xf32>
    %740 = arith.mulf %739, %272 : vector<8x8xf32>
    %741 = arith.addf %254, %740 : vector<8x8xf32>
    %742 = vector.broadcast %145 : f32 to vector<8x8xf32>
    %743 = arith.mulf %742, %270 : vector<8x8xf32>
    %744 = arith.addf %741, %743 : vector<8x8xf32>
    %745 = vector.broadcast %146 : f32 to vector<8x8xf32>
    %746 = arith.mulf %745, %273 : vector<8x8xf32>
    %747 = arith.addf %744, %746 : vector<8x8xf32>
    %748 = vector.broadcast %147 : f32 to vector<8x8xf32>
    %749 = arith.mulf %748, %274 : vector<8x8xf32>
    %750 = arith.addf %747, %749 : vector<8x8xf32>
    %751 = vector.broadcast %148 : f32 to vector<8x8xf32>
    %752 = arith.mulf %751, %263 : vector<8x8xf32>
    %753 = arith.addf %750, %752 : vector<8x8xf32>
    %754 = vector.broadcast %149 : f32 to vector<8x8xf32>
    %755 = arith.mulf %754, %275 : vector<8x8xf32>
    %756 = arith.addf %753, %755 : vector<8x8xf32>
    %757 = vector.broadcast %150 : f32 to vector<8x8xf32>
    %758 = arith.mulf %757, %276 : vector<8x8xf32>
    %759 = arith.addf %756, %758 : vector<8x8xf32>
    %760 = vector.broadcast %151 : f32 to vector<8x8xf32>
    %761 = arith.mulf %760, %271 : vector<8x8xf32>
    %762 = arith.addf %759, %761 : vector<8x8xf32>
    %763 = vector.broadcast %152 : f32 to vector<8x8xf32>
    %764 = arith.mulf %763, %277 : vector<8x8xf32>
    %765 = arith.addf %762, %764 : vector<8x8xf32>
    %cst_210 = arith.constant 5.000000e-01 : f32
    %766 = vector.broadcast %cst_210 : f32 to vector<8x8xf32>
    %767 = arith.mulf %766, %765 : vector<8x8xf32>
    %cst_211 = arith.constant 0.707106769 : f32
    %768 = vector.broadcast %cst_211 : f32 to vector<8x8xf32>
    %769 = arith.mulf %765, %768 : vector<8x8xf32>
    %770 = math.absf %769 : vector<8x8xf32>
    %cst_212 = arith.constant 0.327591091 : f32
    %771 = vector.broadcast %cst_212 : f32 to vector<8x8xf32>
    %772 = arith.mulf %771, %770 : vector<8x8xf32>
    %cst_213 = arith.constant 1.000000e+00 : f32
    %773 = vector.broadcast %cst_213 : f32 to vector<8x8xf32>
    %774 = arith.addf %773, %772 : vector<8x8xf32>
    %cst_214 = arith.constant 1.000000e+00 : f32
    %775 = vector.broadcast %cst_214 : f32 to vector<8x8xf32>
    %776 = arith.divf %775, %774 : vector<8x8xf32>
    %cst_215 = arith.constant 1.06140542 : f32
    %777 = vector.broadcast %cst_215 : f32 to vector<8x8xf32>
    %778 = arith.mulf %776, %777 : vector<8x8xf32>
    %cst_216 = arith.constant -1.45315206 : f32
    %779 = vector.broadcast %cst_216 : f32 to vector<8x8xf32>
    %780 = arith.addf %779, %778 : vector<8x8xf32>
    %781 = arith.mulf %776, %780 : vector<8x8xf32>
    %cst_217 = arith.constant 1.42141378 : f32
    %782 = vector.broadcast %cst_217 : f32 to vector<8x8xf32>
    %783 = arith.addf %782, %781 : vector<8x8xf32>
    %784 = arith.mulf %776, %783 : vector<8x8xf32>
    %cst_218 = arith.constant -0.284496725 : f32
    %785 = vector.broadcast %cst_218 : f32 to vector<8x8xf32>
    %786 = arith.addf %785, %784 : vector<8x8xf32>
    %787 = arith.mulf %776, %786 : vector<8x8xf32>
    %cst_219 = arith.constant 0.254829586 : f32
    %788 = vector.broadcast %cst_219 : f32 to vector<8x8xf32>
    %789 = arith.addf %788, %787 : vector<8x8xf32>
    %790 = arith.mulf %776, %789 : vector<8x8xf32>
    %cst_220 = arith.constant 0.000000e+00 : f32
    %791 = vector.broadcast %cst_220 : f32 to vector<8x8xf32>
    %792 = arith.subf %791, %770 : vector<8x8xf32>
    %793 = arith.mulf %792, %770 : vector<8x8xf32>
    %794 = math.exp %793 : vector<8x8xf32>
    %795 = arith.mulf %790, %794 : vector<8x8xf32>
    %cst_221 = arith.constant 1.000000e+00 : f32
    %796 = vector.broadcast %cst_221 : f32 to vector<8x8xf32>
    %797 = arith.subf %796, %795 : vector<8x8xf32>
    %cst_222 = arith.constant 0.000000e+00 : f32
    %798 = vector.broadcast %cst_222 : f32 to vector<8x8xf32>
    %799 = arith.cmpf olt, %769, %798 : vector<8x8xf32>
    %cst_223 = arith.constant 0.000000e+00 : f32
    %800 = vector.broadcast %cst_223 : f32 to vector<8x8xf32>
    %801 = arith.subf %800, %797 : vector<8x8xf32>
    %802 = arith.select %799, %801, %797 : vector<8x8xi1>, vector<8x8xf32>
    %cst_224 = arith.constant 1.000000e+00 : f32
    %803 = vector.broadcast %cst_224 : f32 to vector<8x8xf32>
    %804 = arith.addf %803, %802 : vector<8x8xf32>
    %805 = arith.mulf %767, %804 : vector<8x8xf32>
    %806 = vector.broadcast %216 : f32 to vector<8x8xf32>
    %807 = arith.mulf %806, %805 : vector<8x8xf32>
    %808 = arith.addf %714, %807 : vector<8x8xf32>
    %809 = vector.broadcast %217 : f32 to vector<8x8xf32>
    %810 = arith.mulf %809, %805 : vector<8x8xf32>
    %811 = arith.addf %717, %810 : vector<8x8xf32>
    %812 = vector.broadcast %218 : f32 to vector<8x8xf32>
    %813 = arith.mulf %812, %805 : vector<8x8xf32>
    %814 = arith.addf %720, %813 : vector<8x8xf32>
    %815 = vector.broadcast %219 : f32 to vector<8x8xf32>
    %816 = arith.mulf %815, %805 : vector<8x8xf32>
    %817 = arith.addf %723, %816 : vector<8x8xf32>
    %818 = vector.broadcast %220 : f32 to vector<8x8xf32>
    %819 = arith.mulf %818, %805 : vector<8x8xf32>
    %820 = arith.addf %726, %819 : vector<8x8xf32>
    %821 = vector.broadcast %221 : f32 to vector<8x8xf32>
    %822 = arith.mulf %821, %805 : vector<8x8xf32>
    %823 = arith.addf %729, %822 : vector<8x8xf32>
    %824 = vector.broadcast %222 : f32 to vector<8x8xf32>
    %825 = arith.mulf %824, %805 : vector<8x8xf32>
    %826 = arith.addf %732, %825 : vector<8x8xf32>
    %827 = vector.broadcast %223 : f32 to vector<8x8xf32>
    %828 = arith.mulf %827, %805 : vector<8x8xf32>
    %829 = arith.addf %735, %828 : vector<8x8xf32>
    %830 = vector.broadcast %224 : f32 to vector<8x8xf32>
    %831 = arith.mulf %830, %805 : vector<8x8xf32>
    %832 = arith.addf %738, %831 : vector<8x8xf32>
    %833 = vector.broadcast %153 : f32 to vector<8x8xf32>
    %834 = arith.mulf %833, %272 : vector<8x8xf32>
    %835 = arith.addf %256, %834 : vector<8x8xf32>
    %836 = vector.broadcast %154 : f32 to vector<8x8xf32>
    %837 = arith.mulf %836, %270 : vector<8x8xf32>
    %838 = arith.addf %835, %837 : vector<8x8xf32>
    %839 = vector.broadcast %155 : f32 to vector<8x8xf32>
    %840 = arith.mulf %839, %273 : vector<8x8xf32>
    %841 = arith.addf %838, %840 : vector<8x8xf32>
    %842 = vector.broadcast %156 : f32 to vector<8x8xf32>
    %843 = arith.mulf %842, %274 : vector<8x8xf32>
    %844 = arith.addf %841, %843 : vector<8x8xf32>
    %845 = vector.broadcast %157 : f32 to vector<8x8xf32>
    %846 = arith.mulf %845, %263 : vector<8x8xf32>
    %847 = arith.addf %844, %846 : vector<8x8xf32>
    %848 = vector.broadcast %158 : f32 to vector<8x8xf32>
    %849 = arith.mulf %848, %275 : vector<8x8xf32>
    %850 = arith.addf %847, %849 : vector<8x8xf32>
    %851 = vector.broadcast %159 : f32 to vector<8x8xf32>
    %852 = arith.mulf %851, %276 : vector<8x8xf32>
    %853 = arith.addf %850, %852 : vector<8x8xf32>
    %854 = vector.broadcast %160 : f32 to vector<8x8xf32>
    %855 = arith.mulf %854, %271 : vector<8x8xf32>
    %856 = arith.addf %853, %855 : vector<8x8xf32>
    %857 = vector.broadcast %161 : f32 to vector<8x8xf32>
    %858 = arith.mulf %857, %277 : vector<8x8xf32>
    %859 = arith.addf %856, %858 : vector<8x8xf32>
    %cst_225 = arith.constant 5.000000e-01 : f32
    %860 = vector.broadcast %cst_225 : f32 to vector<8x8xf32>
    %861 = arith.mulf %860, %859 : vector<8x8xf32>
    %cst_226 = arith.constant 0.707106769 : f32
    %862 = vector.broadcast %cst_226 : f32 to vector<8x8xf32>
    %863 = arith.mulf %859, %862 : vector<8x8xf32>
    %864 = math.absf %863 : vector<8x8xf32>
    %cst_227 = arith.constant 0.327591091 : f32
    %865 = vector.broadcast %cst_227 : f32 to vector<8x8xf32>
    %866 = arith.mulf %865, %864 : vector<8x8xf32>
    %cst_228 = arith.constant 1.000000e+00 : f32
    %867 = vector.broadcast %cst_228 : f32 to vector<8x8xf32>
    %868 = arith.addf %867, %866 : vector<8x8xf32>
    %cst_229 = arith.constant 1.000000e+00 : f32
    %869 = vector.broadcast %cst_229 : f32 to vector<8x8xf32>
    %870 = arith.divf %869, %868 : vector<8x8xf32>
    %cst_230 = arith.constant 1.06140542 : f32
    %871 = vector.broadcast %cst_230 : f32 to vector<8x8xf32>
    %872 = arith.mulf %870, %871 : vector<8x8xf32>
    %cst_231 = arith.constant -1.45315206 : f32
    %873 = vector.broadcast %cst_231 : f32 to vector<8x8xf32>
    %874 = arith.addf %873, %872 : vector<8x8xf32>
    %875 = arith.mulf %870, %874 : vector<8x8xf32>
    %cst_232 = arith.constant 1.42141378 : f32
    %876 = vector.broadcast %cst_232 : f32 to vector<8x8xf32>
    %877 = arith.addf %876, %875 : vector<8x8xf32>
    %878 = arith.mulf %870, %877 : vector<8x8xf32>
    %cst_233 = arith.constant -0.284496725 : f32
    %879 = vector.broadcast %cst_233 : f32 to vector<8x8xf32>
    %880 = arith.addf %879, %878 : vector<8x8xf32>
    %881 = arith.mulf %870, %880 : vector<8x8xf32>
    %cst_234 = arith.constant 0.254829586 : f32
    %882 = vector.broadcast %cst_234 : f32 to vector<8x8xf32>
    %883 = arith.addf %882, %881 : vector<8x8xf32>
    %884 = arith.mulf %870, %883 : vector<8x8xf32>
    %cst_235 = arith.constant 0.000000e+00 : f32
    %885 = vector.broadcast %cst_235 : f32 to vector<8x8xf32>
    %886 = arith.subf %885, %864 : vector<8x8xf32>
    %887 = arith.mulf %886, %864 : vector<8x8xf32>
    %888 = math.exp %887 : vector<8x8xf32>
    %889 = arith.mulf %884, %888 : vector<8x8xf32>
    %cst_236 = arith.constant 1.000000e+00 : f32
    %890 = vector.broadcast %cst_236 : f32 to vector<8x8xf32>
    %891 = arith.subf %890, %889 : vector<8x8xf32>
    %cst_237 = arith.constant 0.000000e+00 : f32
    %892 = vector.broadcast %cst_237 : f32 to vector<8x8xf32>
    %893 = arith.cmpf olt, %863, %892 : vector<8x8xf32>
    %cst_238 = arith.constant 0.000000e+00 : f32
    %894 = vector.broadcast %cst_238 : f32 to vector<8x8xf32>
    %895 = arith.subf %894, %891 : vector<8x8xf32>
    %896 = arith.select %893, %895, %891 : vector<8x8xi1>, vector<8x8xf32>
    %cst_239 = arith.constant 1.000000e+00 : f32
    %897 = vector.broadcast %cst_239 : f32 to vector<8x8xf32>
    %898 = arith.addf %897, %896 : vector<8x8xf32>
    %899 = arith.mulf %861, %898 : vector<8x8xf32>
    %900 = vector.broadcast %225 : f32 to vector<8x8xf32>
    %901 = arith.mulf %900, %899 : vector<8x8xf32>
    %902 = arith.addf %808, %901 : vector<8x8xf32>
    %903 = vector.broadcast %226 : f32 to vector<8x8xf32>
    %904 = arith.mulf %903, %899 : vector<8x8xf32>
    %905 = arith.addf %811, %904 : vector<8x8xf32>
    %906 = vector.broadcast %227 : f32 to vector<8x8xf32>
    %907 = arith.mulf %906, %899 : vector<8x8xf32>
    %908 = arith.addf %814, %907 : vector<8x8xf32>
    %909 = vector.broadcast %228 : f32 to vector<8x8xf32>
    %910 = arith.mulf %909, %899 : vector<8x8xf32>
    %911 = arith.addf %817, %910 : vector<8x8xf32>
    %912 = vector.broadcast %229 : f32 to vector<8x8xf32>
    %913 = arith.mulf %912, %899 : vector<8x8xf32>
    %914 = arith.addf %820, %913 : vector<8x8xf32>
    %915 = vector.broadcast %230 : f32 to vector<8x8xf32>
    %916 = arith.mulf %915, %899 : vector<8x8xf32>
    %917 = arith.addf %823, %916 : vector<8x8xf32>
    %918 = vector.broadcast %231 : f32 to vector<8x8xf32>
    %919 = arith.mulf %918, %899 : vector<8x8xf32>
    %920 = arith.addf %826, %919 : vector<8x8xf32>
    %921 = vector.broadcast %232 : f32 to vector<8x8xf32>
    %922 = arith.mulf %921, %899 : vector<8x8xf32>
    %923 = arith.addf %829, %922 : vector<8x8xf32>
    %924 = vector.broadcast %233 : f32 to vector<8x8xf32>
    %925 = arith.mulf %924, %899 : vector<8x8xf32>
    %926 = arith.addf %832, %925 : vector<8x8xf32>
    %927 = vector.broadcast %162 : f32 to vector<8x8xf32>
    %928 = arith.mulf %927, %272 : vector<8x8xf32>
    %929 = arith.addf %258, %928 : vector<8x8xf32>
    %930 = vector.broadcast %163 : f32 to vector<8x8xf32>
    %931 = arith.mulf %930, %270 : vector<8x8xf32>
    %932 = arith.addf %929, %931 : vector<8x8xf32>
    %933 = vector.broadcast %164 : f32 to vector<8x8xf32>
    %934 = arith.mulf %933, %273 : vector<8x8xf32>
    %935 = arith.addf %932, %934 : vector<8x8xf32>
    %936 = vector.broadcast %165 : f32 to vector<8x8xf32>
    %937 = arith.mulf %936, %274 : vector<8x8xf32>
    %938 = arith.addf %935, %937 : vector<8x8xf32>
    %939 = vector.broadcast %166 : f32 to vector<8x8xf32>
    %940 = arith.mulf %939, %263 : vector<8x8xf32>
    %941 = arith.addf %938, %940 : vector<8x8xf32>
    %942 = vector.broadcast %167 : f32 to vector<8x8xf32>
    %943 = arith.mulf %942, %275 : vector<8x8xf32>
    %944 = arith.addf %941, %943 : vector<8x8xf32>
    %945 = vector.broadcast %168 : f32 to vector<8x8xf32>
    %946 = arith.mulf %945, %276 : vector<8x8xf32>
    %947 = arith.addf %944, %946 : vector<8x8xf32>
    %948 = vector.broadcast %169 : f32 to vector<8x8xf32>
    %949 = arith.mulf %948, %271 : vector<8x8xf32>
    %950 = arith.addf %947, %949 : vector<8x8xf32>
    %951 = vector.broadcast %170 : f32 to vector<8x8xf32>
    %952 = arith.mulf %951, %277 : vector<8x8xf32>
    %953 = arith.addf %950, %952 : vector<8x8xf32>
    %cst_240 = arith.constant 5.000000e-01 : f32
    %954 = vector.broadcast %cst_240 : f32 to vector<8x8xf32>
    %955 = arith.mulf %954, %953 : vector<8x8xf32>
    %cst_241 = arith.constant 0.707106769 : f32
    %956 = vector.broadcast %cst_241 : f32 to vector<8x8xf32>
    %957 = arith.mulf %953, %956 : vector<8x8xf32>
    %958 = math.absf %957 : vector<8x8xf32>
    %cst_242 = arith.constant 0.327591091 : f32
    %959 = vector.broadcast %cst_242 : f32 to vector<8x8xf32>
    %960 = arith.mulf %959, %958 : vector<8x8xf32>
    %cst_243 = arith.constant 1.000000e+00 : f32
    %961 = vector.broadcast %cst_243 : f32 to vector<8x8xf32>
    %962 = arith.addf %961, %960 : vector<8x8xf32>
    %cst_244 = arith.constant 1.000000e+00 : f32
    %963 = vector.broadcast %cst_244 : f32 to vector<8x8xf32>
    %964 = arith.divf %963, %962 : vector<8x8xf32>
    %cst_245 = arith.constant 1.06140542 : f32
    %965 = vector.broadcast %cst_245 : f32 to vector<8x8xf32>
    %966 = arith.mulf %964, %965 : vector<8x8xf32>
    %cst_246 = arith.constant -1.45315206 : f32
    %967 = vector.broadcast %cst_246 : f32 to vector<8x8xf32>
    %968 = arith.addf %967, %966 : vector<8x8xf32>
    %969 = arith.mulf %964, %968 : vector<8x8xf32>
    %cst_247 = arith.constant 1.42141378 : f32
    %970 = vector.broadcast %cst_247 : f32 to vector<8x8xf32>
    %971 = arith.addf %970, %969 : vector<8x8xf32>
    %972 = arith.mulf %964, %971 : vector<8x8xf32>
    %cst_248 = arith.constant -0.284496725 : f32
    %973 = vector.broadcast %cst_248 : f32 to vector<8x8xf32>
    %974 = arith.addf %973, %972 : vector<8x8xf32>
    %975 = arith.mulf %964, %974 : vector<8x8xf32>
    %cst_249 = arith.constant 0.254829586 : f32
    %976 = vector.broadcast %cst_249 : f32 to vector<8x8xf32>
    %977 = arith.addf %976, %975 : vector<8x8xf32>
    %978 = arith.mulf %964, %977 : vector<8x8xf32>
    %cst_250 = arith.constant 0.000000e+00 : f32
    %979 = vector.broadcast %cst_250 : f32 to vector<8x8xf32>
    %980 = arith.subf %979, %958 : vector<8x8xf32>
    %981 = arith.mulf %980, %958 : vector<8x8xf32>
    %982 = math.exp %981 : vector<8x8xf32>
    %983 = arith.mulf %978, %982 : vector<8x8xf32>
    %cst_251 = arith.constant 1.000000e+00 : f32
    %984 = vector.broadcast %cst_251 : f32 to vector<8x8xf32>
    %985 = arith.subf %984, %983 : vector<8x8xf32>
    %cst_252 = arith.constant 0.000000e+00 : f32
    %986 = vector.broadcast %cst_252 : f32 to vector<8x8xf32>
    %987 = arith.cmpf olt, %957, %986 : vector<8x8xf32>
    %cst_253 = arith.constant 0.000000e+00 : f32
    %988 = vector.broadcast %cst_253 : f32 to vector<8x8xf32>
    %989 = arith.subf %988, %985 : vector<8x8xf32>
    %990 = arith.select %987, %989, %985 : vector<8x8xi1>, vector<8x8xf32>
    %cst_254 = arith.constant 1.000000e+00 : f32
    %991 = vector.broadcast %cst_254 : f32 to vector<8x8xf32>
    %992 = arith.addf %991, %990 : vector<8x8xf32>
    %993 = arith.mulf %955, %992 : vector<8x8xf32>
    %994 = vector.broadcast %234 : f32 to vector<8x8xf32>
    %995 = arith.mulf %994, %993 : vector<8x8xf32>
    %996 = arith.addf %902, %995 : vector<8x8xf32>
    %997 = vector.broadcast %235 : f32 to vector<8x8xf32>
    %998 = arith.mulf %997, %993 : vector<8x8xf32>
    %999 = arith.addf %905, %998 : vector<8x8xf32>
    %1000 = vector.broadcast %236 : f32 to vector<8x8xf32>
    %1001 = arith.mulf %1000, %993 : vector<8x8xf32>
    %1002 = arith.addf %908, %1001 : vector<8x8xf32>
    %1003 = vector.broadcast %237 : f32 to vector<8x8xf32>
    %1004 = arith.mulf %1003, %993 : vector<8x8xf32>
    %1005 = arith.addf %911, %1004 : vector<8x8xf32>
    %1006 = vector.broadcast %238 : f32 to vector<8x8xf32>
    %1007 = arith.mulf %1006, %993 : vector<8x8xf32>
    %1008 = arith.addf %914, %1007 : vector<8x8xf32>
    %1009 = vector.broadcast %239 : f32 to vector<8x8xf32>
    %1010 = arith.mulf %1009, %993 : vector<8x8xf32>
    %1011 = arith.addf %917, %1010 : vector<8x8xf32>
    %1012 = vector.broadcast %240 : f32 to vector<8x8xf32>
    %1013 = arith.mulf %1012, %993 : vector<8x8xf32>
    %1014 = arith.addf %920, %1013 : vector<8x8xf32>
    %1015 = vector.broadcast %241 : f32 to vector<8x8xf32>
    %1016 = arith.mulf %1015, %993 : vector<8x8xf32>
    %1017 = arith.addf %923, %1016 : vector<8x8xf32>
    %1018 = vector.broadcast %242 : f32 to vector<8x8xf32>
    %1019 = arith.mulf %1018, %993 : vector<8x8xf32>
    %1020 = arith.addf %926, %1019 : vector<8x8xf32>
    %cst_255 = arith.constant dense<0.000000e+00> : vector<8x8xf32>
    %1021 = tpu.matmul %996, %87, %cst_255 {dimension_numbers = #tpu.dot_dimension_numbers<[1], [0], [0], [1], [0, 0, 1, 1], [], []>, precision = #tpu.contract_precision<fp32>} : vector<8x8xf32>, vector<8x8xf32>, vector<8x8xf32> -> vector<8x8xf32>
    %1022 = arith.addf %1021, %999 : vector<8x8xf32>
    %cst_256 = arith.constant dense<0.000000e+00> : vector<8x8xf32>
    %1023 = tpu.matmul %1002, %93, %cst_256 {dimension_numbers = #tpu.dot_dimension_numbers<[1], [0], [0], [1], [0, 0, 1, 1], [], []>, precision = #tpu.contract_precision<fp32>} : vector<8x8xf32>, vector<8x8xf32>, vector<8x8xf32> -> vector<8x8xf32>
    %1024 = arith.addf %1022, %1023 : vector<8x8xf32>
    %cst_257 = arith.constant dense<0.000000e+00> : vector<8x8xf32>
    %1025 = tpu.matmul %75, %1024, %cst_257 {dimension_numbers = #tpu.dot_dimension_numbers<[1], [0], [0], [1], [0, 0, 1, 1], [], []>, precision = #tpu.contract_precision<fp32>} : vector<8x8xf32>, vector<8x8xf32>, vector<8x8xf32> -> vector<8x8xf32>
    %1026 = arith.addf %260, %1025 : vector<8x8xf32>
    %cst_258 = arith.constant dense<0.000000e+00> : vector<8x8xf32>
    %1027 = tpu.matmul %1005, %87, %cst_258 {dimension_numbers = #tpu.dot_dimension_numbers<[1], [0], [0], [1], [0, 0, 1, 1], [], []>, precision = #tpu.contract_precision<fp32>} : vector<8x8xf32>, vector<8x8xf32>, vector<8x8xf32> -> vector<8x8xf32>
    %1028 = arith.addf %1027, %1008 : vector<8x8xf32>
    %cst_259 = arith.constant dense<0.000000e+00> : vector<8x8xf32>
    %1029 = tpu.matmul %1011, %93, %cst_259 {dimension_numbers = #tpu.dot_dimension_numbers<[1], [0], [0], [1], [0, 0, 1, 1], [], []>, precision = #tpu.contract_precision<fp32>} : vector<8x8xf32>, vector<8x8xf32>, vector<8x8xf32> -> vector<8x8xf32>
    %1030 = arith.addf %1028, %1029 : vector<8x8xf32>
    %1031 = arith.addf %1026, %1030 : vector<8x8xf32>
    %cst_260 = arith.constant dense<0.000000e+00> : vector<8x8xf32>
    %1032 = tpu.matmul %1014, %87, %cst_260 {dimension_numbers = #tpu.dot_dimension_numbers<[1], [0], [0], [1], [0, 0, 1, 1], [], []>, precision = #tpu.contract_precision<fp32>} : vector<8x8xf32>, vector<8x8xf32>, vector<8x8xf32> -> vector<8x8xf32>
    %1033 = arith.addf %1032, %1017 : vector<8x8xf32>
    %cst_261 = arith.constant dense<0.000000e+00> : vector<8x8xf32>
    %1034 = tpu.matmul %1020, %93, %cst_261 {dimension_numbers = #tpu.dot_dimension_numbers<[1], [0], [0], [1], [0, 0, 1, 1], [], []>, precision = #tpu.contract_precision<fp32>} : vector<8x8xf32>, vector<8x8xf32>, vector<8x8xf32> -> vector<8x8xf32>
    %1035 = arith.addf %1033, %1034 : vector<8x8xf32>
    %cst_262 = arith.constant dense<0.000000e+00> : vector<8x8xf32>
    %1036 = tpu.matmul %81, %1035, %cst_262 {dimension_numbers = #tpu.dot_dimension_numbers<[1], [0], [0], [1], [0, 0, 1, 1], [], []>, precision = #tpu.contract_precision<fp32>} : vector<8x8xf32>, vector<8x8xf32>, vector<8x8xf32> -> vector<8x8xf32>
    %1037 = arith.addf %1031, %1036 : vector<8x8xf32>
    %cst_263 = arith.constant dense<0.000000e+00> : vector<8x8xf32>
    %1038 = tpu.matmul %97, %1037, %cst_263 {dimension_numbers = #tpu.dot_dimension_numbers<[1], [1], [0], [0], [0, 0, 1, 0], [], []>, precision = #tpu.contract_precision<fp32>} : vector<8x8xf32>, vector<8x8xf32>, vector<8x8xf32> -> vector<8x8xf32>
    %1039 = arith.addf %1037, %1038 : vector<8x8xf32>
    %cst_264 = arith.constant 0.000000e+00 : f32
    %1040 = vector.broadcast %cst_264 : f32 to vector<8x8xf32>
    %1041 = arith.cmpf oge, %1039, %1040 : vector<8x8xf32>
    %1042 = arith.andi %98, %1041 : vector<8x8xi1>
    %cst_265 = arith.constant 0.000000e+00 : f32
    %1043 = vector.broadcast %cst_265 : f32 to vector<8x8xf32>
    %1044 = arith.select %1042, %1039, %1043 : vector<8x8xi1>, vector<8x8xf32>
    %c0_266 = arith.constant 0 : index
    %c0_267 = arith.constant 0 : index
    %c0_268 = arith.constant 0 : index
    %1045 = vector.load %arg8[%c0_266, %c0_267, %c0_268] : memref<1x8x8xf32, #tpu.memory_space<vmem>>, vector<1x8x8xf32>
    %1046 = vector.shape_cast %1045 : vector<1x8x8xf32> to vector<8x8xf32>
    %1047 = vector.shape_cast %1044 : vector<8x8xf32> to vector<1x8x8xf32>
    tpu.vector_store %arg8[%c0_266, %c0_267, %c0_268], %1047 {strides = array<i32>} : memref<1x8x8xf32, #tpu.memory_space<vmem>>, vector<1x8x8xf32>,
    return
  }
  func.func @transform_0(%arg0: i32) -> (i32, i32) {
    %c0_i32 = arith.constant 0 : i32
    %c0_i32_0 = arith.constant 0 : i32
    return %arg0, %c0_i32 : i32, i32
  }
  func.func @transform_1(%arg0: i32) -> (i32, i32) {
    %c0_i32 = arith.constant 0 : i32
    %c0_i32_0 = arith.constant 0 : i32
    %c0_i32_1 = arith.constant 0 : i32
    return %c0_i32, %c0_i32_0 : i32, i32
  }
  func.func @transform_2(%arg0: i32) -> (i32, i32) {
    %c0_i32 = arith.constant 0 : i32
    %c0_i32_0 = arith.constant 0 : i32
    %c0_i32_1 = arith.constant 0 : i32
    return %c0_i32, %c0_i32_0 : i32, i32
  }
  func.func @transform_3(%arg0: i32) -> i32 {
    %c0_i32 = arith.constant 0 : i32
    %c0_i32_0 = arith.constant 0 : i32
    return %c0_i32 : i32
  }
  func.func @transform_4(%arg0: i32) -> i32 {
    %c0_i32 = arith.constant 0 : i32
    %c0_i32_0 = arith.constant 0 : i32
    return %c0_i32 : i32
  }
  func.func @transform_5(%arg0: i32) -> i32 {
    %c0_i32 = arith.constant 0 : i32
    %c0_i32_0 = arith.constant 0 : i32
    return %c0_i32 : i32
  }
  func.func @transform_6(%arg0: i32) -> i32 {
    %c0_i32 = arith.constant 0 : i32
    %c0_i32_0 = arith.constant 0 : i32
    return %c0_i32 : i32
  }
  func.func @transform_7(%arg0: i32) -> (i32, i32, i32) {
    %c0_i32 = arith.constant 0 : i32
    %c0_i32_0 = arith.constant 0 : i32
    %c0_i32_1 = arith.constant 0 : i32
    return %arg0, %c0_i32, %c0_i32_0 : i32, i32, i32
  }
  func.func @transform_8(%arg0: i32) -> (i32, i32, i32) {
    %c0_i32 = arith.constant 0 : i32
    %c0_i32_0 = arith.constant 0 : i32
    %c0_i32_1 = arith.constant 0 : i32
    return %arg0, %c0_i32, %c0_i32_0 : i32, i32, i32
  }
  func.func @transform_9(%arg0: i32) -> (i32, i32, i32) {
    %c0_i32 = arith.constant 0 : i32
    %c0_i32_0 = arith.constant 0 : i32
    %c0_i32_1 = arith.constant 0 : i32
    return %arg0, %c0_i32, %c0_i32_0 : i32, i32, i32
  }
}

</mosaic_0001>

<bundles_post_ra>
// kernel: tpu_custom_call.1
= control target key start
LH: loop header
LB: loop body
LE: loop exit
PB: predicated region body
PF: predicated region fallthrough
CT: control target
= control target key end

     0   :  { %s14287_s0 = inlined_call_operand.hbm [shape: f32[16,25], index: 0, kind: input, shape index: {}]   ;;  %s14288_s1 = inlined_call_operand.hbm [shape: f32[25,48], index: 1, kind: input, shape index: {}]   ;;  %s14289_s2 = inlined_call_operand.vmem [shape: f32[1,48], index: 2, kind: input, shape index: {}]   ;;  %s14290_s3 = inlined_call_operand.vmem [shape: f32[72], index: 3, kind: input, shape index: {}]   ;;  %s14291_s4 = inlined_call_operand.vmem [shape: f32[8], index: 4, kind: input, shape index: {}]   ;;  %s14292_s5 = inlined_call_operand.vmem [shape: f32[72], index: 5, kind: input, shape index: {}]   ;;  %s14293_s6 = inlined_call_operand.<no memory space> [shape: f32[1], index: 6, kind: input, shape index: {}]   ;;  %s14294_s7 = inlined_call_operand.hbm [shape: f32[2,8,8], index: 7, kind: output, shape index: {0}]   ;;  %s14295_s8 = inlined_call_operand.hbm [shape: f32[2,8,8], index: 8, kind: output, shape index: {1}]   ;;  %s14296_s9 = inlined_call_operand.hbm [shape: f32[2,8,8], index: 9, kind: output, shape index: {2}]  }
   0x1   :  { %14364 = sst [smem:[#allocation63_spill]] %s14287_s0 }
   0x2   :  { %14365 = sst [smem:[#allocation64_spill]] %s14288_s1 }
   0x3   :  { %14366 = sst [smem:[#allocation65_spill]] %s14289_s2 }
   0x4   :  { %14367 = sst [smem:[#allocation66_spill]] %s14290_s3 }
   0x5   :  { %14368 = sst [smem:[#allocation67_spill]] %s14291_s4 }
   0x6   :  { %14369 = sst [smem:[#allocation68_spill]] %s14292_s5 }
   0x7   :  { %14370 = sst [smem:[#allocation69_spill]] %s14294_s7 }
   0x8   :  { %14371 = sst [smem:[#allocation70_spill]] %s14295_s8 }
   0x9   :  { %14372 = sst [smem:[#allocation71_spill]] %s14296_s9 }
   0xa   :  { %15 = sst [smem:[#allocation2]] %s14293_s6 }
   0xb   :  { %16 = vsyncpa [#allocation4], 0 }
   0xc   :  { %18 = vsyncpa [#allocation4 + $0x1], 0 }
   0xd   :  { %19 = vsyncpa [#allocation8], 0 }
   0xe   :  { %20 = vsyncpa [#allocation6], 0 }
   0xf   :  { %21 = vsyncpa [#allocation11], 0 }
  0x10   :  { %22 = vsyncpa [#allocation5], 0 }
  0x11   :  { %24 = vsyncpa [#allocation5 + $0x1], 0 }
  0x12   :  { %25 = vsyncpa [#allocation15], 0 }
  0x13   :  { %27 = vsyncpa [#allocation15 + $0x1], 0  ;;  %s12327_s11 = smov 0   ;;  %s12329_s12 = smov 0  }
  0x14   :  { %s12331_s13 = smov 0   ;;  %s12333_s14 = smov 0  }
  0x15 LB: > { %14373 = sst [smem:[#allocation23_spill]] %s12243_s11  ;;  %s14377_s4 = sld [smem:[#allocation67_spill]]  ;;  %s12255_s14 = sphi %s12333_s14, %s14543_s14   ;;  %s12251_s13 = sphi %s12331_s13, %s14546_s13   ;;  %s12247_s12 = sphi %s12329_s12, %s14545_s12   ;;  %s12243_s11 = sphi %s12327_s11, %s14544_s11  }
  0x16   : > { %14374 = sst [smem:[#allocation24_spill]] %s12247_s12  ;;  %s12351_s17 = sadd.s32 4294967295, %s12255_s14  }
  0x17   : > { %14375 = sst [smem:[#allocation25_spill]] %s12251_s13  ;;  %p10501_p0 = scmp.ge.s32.totalorder %s12255_s14, 1 }
  0x18   : > { %14376 = sst [smem:[#allocation26_spill]] %s12255_s14  ;;  %p14298_p1 = scmp.eq.s32.totalorder %s12351_s17, 0 }
  0x19   : > { %14378 = sst [smem:[#allocation27_spill]] %s12351_s17  ;;  %p268_p2 = scmp.lt.s32.totalorder %s12255_s14, 3 }
  0x1a   : > { %s12257_s19 = smov [#allocation7]   ;;  %s14381_s3 = sld [smem:[#allocation66_spill]] }
  0x1b   : > { %s308_s16 = sshll.u32 %s14377_s4, 4  ;;  %p12356_p3 = pnand %p10501_p0, %p268_p2  ;;  %s309_s16 = int_to_ptr.vmem [resolvable:$true] %s308_s16 }
  0x1c   : > { %s280_s20 = sshll.u32 %s12257_s19, 4  ;;  %s14382_s5 = sld [smem:[#allocation68_spill]]  ;;  %s12363_s20 = int_to_ptr.vmem [resolvable:$true] %s280_s20 }
  0x1d   : > { %p11888_p5 = pneg %p12356_p3  ;;  %s12014_s28 = scalar_lea.vmem %s309_s16, 16 }
  0x1e   : > { %p12015_p7 = scmp.ne.s32.totalorder %s309_s16, %s12014_s28  ;;  %p12022_p11 = scmp.lt.s32.totalorder %s309_s16, %s309_s16 }
  0x1f   : > { %p12367_p6 = pnand %p11888_p5, %p14298_p1  ;;  %p12023_p12 = scmp.lt.s32.totalorder %s12014_s28, %s12014_s28 }
  0x20   : > { %s297_s24 = sshll.u32 %s14381_s3, 4  ;;  %s12374_s24 = int_to_ptr.vmem [resolvable:$true] %s297_s24 }
  0x21   : > { %p12381_p8 = pneg %p12367_p6  ;;  %p12024_p13 = por %p12023_p12, %p12022_p11 }
  0x22   : > { %s319_s27 = sshll.u32 %s14382_s5, 4  ;;  %s320_s27 = int_to_ptr.vmem [resolvable:$true] %s319_s27 }
  0x23   : > { %p12017_p9 = pnand %p12381_p8, %p12015_p7 }
  0x25   : > { %p12018_p10 = pneg %p12017_p9 }
  0x27   : > { %p12025_p0 = pnand %p12024_p13, %p12018_p10 }
  0x29   : > { %12028 = shalt.err (!%p12025_p0)
}
  0x2a   : > { %s12258_s30 = smov [#allocation10]   ;;  %s14384_s1 = sld [smem:[#allocation64_spill]] }
  0x2b   : > { %11897 = dma.vmem_to_smem (!%p12367_p6), %s309_s16, 16, %s12258_s30, [#allocation11]  }
  0x30   : > { %s12029_s15 = scalar_lea.hbm %s14384_s1, 512 }
  0x31   : > { %p12030_p2 = scmp.ne.s32.totalorder %s14384_s1, %s12029_s15  ;;  %p12036_p9 = scmp.lt.u32.totalorder %s12029_s15, %s14384_s1 }
  0x33   : > { %p12032_p5 = pnand %p12030_p2, %p12381_p8 }
  0x35   : > { %p12033_p7 = pneg %p12032_p5 }
  0x37   : > { %p12038_p10 = pnand %p12036_p9, %p12033_p7 }
  0x39   : > { %12041 = shalt.err (!%p12038_p10)
}
  0x3a   : > { %s12042_s16 = scalar_lea.vmem %s12363_s20, 512  ;;  %p12050_p0 = scmp.lt.s32.totalorder %s12363_s20, %s12363_s20 }
  0x3b   : > { %p12043_p11 = scmp.ne.s32.totalorder %s12363_s20, %s12042_s16  ;;  %p12051_p4 = scmp.lt.s32.totalorder %s12042_s16, %s12042_s16 }
  0x3d   : > { %p12045_p12 = pnand %p12043_p11, %p12381_p8  ;;  %p12052_p2 = por %p12051_p4, %p12050_p0 }
  0x3f   : > { %p12046_p13 = pneg %p12045_p12 }
  0x41   : > { %p12053_p5 = pnand %p12052_p2, %p12046_p13 }
  0x43   : > { %12056 = shalt.err (!%p12053_p5)
}
  0x44   : > { %s12259_s26 = smov 128   ;;  %s12260_s28 = smov 8  }
  0x45   : > { %11891 = dma.hbm_to_vmem [thread:$0]  (!%p12367_p6), %s14384_s1, 512, %s12363_s20, [#allocation8], %s12259_s26, %s12259_s26, %s12260_s28  }
  0x46   : > { %s12057_s6 = scalar_lea.vmem %s12374_s24, 16  ;;  %p12065_p10 = scmp.lt.s32.totalorder %s12374_s24, %s12374_s24 }
  0x47   : > { %p12058_p7 = scmp.ne.s32.totalorder %s12374_s24, %s12057_s6  ;;  %p12066_p11 = scmp.lt.s32.totalorder %s12057_s6, %s12057_s6 }
  0x49   : > { %p12060_p9 = pnand %p12058_p7, %p12381_p8  ;;  %p12067_p12 = por %p12066_p11, %p12065_p10 }
  0x4b   : > { %p12061_p4 = pneg %p12060_p9 }
  0x4d   : > { %p12068_p13 = pnand %p12067_p12, %p12061_p4 }
  0x4f   : > { %12071 = shalt.err (!%p12068_p13)
}
  0x50   : > { %s12261_s15 = smov [#allocation9]   ;;  %s12072_s20 = scalar_lea.vmem %s320_s27, 16 }
  0x51   : > { %11894 = dma.vmem_to_smem (!%p12367_p6), %s12374_s24, 16, %s12261_s15, [#allocation6]  }
  0x52   : > { %p12073_p0 = scmp.ne.s32.totalorder %s320_s27, %s12072_s20  ;;  %p12080_p7 = scmp.lt.s32.totalorder %s320_s27, %s320_s27 }
  0x53   : > { %p12081_p9 = scmp.lt.s32.totalorder %s12072_s20, %s12072_s20 }
  0x54   : > { %p12075_p2 = pnand %p12073_p0, %p12381_p8 }
  0x55   : > { %p12082_p4 = por %p12081_p9, %p12080_p7 }
  0x56   : > { %p12076_p5 = pneg %p12075_p2 }
  0x58   : > { %p12083_p10 = pnand %p12082_p4, %p12076_p5 }
  0x5a   : > { %12086 = shalt.err (!%p12083_p10)
}
  0x5b   : > { %s12262_s23 = smov [#allocation12]   ;;  %s14297_s24 = sadd.s32 4294967294, %s12255_s14  }
  0x5c   : > { %11900 = dma.vmem_to_smem (!%p12367_p6), %s320_s27, 16, %s12262_s23, [#allocation11]  }
  0x5d   : > { %s12431_s29 = sadd.s32 1, %s12255_s14   ;;  %s40_s25 = sadd.s32 1, %s12251_s13 }
  0x5e   : > { %14385 = sst [smem:[#allocation28_spill]] %s12431_s29  ;;  %s37_s21 = ssub.s32 %s12255_s14, %s12431_s29 }
  0x5f   : > { %p38_p8 = scmp.eq.s32.totalorder %s37_s21, 0  ;;  %p47_p11 = scmp.ne.s32.totalorder %s12251_s13, %s12247_s12 }
  0x60   : > { %p48_p12 = scmp.eq.s32.totalorder %s12255_s14, 0  ;;  %p53_p13 = scmp.ne.s32.totalorder %s12247_s12, %s12243_s11 }
  0x61   : > { %s12442_s16 = scalar_select %p38_p8, %s12251_s13, %s40_s25  }
  0x62   : > { %p12444_p0 = por %p48_p12, %p47_p11  ;;  %p12450_p6 = por %p14298_p1, %p53_p13 }
  0x63   : > { %14386 = sst [smem:[#allocation29_spill]] %s12442_s16  ;;  %p203_p2 = scmp.eq.s32.totalorder %s12351_s17, 1 }
  0x64   : > { %s14388_s27 = scalar_select %p12450_p6, 1, 0 }
  0x65   : > { %p209_p5 = scmp.eq.s32.totalorder %s14297_s24, 1  ;;  %p11919_p7 = scmp.lt.s32.totalorder %s12255_s14, 2 }
  0x66   : > { %s333_s28 = sand.u32 1, %s12251_s13   ;;  %p12459_p9 = por %p203_p2, %p47_p11 }
  0x67   : > { %p12463_p4 = por %p209_p5, %p53_p13  ;;  %s10507_s6 = sshll.u32 %s333_s28, 3 }
  0x68   : > { %s14389_s30 = scalar_select %p12459_p9, 1, 0 }
  0x69   : > { %s14391_s10 = scalar_select %p12463_p4, 1, 0 }
  0x6a   : > { %14390 = sst [smem:[#allocation30_spill]] %s14389_s30  ;;  %s10508_s15 = sshll.u32 %s12255_s14, 7 }
  0x6b   : > { %14392 = sst [smem:[#allocation31_spill]] %s14391_s10  ;;  %s14393_s0 = sld [smem:[#allocation63_spill]] }
  0x6c   : > { %s337_s23 = scalar_lea.vmem [#allocation3], %s10507_s6  ;;  %p12477_p10 = pnand %p11919_p7, %p12444_p0 }
  0x6d   : > { %s344_s21 = sshll.u32 %s337_s23, 4  ;;  %s334_s24 = scalar_lea.sflag [#allocation4], %s333_s28  ;;  %s12473_s21 = int_to_ptr.vmem [resolvable:$true] %s344_s21 }
  0x6e   : > { %p12089_p11 = pneg %p12477_p10 }
  0x71   : > { %s12471_s20 = scalar_lea.hbm %s14393_s0, %s10508_s15  ;;  %s12092_s19 = scalar_lea.hbm %s14393_s0, 256 }
  0x72   : > { %s12087_s1 = scalar_lea.hbm %s12471_s20, 128  ;;  %p12093_p0 = scmp.lt.u32.totalorder %s12471_s20, %s14393_s0 }
  0x73   : > { %p12088_p8 = scmp.ne.s32.totalorder %s12471_s20, %s12087_s1  ;;  %p12094_p2 = scmp.lt.u32.totalorder %s12092_s19, %s12087_s1 }
  0x74   : > { %p12096_p7 = scmp.lt.u32.totalorder %s12087_s1, %s12471_s20 }
  0x75   : > { %p12090_p12 = pnand %p12089_p11, %p12088_p8  ;;  %p12095_p5 = por %p12094_p2, %p12093_p0 }
  0x77   : > { %p12091_p13 = pneg %p12090_p12  ;;  %p12097_p1 = por %p12096_p7, %p12095_p5 }
  0x79   : > { %p12098_p4 = pnand %p12097_p1, %p12091_p13 }
  0x7b   : > { %12101 = shalt.err (!%p12098_p4)
}
  0x7c   : > { %s12102_s28 = scalar_lea.vmem %s12473_s21, 128  ;;  %s12263_s23 = smov [#allocation3]  }
  0x7d   : > { %p12103_p8 = scmp.ne.s32.totalorder %s12473_s21, %s12102_s28  ;;  %s12107_s6 = sshll.u32 %s12263_s23, 4  ;;  %s12108_s6 = int_to_ptr.vmem [resolvable:$false] %s12107_s6 }
  0x7e   : > { %s12109_s15 = scalar_lea.vmem %s12108_s6, 256  ;;  %p12110_p6 = scmp.lt.s32.totalorder %s12473_s21, %s12108_s6 }
  0x7f   : > { %p12105_p12 = pnand %p12103_p8, %p12089_p11  ;;  %p12111_p0 = scmp.lt.s32.totalorder %s12109_s15, %s12102_s28 }
  0x81   : > { %p12106_p9 = pneg %p12105_p12  ;;  %p12112_p2 = por %p12111_p0, %p12110_p6 }
  0x83   : > { %p12113_p5 = pnand %p12112_p2, %p12106_p9 }
  0x85   : > { %12116 = shalt.err (!%p12113_p5)
}
  0x86   : > { %11904 = dma.hbm_to_vmem [thread:$0]  (!%p12477_p10), %s12471_s20, 128, %s12473_s21, %s334_s24  }
  0x87   : > { %353 = sbr.rel (%p12356_p3) target bundleno = 2814 (0xafe), region = 48 }
  0x8e   : > { %s12509_s1 = sand.u32 1, %s12247_s12   ;;  %p14397_p1 = scmp.ne.s32.totalorder %s14388_s27, 0 }
  0x8f   : > { %14395 = sst [smem:[#allocation32_spill]] %s12509_s1  ;;  %s12512_s19 = sshll.u32 %s12509_s1, 3 }
  0x90   : > { %14396 = sst [smem:[#allocation33_spill]] %s12512_s19  ;;  %s356_s26 = scalar_lea.sflag [#allocation4], %s12509_s1 }
  0x91   : > { %s359_s22 = scalar_lea.vmem [#allocation3], %s12512_s19 }
  0x92   : > { %12218 = dma.done.wait (%p14397_p1), %s356_s26, 128  }
  0x93   : > { %12220 = vsyncadd (%p14397_p1), %s356_s26, 4294967168  ;;  %p14398_p6 = scmp.eq.s32.totalorder %s12351_s17, 0 }
  0x95   : > { %12222 = dma.done.wait (%p14398_p6), [#allocation8], 512   ;;  %p14399_p3 = pmov %p14398_p6 }
  0x97   : > { %12224 = vsyncadd (%p14399_p3), [#allocation8], 4294966784  ;;  %p14400_p9 = pmov %p14399_p3 }
  0x98   : > { %p14401_p4 = pmov %p14399_p3 }
  0x99   : > { %12226 = dma.done.wait (%p14400_p9), [#allocation6], 16  }
  0x9a   : > { %12228 = vsyncadd (%p14401_p4), [#allocation6], 4294967280  ;;  %p14402_p10 = pmov %p14399_p3 }
  0x9b   : > { %p14403_p11 = pmov %p14399_p3 }
  0x9c   : > { %12230 = dma.done.wait (%p14402_p10), [#allocation11], 32  }
  0x9d   : > { %12232 = vsyncadd (%p14403_p11), [#allocation11], 4294967264 }
  0x9e   : > { %380 = sfence }
  0x9f   : > { %v422_v0 = vld [vmem:[#allocation7] sm:$0xff]  ;;  %v423_v1 = vld [vmem:[#allocation7 + $0x8] sm:$0xff]  ;;  %v424_v2 = vld [vmem:[#allocation7 + $0x10] sm:$0xff]  ;;  %vm437_vm0 = vcmask 1040384   ;;  %v12264_v3 = vmov 0.0|0.0   ;;  %vm12265_vm1 = vmmov 0  }
  0xa0   : > { %11623 = vmatprep.subr.bf16.mxu0 %v12264_v3  ;;  %v442_v4 = vand.u32 4294901760, %v422_v0  ;;  %v445_v5 = vand.u32 4294901760, %v423_v1  ;;  %v425_v6 = vld [vmem:[#allocation7 + $0x18] sm:$0x1]  ;;  %v448_v7 = vand.u32 4294901760, %v424_v2  ;;  %v14321_v9 = vmov 0.0  }
  0xa1   : > { %v439_v8 = vsel %vm437_vm0, %v425_v6, 0  ;;  %10995 = vmatprep.mubr.msk.f32.mxu0 %vm12265_vm1, %v14321_v9  ;;  %v421_v10 = vld [vmem:[%s359_s22] sm:$0xff]  ;;  %vm433_vm2 = vcmask 203776   ;;  %11053 = vmatprep.subr.mxu1 %v14321_v9  ;;  %s14404_s2 = sld [smem:[#allocation65_spill]]  ;;  %s12267_s27 = smov 96   ;;  %vm954_vm4 = vcmask 261120  }
  0xa2   : > { %v11624_v11 = vpack.c.bf16 %v445_v5, %v442_v4  ;;  %v522_v12 = vsub.f32 %v422_v0, %v442_v4  ;;  %v529_v13 = vsub.f32 %v423_v1, %v445_v5  ;;  %v451_v14 = vand.u32 4294901760, %v439_v8  ;;  %11055 = vmatprep.mubr.msk.f32.mxu1 %vm12265_vm1, %v14321_v9  ;;  %s12268_s20 = smov 112   ;;  %s12269_s21 = smov 88  }
  0xa3   : > { %v536_v15 = vsub.f32 %v424_v2, %v448_v7  ;;  %v435_v16 = vsel %vm433_vm2, %v421_v10, 0  ;;  %vm972_vm5 = vcmask 130048   ;;  %vm1625_vm10 = vcmask 64512   ;;  %s14301_s25 = scalar_lea.vmem [#allocation14], %s12512_s19  ;;  %s14302_s28 = scalar_lea.vmem [#allocation16], %s12512_s19 }
  0xa4   : > { %11625 = vmatpush3.bf16.msra.mxu0 %v11624_v11  ;;  %v11627_v17 = vpack.c.bf16 %v451_v14, %v448_v7  ;;  %v543_v18 = vsub.f32 %v439_v8, %v451_v14  ;;  %v510_v19 = vand.u32 4294901760, %v435_v16  ;;  %v523_v20 = vand.u32 4294901760, %v522_v12  ;;  %s12958_s23 = sld [smem:[#allocation9 + $0x1]]  ;;  %s12960_s6 = sld [smem:[#allocation9 + $0xa]] }
  0xa5   : > { %11626 = vmatprep.subr.bf16.mxu0 %v12264_v3  ;;  %v530_v21 = vand.u32 4294901760, %v529_v13  ;;  %v537_v22 = vand.u32 4294901760, %v536_v15  ;;  %v11636_v38 = vpack.c.bf16 %v529_v13, %v522_v12  ;;  %s12962_s15 = sld [smem:[#allocation9 + $0x13]]  ;;  %s12964_s26 = sld [smem:[#allocation9 + $0x1c]] }
  0xa6   : > { %v511_v23 = vsub.f32 %v435_v16, %v510_v19  ;;  %v524_v24 = vsub.f32 %v522_v12, %v523_v20  ;;  %v544_v25 = vand.u32 4294901760, %v543_v18  ;;  %v11639_v39 = vpack.c.bf16 %v543_v18, %v536_v15  ;;  %s12966_s22 = sld [smem:[#allocation9 + $0x25]]  ;;  %s12968_s18 = sld [smem:[#allocation9 + $0x2e]] }
  0xa7   : > { %v531_v26 = vsub.f32 %v529_v13, %v530_v21  ;;  %v538_v27 = vsub.f32 %v536_v15, %v537_v22  ;;  %v11648_v40 = vpack.c.bf16 %v530_v21, %v523_v20  ;;  %v10518_v42 = vld [vmem:[%s14404_s2] ss:$0 sm:$0xff]  ;;  %s12970_s24 = sld [smem:[#allocation9 + $0x37]]  ;;  %s12982_s0 = sld [smem:[#allocation9 + $0x24]] }
  0xa8   : > { %11628 = vmatpush3.bf16.msra.mxu0 %v11627_v17  ;;  %v512_v28 = vand.u32 4294901760, %v511_v23  ;;  %v525_v29 = vand.u32 4294901760, %v524_v24  ;;  %v545_v30 = vsub.f32 %v543_v18, %v544_v25  ;;  %v11651_v41 = vpack.c.bf16 %v544_v25, %v537_v22  ;;  %s12984_s2 = sld [smem:[#allocation9 + $0x2d]]  ;;  %s12986_s3 = sld [smem:[#allocation9 + $0x36]] }
  0xa9   : > { %11629 = vmatprep.subr.bf16.mxu0 %v12264_v3  ;;  %v532_v31 = vand.u32 4294901760, %v531_v26  ;;  %v539_v34 = vand.u32 4294901760, %v538_v27  ;;  %s12988_s4 = sld [smem:[#allocation9 + $0x3f]]  ;;  %s12990_s5 = sld [smem:[#allocation10]] }
  0xaa   : > { %v513_v32 = vsub.f32 %v511_v23, %v512_v28  ;;  %v546_v35 = vand.u32 4294901760, %v545_v30  ;;  %s12992_s16 = sld [smem:[#allocation10 + $0x1]]  ;;  %s12994_s13 = sld [smem:[#allocation10 + $0x2]] }
  0xab   : > { %v11630_v33 = vpack.c.bf16 %v532_v31, %v525_v29  ;;  %s12996_s12 = sld [smem:[#allocation10 + $0x3]]  ;;  %s12998_s29 = sld [smem:[#allocation10 + $0x4]] }
  0xac   : > { %v514_v36 = vand.u32 4294901760, %v513_v32  ;;  %v11633_v37 = vpack.c.bf16 %v546_v35, %v539_v34  ;;  %s13000_s14 = sld [smem:[#allocation10 + $0x5]]  ;;  %s13002_s10 = sld [smem:[#allocation10 + $0x6]] }
  0xad   : > { %s13004_s11 = sld [smem:[#allocation10 + $0x7]]  ;;  %s13006_s7 = sld [smem:[#allocation9 + $0x2]] }
  0xae   : > { %10996 = vmatmul.mubr.f32.vlgmr.msra.gmra.mrb[0].mxu0 %v514_v36  ;;  %s13008_s1 = sld [smem:[#allocation9 + $0xb]]  ;;  %s13014_s9 = sld [smem:[#allocation9 + $0x14]] }
  0xaf   : > { %11631 = vmatpush3.bf16.msra.mxu0 %v11630_v33  ;;  %11006 = vmatprep.mubr.msk.f32.mxu0 %vm12265_vm1, %v14321_v9  ;;  %s13016_s8 = sld [smem:[#allocation9 + $0x1d]]  ;;  %s13022_s30 = sld [smem:[#allocation9 + $0x26]] }
  0xb0   : > { %11632 = vmatprep.subr.bf16.mxu0 %v12264_v3  ;;  %s13024_s17 = sld [smem:[#allocation9 + $0x2f]]  ;;  %s13248_s19 = sld [smem:[#allocation12 + $0x36]] }
  0xb3   : > { %11634 = vmatpush3.bf16.msra.mxu0 %v11633_v37 }
  0xb4   : > { %11635 = vmatprep.subr.bf16.mxu0 %v12264_v3 }
  0xb6   : > { %11007 = vmatmul.mubr.f32.vlgmr.msra.gmra.mrb[0].mxu0 %v510_v19  ;;  %14426 = sst [smem:[#allocation51_spill]] %s13248_s19  ;;  %s13359_s19 = sld [smem:[#allocation12 + $0x11]] }
  0xb7   : > { %11637 = vmatpush3.bf16.msra.mxu0 %v11636_v38  ;;  %11017 = vmatprep.mubr.msk.f32.mxu0 %vm12265_vm1, %v14321_v9 }
  0xb8   : > { %11638 = vmatprep.subr.bf16.mxu0 %v12264_v3 }
  0xbb   : > { %11640 = vmatpush3.bf16.msra.mxu0 %v11639_v39 }
  0xbc   : > { %11641 = vmatprep.subr.bf16.mxu0 %v12264_v3 }
  0xbe   : > { %11018 = vmatmul.mubr.f32.vlgmr.msra.gmra.mrb[0].mxu0 %v511_v23 }
  0xbf   : > { %11643 = vmatpush3.bf16.msra.mxu0 %v11624_v11  ;;  %11028 = vmatprep.mubr.msk.f32.mxu0 %vm12265_vm1, %v14321_v9 }
  0xc0   : > { %11644 = vmatprep.subr.bf16.mxu0 %v12264_v3 }
  0xc3   : > { %11646 = vmatpush3.bf16.msra.mxu0 %v11627_v17 }
  0xc4   : > { %11647 = vmatprep.subr.bf16.mxu0 %v12264_v3 }
  0xc6   : > { %11029 = vmatmul.mubr.f32.vlgmr.msra.gmra.mrb[0].mxu0 %v512_v28 }
  0xc7   : > { %11649 = vmatpush3.bf16.msra.mxu0 %v11648_v40  ;;  %11039 = vmatprep.mubr.msk.f32.mxu0 %vm12265_vm1, %v14321_v9 }
  0xc8   : > { %11650 = vmatprep.subr.bf16.mxu0 %v12264_v3 }
  0xcb   : > { %11652 = vmatpush3.bf16.msra.mxu0 %v11651_v41 }
  0xcc   : > { %11653 = vmatprep.subr.bf16.mxu0 %v12264_v3 }
  0xce   : > { %11040 = vmatmul.mubr.f32.vlgmr.msra.gmra.mrb[0].mxu0 %v510_v19 }
  0xcf   : > { %11655 = vmatpush3.bf16.msra.mxu0 %v11624_v11  ;;  %11050 = vmatprep.mubr.msk.f32.mxu0 %vm12265_vm1, %v14321_v9 }
  0xd0   : > { %11656 = vmatprep.subr.bf16.mxu0 %v12264_v3 }
  0xd3   : > { %11658 = vmatpush3.bf16.msra.mxu0 %v11627_v17 }
  0xd4   : > { %11113 = vmatprep.subr.mxu0 %v14321_v9 }
  0xd6   : > { %11051 = vmatmul.mubr.f32.vlgmr.msra.gmra.mrb[0].mxu0 %v510_v19 }
  0xd7   : > { %11115 = vmatprep.mubr.msk.f32.mxu0 %vm12265_vm1, %v14321_v9 }
 0x1a9   : > { %v922_v43 = vpop.f32.mrb[0].mxu0 }
 0x1aa   : > { %v11659_v44 = vadd.f32 %v10518_v42, %v922_v43  ;;  %v11052_v45 = vpop.f32.mrb[1].mxu0 }
 0x1ac   : > { %v927_v46 = vmul.f32 0.70710677, %v11659_v44  ;;  %v926_v4 = vmul.f32 0.5, %v11659_v44 }
 0x1ae   : > { %v928_v47 = vand.u32 2147483647, %v927_v46  ;;  %vm948_vm3 = vcmp.lt.f32.partialorder %v927_v46, 0.0 }
 0x1b0   : > { %v929_v48 = vmul.f32 0.3275911, %v928_v47  ;;  %v942_v50 = vsub.f32 0.0, %v928_v47 }
 0x1b2   : > { %v930_v49 = vadd.f32 1.0, %v929_v48  ;;  %v943_v52 = vmul.f32 %v942_v50, %v928_v47 }
 0x1b4   : > { %11970 = vrcp.f32 %v930_v49  ;;  %v944_v55 = vmul.f32 1.442695, %v943_v52 }
 0x1b6   : > { %11972 = vpow2.f32 %v944_v55 }
 0x1be   : > { %v11971_v51 = vpop.eup %11970 }
 0x1bf   : > { %v933_v53 = vmul.f32 1.0614054, %v11971_v51 }
 0x1c0   : > { %v11973_v63 = vpop.eup %11972 }
 0x1c1   : > { %v934_v54 = vadd.f32 -1.4531521, %v933_v53 }
 0x1c3   : > { %v935_v56 = vmul.f32 %v11971_v51, %v934_v54 }
 0x1c5   : > { %v936_v57 = vadd.f32 1.4214138, %v935_v56 }
 0x1c7   : > { %v937_v58 = vmul.f32 %v11971_v51, %v936_v57 }
 0x1c9   : > { %v938_v59 = vadd.f32 -0.28449672, %v937_v58 }
 0x1cb   : > { %v939_v60 = vmul.f32 %v11971_v51, %v938_v59  ;;  %v986_v59 = vlaneseq }
 0x1cd   : > { %v940_v61 = vadd.f32 0.2548296, %v939_v60  ;;  %v12612_v60 = vshrl.u32 %v986_v59, 7 }
 0x1cf   : > { %v941_v62 = vmul.f32 %v11971_v51, %v940_v61  ;;  %14405 = vst [vmem:[#allocation34_spill] sm:$0xff] %v12612_v60  ;;  %v12614_v61 = vand.u32 127, %v986_v59  ;;  %v5701_v59 = vstv %s12960_s6  ;;  %s13028_s6 = sld [smem:[#allocation9 + $0x41]] }
 0x1d1   : > { %v946_v0 = vmul.f32 %v11973_v63, %v941_v62  ;;  %14406 = vst [vmem:[#allocation35_spill] sm:$0xff] %v12614_v61  ;;  %v10519_v62 = vadd.s32 4294967295, %v12612_v60  ;;  %v993_v63 = vadd.s32 1, %v12612_v60 }
 0x1d3   : > { %v947_v1 = vsub.f32 1.0, %v946_v0  ;;  %vm991_vm11 = vcmp.eq.s32.totalorder %v12614_v61, %v10519_v62  ;;  %vm994_vm12 = vcmp.eq.s32.totalorder %v12614_v61, %v993_v63  ;;  %v5782_v62 = vstv %s12962_s15  ;;  %s13124_s15 = sld [smem:[#allocation9 + $0x29]] }
 0x1d4   : > { %v12621_v0 = vsel %vm991_vm11, 1.0, %v14321_v9  ;;  %v5863_v63 = vstv %s12964_s26  ;;  %s13126_s26 = sld [smem:[#allocation9 + $0x32]] }
 0x1d5   : > { %v949_v2 = vsub.f32 0.0, %v947_v1  ;;  %14407 = vst [vmem:[#allocation36_spill] sm:$0xff] %v12621_v0 }
 0x1d7   : > { %v950_v3 = vsel %vm948_vm3, %v949_v2, %v947_v1  ;;  %v12624_v1 = vsel %vm994_vm12, 1.0, %v14321_v9  ;;  %v2080_v2 = vsel %vm1625_vm10, %v12621_v0, 0 }
 0x1d8   : > { %v951_v5 = vadd.f32 1.0, %v950_v3  ;;  %14408 = vst [vmem:[#allocation37_spill] sm:$0xff] %v12624_v1  ;;  %v2529_v3 = vsel %vm1625_vm10, %v12624_v1, 0 }
 0x1da   : > { %v952_v6 = vmul.f32 %v951_v5, %v926_v4  ;;  %v12630_v4 = vsub.f32 %v2080_v2, %v2080_v2  ;;  %v12632_v5 = vsub.f32 %v2529_v3, %v2529_v3  ;;  %v5944_v2 = vstv %s12966_s22  ;;  %s13128_s22 = sld [smem:[#allocation9 + $0x3b]] }
 0x1db   : > { %v6025_v3 = vstv %s12968_s18  ;;  %s13130_s18 = sld [smem:[#allocation9 + $0x44]] }
 0x1dc   : > { %v953_v7 = vmul.f32 %v952_v6, %v952_v6  ;;  %14409 = vst [vmem:[#allocation38_spill] sm:$0xff] %v12630_v4  ;;  %14410 = vst [vmem:[#allocation39_spill] sm:$0xff] %v12632_v5 }
 0x1de   : > { %969 = vrot.lane.b32.xlu0 %v953_v7, %s12267_s27  ;;  %v955_v8 = vsel %vm954_vm4, %v953_v7, 0.0  ;;  %v12638_v7 = vand.u32 4294901760, %v12632_v5 }
 0x1e0   : > { %14412 = vst [vmem:[#allocation41_spill] sm:$0xff] %v12638_v7 }
 0x1fd   : > { %956 = vadd.xlane.f32.xlu0 %v955_v8 }
 0x250   : > { %v970_v10 = vpop.permute.xlu0 %969 }
 0x251   : > { %v973_v11 = vsel %vm972_vm5, %v970_v10, 0.0  ;;  %v2600_v10 = vsub.f32 %v12632_v5, %v12638_v7 }
 0x252   : > { %974 = vadd.xlane.f32.xlu1 %v973_v11 }
 0x28a   : > { %v957_v12 = vpop.xlane.xlu0 %956 }
 0x28b   : > { %11974 = vrsqrt.f32 %v957_v12  ;;  %vm960_vm6 = vcmp.eq.f32.partialorder %v957_v12, inf  ;;  %v963_v15 = vand.u32 2147483648, %v957_v12  ;;  %vm962_vm7 = vcmp.eq.f32.partialorder %v957_v12, 0.0 }
 0x295   : > { %v11975_v13 = vpop.eup %11974 }
 0x296   : > { %v959_v14 = vmul.f32 %v11975_v13, %v957_v12 }
 0x298   : > { %v961_v16 = vsel %vm960_vm6, %v957_v12, %v959_v14 }
 0x299   : > { %v964_v17 = vsel %vm962_vm7, %v963_v15, %v961_v16  ;;  %v12652_v15 = vand.u32 4294901760, %v2600_v10 }
 0x29a   : > { %v965_v18 = vmax.f32 %v964_v17, 1e-12 }
 0x29b   : > { %14414 = vst [vmem:[#allocation43_spill] sm:$0xff] %v12652_v15 }
 0x29c   : > { %11976 = vrcp.f32 %v965_v18 }
 0x2a6   : > { %v11977_v19 = vpop.eup %11976 }
 0x2a7   : > { %v967_v20 = vmul.f32 %v11977_v19, %v952_v6 }
 0x2a9   : > { %1168 = vrot.lane.b32.xlu1 %v967_v20, %s12268_s20  ;;  %v1170_v30 = vsel %vm972_vm5, %v967_v20, 0  ;;  %s12974_s20 = sld [smem:[#allocation9]] }
 0x2aa   : > { %v1240_v31 = vand.u32 4294901760, %v1170_v30 }
 0x2ac   : > { %v1241_v32 = vsub.f32 %v1170_v30, %v1240_v31 }
 0x2ae   : > { %v1242_v33 = vand.u32 4294901760, %v1241_v32 }
 0x2b0   : > { %v1243_v36 = vsub.f32 %v1241_v32, %v1242_v33 }
 0x2b2   : > { %v1244_v39 = vand.u32 4294901760, %v1243_v36 }
 0x2df   : > { %v975_v21 = vpop.xlane.xlu1 %974 }
 0x2e0   : > { %11978 = vrsqrt.f32 %v975_v21  ;;  %vm978_vm8 = vcmp.eq.f32.partialorder %v975_v21, inf  ;;  %v981_v24 = vand.u32 2147483648, %v975_v21  ;;  %vm980_vm9 = vcmp.eq.f32.partialorder %v975_v21, 0.0 }
 0x2ea   : > { %v11979_v22 = vpop.eup %11978 }
 0x2eb   : > { %v977_v23 = vmul.f32 %v11979_v22, %v975_v21  ;;  %v999_v22 = vadd.s32 1, %v12614_v61 }
 0x2ed   : > { %v979_v25 = vsel %vm978_vm8, %v975_v21, %v977_v23  ;;  %v10520_v21 = vadd.s32 4294967295, %v12614_v61  ;;  %vm12718_vm14 = vcmp.eq.s32.totalorder %v12612_v60, %v999_v22  ;;  %v1150_v22 = vstv %s12990_s5  ;;  %s13092_s5 = sld [smem:[#allocation9 + $0x28]] }
 0x2ee   : > { %v982_v26 = vsel %vm980_vm9, %v981_v24, %v979_v25  ;;  %v14319_v25 = vmov 1.0   ;;  %v14521_v24 = vld [vmem:[#allocation37_spill] sm:$0xff] }
 0x2ef   : > { %v983_v27 = vmax.f32 %v982_v26, 1e-12  ;;  %vm12713_vm13 = vcmp.eq.s32.totalorder %v12612_v60, %v10520_v21 }
 0x2f0   : > { %v998_v26 = vsel %vm12713_vm13, 1.0, %v14321_v9 }
 0x2f1   : > { %11980 = vrcp.f32 %v983_v27  ;;  %v1001_v27 = vsel %vm12718_vm14, 1.0, %v14321_v9 }
 0x2f2   : > { %v12740_v30 = vsub.f32 %v1001_v27, %v1001_v27  ;;  %v1154_v27 = vstv %s12994_s13  ;;  %s13104_s13 = sld [smem:[#allocation9 + $0x15]] }
 0x2fb   : > { %v11981_v28 = vpop.eup %11980 }
 0x2fc   : > { %v985_v29 = vmul.f32 %v11981_v28, %v952_v6  ;;  %v12635_v6 = vand.u32 4294901760, %v12630_v4  ;;  %v12736_v28 = vsub.f32 %v998_v26, %v998_v26  ;;  %v1152_v26 = vstv %s12992_s16  ;;  %s13112_s16 = sld [smem:[#allocation9 + $0x39]] }
 0x2fe   : > { %1621 = vrot.lane.b32.xlu1 %v985_v29, %s12267_s27  ;;  %14411 = vst [vmem:[#allocation40_spill] sm:$0xff] %v12635_v6  ;;  %v2151_v8 = vsub.f32 %v12630_v4, %v12635_v6  ;;  %s12972_s27 = sld [smem:[#allocation9 + $0x40]] }
 0x300   : > { %v12650_v14 = vand.u32 4294901760, %v2151_v8  ;;  %v6106_v8 = vstv %s12970_s24  ;;  %s13188_s24 = sld [smem:[#allocation9 + $0x7]] }
 0x302   : > { %1623 = vrot.lane.b32.xlu1 %v985_v29, %s12269_s21  ;;  %14413 = vst [vmem:[#allocation42_spill] sm:$0xff] %v12650_v14  ;;  %s12976_s21 = sld [smem:[#allocation9 + $0x9]] }
 0x304   : > { %v6187_v10 = vstv %s12972_s27  ;;  %s13190_s27 = sld [smem:[#allocation9 + $0x10]] }
 0x31b   : > { %v1169_v34 = vpop.permute.xlu1 %1168 }
 0x31c   : > { %v1172_v35 = vsel %vm972_vm5, %v1169_v34, 0 }
 0x31d   : > { %v1175_v37 = vand.u32 4294901760, %v1172_v35 }
 0x31f   : > { %v1252_v38 = vsub.f32 %v1172_v35, %v1175_v37  ;;  %11054 = vmatpush3.xpose.msra.mxu1 %v1175_v37  ;;  %v12747_v35 = vand.u32 4294901760, %v12736_v28 }
 0x320   : > { %11058 = vmatprep.subr.mxu1 %v14321_v9 }
 0x321   : > { %v1253_v40 = vand.u32 4294901760, %v1252_v38 }
 0x322   : > { %11056 = vmatmul.mubr.f32.vlgmr.msra.gmra.mrb[0].mxu1 %v1244_v39  ;;  %v3058_v39 = vsub.f32 %v12736_v28, %v12747_v35 }
 0x323   : > { %v1254_v41 = vsub.f32 %v1252_v38, %v1253_v40  ;;  %11060 = vmatprep.mubr.msk.f32.mxu1 %vm12265_vm1, %v14321_v9 }
 0x325   : > { %v1255_v42 = vand.u32 4294901760, %v1254_v41 }
 0x327   : > { %11059 = vmatpush3.xpose.msra.mxu1 %v1255_v42 }
 0x328   : > { %11063 = vmatprep.subr.mxu1 %v14321_v9 }
 0x32a   : > { %11061 = vmatmul.mubr.f32.vlgmr.msra.gmra.mrb[0].mxu1 %v1240_v31 }
 0x32b   : > { %11064 = vmatpush3.xpose.msra.mxu1 %v1252_v38  ;;  %11065 = vmatprep.mubr.msk.f32.mxu1 %vm12265_vm1, %v14321_v9 }
 0x32c   : > { %11068 = vmatprep.subr.mxu1 %v14321_v9 }
 0x332   : > { %11066 = vmatmul.mubr.f32.vlgmr.msra.gmra.mrb[0].mxu1 %v1241_v32 }
 0x333   : > { %11069 = vmatpush3.xpose.msra.mxu1 %v1175_v37  ;;  %11070 = vmatprep.mubr.msk.f32.mxu1 %vm12265_vm1, %v14321_v9 }
 0x334   : > { %11073 = vmatprep.subr.mxu1 %v14321_v9 }
 0x33a   : > { %11071 = vmatmul.mubr.f32.vlgmr.msra.gmra.mrb[0].mxu1 %v1242_v33 }
 0x33b   : > { %11074 = vmatpush3.xpose.msra.mxu1 %v1253_v40  ;;  %11075 = vmatprep.mubr.msk.f32.mxu1 %vm12265_vm1, %v14321_v9 }
 0x33c   : > { %11078 = vmatprep.subr.mxu1 %v14321_v9 }
 0x342   : > { %11076 = vmatmul.mubr.f32.vlgmr.msra.gmra.mrb[0].mxu1 %v1240_v31 }
 0x343   : > { %11079 = vmatpush3.xpose.msra.mxu1 %v1175_v37  ;;  %11080 = vmatprep.mubr.msk.f32.mxu1 %vm12265_vm1, %v14321_v9  ;;  %v12750_v37 = vand.u32 4294901760, %v12740_v30 }
 0x344   : > { %11083 = vmatprep.subr.mxu1 %v14321_v9 }
 0x345   : > { %v3498_v41 = vsub.f32 %v12740_v30, %v12750_v37 }
 0x34a   : > { %11081 = vmatmul.mubr.f32.vlgmr.msra.gmra.mrb[0].mxu1 %v1240_v31 }
 0x34b   : > { %11085 = vmatprep.mubr.msk.f32.mxu1 %vm12265_vm1, %v14321_v9 }
 0x370   : > { %v1622_v43 = vpop.permute.xlu1 %1621 }
 0x371   : > { %v1626_v44 = vsel %vm1625_vm10, %v1622_v43, 0  ;;  %v12756_v43 = vand.u32 4294901760, %v3058_v39  ;;  %v5626_v39 = vstv %s12974_s20  ;;  %s13192_s20 = sld [smem:[#allocation9 + $0x19]] }
 0x372   : > { %v1696_v45 = vand.u32 4294901760, %v1626_v44 }
 0x374   : > { %v1697_v46 = vsub.f32 %v1626_v44, %v1696_v45  ;;  %v1624_v47 = vpop.permute.xlu1 %1623 }
 0x375   : > { %v1628_v48 = vsel %vm1625_vm10, %v1624_v47, 0 }
 0x376   : > { %v1698_v49 = vand.u32 4294901760, %v1697_v46  ;;  %v1631_v50 = vand.u32 4294901760, %v1628_v48 }
 0x378   : > { %v1699_v51 = vsub.f32 %v1697_v46, %v1698_v49  ;;  %v1708_v52 = vsub.f32 %v1628_v48, %v1631_v50  ;;  %11084 = vmatpush3.xpose.msra.mxu1 %v1631_v50 }
 0x379   : > { %11088 = vmatprep.subr.mxu1 %v14321_v9 }
 0x37a   : > { %v1700_v53 = vand.u32 4294901760, %v1699_v51  ;;  %v1709_v54 = vand.u32 4294901760, %v1708_v52 }
 0x37c   : > { %v1710_v55 = vsub.f32 %v1708_v52, %v1709_v54  ;;  %11086 = vmatmul.mubr.f32.vlgmr.msra.gmra.mrb[2].mxu1 %v1700_v53 }
 0x37d   : > { %11090 = vmatprep.mubr.msk.f32.mxu1 %vm12265_vm1, %v14321_v9 }
 0x37e   : > { %v1711_v56 = vand.u32 4294901760, %v1710_v55 }
 0x380   : > { %11089 = vmatpush3.xpose.msra.mxu1 %v1711_v56 }
 0x381   : > { %11093 = vmatprep.subr.mxu1 %v14321_v9 }
 0x384   : > { %11091 = vmatmul.mubr.f32.vlgmr.msra.gmra.mrb[2].mxu1 %v1696_v45 }
 0x385   : > { %11094 = vmatpush3.xpose.msra.mxu1 %v1708_v52  ;;  %11095 = vmatprep.mubr.msk.f32.mxu1 %vm12265_vm1, %v14321_v9 }
 0x386   : > { %11098 = vmatprep.subr.mxu1 %v14321_v9 }
 0x38c   : > { %11096 = vmatmul.mubr.f32.vlgmr.msra.gmra.mrb[2].mxu1 %v1697_v46 }
 0x38d   : > { %11099 = vmatpush3.xpose.msra.mxu1 %v1631_v50  ;;  %11100 = vmatprep.mubr.msk.f32.mxu1 %vm12265_vm1, %v14321_v9 }
 0x38e   : > { %11103 = vmatprep.subr.mxu1 %v14321_v9 }
 0x394   : > { %11101 = vmatmul.mubr.f32.vlgmr.msra.gmra.mrb[2].mxu1 %v1698_v49 }
 0x395   : > { %11104 = vmatpush3.xpose.msra.mxu1 %v1709_v54  ;;  %11105 = vmatprep.mubr.msk.f32.mxu1 %vm12265_vm1, %v14321_v9 }
 0x396   : > { %11108 = vmatprep.subr.mxu1 %v14321_v9 }
 0x39c   : > { %11106 = vmatmul.mubr.f32.vlgmr.msra.gmra.mrb[2].mxu1 %v1696_v45 }
 0x39d   : > { %11109 = vmatpush3.xpose.msra.mxu1 %v1631_v50  ;;  %11110 = vmatprep.mubr.msk.f32.mxu1 %vm12265_vm1, %v14321_v9 }
 0x39e   : > { %11143 = vmatprep.subr.mxu1 %v14321_v9 }
 0x3a4   : > { %11111 = vmatmul.mubr.f32.vlgmr.msra.gmra.mrb[2].mxu1 %v1696_v45  ;;  %v12758_v45 = vand.u32 4294901760, %v3498_v41 }
 0x3a5   : > { %11145 = vmatprep.mubr.msk.f32.mxu1 %vm12265_vm1, %v14321_v9 }
 0x41d   : > { %v1616_v57 = vpop.f32.mrb[0].mxu1 }
 0x41e   : > { %2077 = vst.msk [vmem:[%s14301_s25] sm:$0xff] %vm1625_vm10, %v1616_v57  ;;  %v11082_v58 = vpop.f32.mrb[1].mxu1  ;;  %s12978_s25 = sld [smem:[#allocation9 + $0x12]] }
 0x41f   : > { %v5629_v58 = vstv %s12958_s23  ;;  %s13026_s23 = sld [smem:[#allocation9 + $0x38]] }
 0x477   : > { %v2072_v11 = vpop.f32.mrb[2].mxu1 }
 0x478   : > { %v12644_v12 = vadd.f32 %v2072_v11, %v1616_v57  ;;  %2078 = vst.msk [vmem:[%s14302_s28] sm:$0xff] %vm1625_vm10, %v2072_v11  ;;  %v11112_v13 = vpop.f32.mrb[3].mxu1  ;;  %s12980_s28 = sld [smem:[#allocation9 + $0x1b]] }
 0x47a   : > { %v2083_v16 = vand.u32 4294901760, %v12644_v12  ;;  %v3861_v46 = vsel %vm1625_vm10, %v12644_v12, 0 }
 0x47b   : > { %v12796_v47 = vand.u32 4294901760, %v3861_v46 }
 0x47c   : > { %11114 = vmatpush3.msra.mxu0 %v2083_v16  ;;  %11144 = vmatpush3.msra.mxu1 %v2083_v16  ;;  %v2160_v17 = vsub.f32 %v12644_v12, %v2083_v16 }
 0x47d   : > { %11116 = vmatmul.mubr.f32.vlgmr.msra.gmra.mrb[2].mxu0 %v12650_v14  ;;  %11146 = vmatmul.mubr.f32.vlgmr.msra.gmra.mrb[4].mxu1 %v12652_v15  ;;  %v3929_v48 = vsub.f32 %v3861_v46, %v12796_v47  ;;  %v6103_v46 = vstv %s12986_s3  ;;  %s13088_s3 = sld [smem:[#allocation9 + $0x16]] }
 0x47e   : > { %11118 = vmatprep.subr.mxu0 %v14321_v9  ;;  %11148 = vmatprep.subr.mxu1 %v14321_v9  ;;  %v2161_v18 = vand.u32 4294901760, %v2160_v17  ;;  %v5860_v41 = vstv %s12980_s28  ;;  %s13122_s28 = sld [smem:[#allocation9 + $0x20]] }
 0x47f   : > { %11120 = vmatprep.mubr.msk.f32.mxu0 %vm12265_vm1, %v14321_v9  ;;  %11150 = vmatprep.mubr.msk.f32.mxu1 %vm12265_vm1, %v14321_v9  ;;  %v3930_v49 = vand.u32 4294901760, %v3929_v48 }
 0x480   : > { %v2162_v19 = vsub.f32 %v2160_v17, %v2161_v18 }
 0x481   : > { %v3931_v50 = vsub.f32 %v3929_v48, %v3930_v49 }
 0x482   : > { %v2163_v20 = vand.u32 4294901760, %v2162_v19 }
 0x483   : > { %v3932_v51 = vand.u32 4294901760, %v3931_v50  ;;  %v5785_v50 = vstv %s13014_s9  ;;  %s13098_s9 = sld [smem:[#allocation9 + $0x43]] }
 0x484   : > { %11119 = vmatpush3.msra.mxu0 %v2163_v20  ;;  %11149 = vmatpush3.msra.mxu1 %v2163_v20 }
 0x485   : > { %11121 = vmatmul.mubr.msk.f32.vlgmr.msra.gmra.mrb[2].mxu0 %vm1625_vm10, %v12621_v0  ;;  %11123 = vmatprep.subr.mxu0 %v14321_v9 }
 0x486   : > { %11151 = vmatmul.mubr.msk.f32.vlgmr.msra.gmra.mrb[4].mxu1 %vm1625_vm10, %v12624_v1  ;;  %11153 = vmatprep.subr.mxu1 %v14321_v9 }
 0x487   : > { %11124 = vmatpush3.msra.mxu0 %v2160_v17  ;;  %11154 = vmatpush3.msra.mxu1 %v2160_v17 }
 0x488   : > { %11125 = vmatprep.mubr.msk.f32.mxu0 %vm12265_vm1, %v14321_v9  ;;  %11128 = vmatprep.subr.mxu0 %v14321_v9 }
 0x489   : > { %11155 = vmatprep.mubr.msk.f32.mxu1 %vm12265_vm1, %v14321_v9  ;;  %11158 = vmatprep.subr.mxu1 %v14321_v9 }
 0x48d   : > { %11126 = vmatmul.mubr.f32.vlgmr.msra.gmra.mrb[2].mxu0 %v12630_v4 }
 0x48e   : > { %11129 = vmatpush3.msra.mxu0 %v2083_v16  ;;  %11156 = vmatmul.mubr.f32.vlgmr.msra.gmra.mrb[4].mxu1 %v12632_v5 }
 0x48f   : > { %11159 = vmatpush3.msra.mxu1 %v2083_v16  ;;  %11130 = vmatprep.mubr.msk.f32.mxu0 %vm12265_vm1, %v14321_v9 }
 0x490   : > { %11133 = vmatprep.subr.mxu0 %v14321_v9  ;;  %11160 = vmatprep.mubr.msk.f32.mxu1 %vm12265_vm1, %v14321_v9 }
 0x491   : > { %11163 = vmatprep.subr.mxu1 %v14321_v9 }
 0x495   : > { %11131 = vmatmul.mubr.f32.vlgmr.msra.gmra.mrb[2].mxu0 %v12635_v6 }
 0x496   : > { %11134 = vmatpush3.msra.mxu0 %v2161_v18  ;;  %11161 = vmatmul.mubr.f32.vlgmr.msra.gmra.mrb[4].mxu1 %v12638_v7 }
 0x497   : > { %11164 = vmatpush3.msra.mxu1 %v2161_v18  ;;  %11135 = vmatprep.mubr.msk.f32.mxu0 %vm12265_vm1, %v14321_v9 }
 0x498   : > { %11138 = vmatprep.subr.mxu0 %v14321_v9  ;;  %11165 = vmatprep.mubr.msk.f32.mxu1 %vm12265_vm1, %v14321_v9 }
 0x499   : > { %11168 = vmatprep.subr.mxu1 %v14321_v9 }
 0x49d   : > { %11136 = vmatmul.mubr.msk.f32.vlgmr.msra.gmra.mrb[2].mxu0 %vm1625_vm10, %v12621_v0 }
 0x49e   : > { %11139 = vmatpush3.msra.mxu0 %v2083_v16  ;;  %11166 = vmatmul.mubr.msk.f32.vlgmr.msra.gmra.mrb[4].mxu1 %vm1625_vm10, %v12624_v1 }
 0x49f   : > { %11169 = vmatpush3.msra.mxu1 %v2083_v16  ;;  %11140 = vmatprep.mubr.msk.f32.mxu0 %vm12265_vm1, %v14321_v9 }
 0x4a0   : > { %11170 = vmatprep.mubr.msk.f32.mxu1 %vm12265_vm1, %v14321_v9  ;;  %11173 = vmatprep.subr.mxu0 %v14321_v9 }
 0x4a1   : > { %11203 = vmatprep.subr.mxu1 %v14321_v9 }
 0x4a5   : > { %11141 = vmatmul.mubr.msk.f32.vlgmr.msra.gmra.mrb[2].mxu0 %vm1625_vm10, %v12621_v0 }
 0x4a6   : > { %11171 = vmatmul.mubr.msk.f32.vlgmr.msra.gmra.mrb[4].mxu1 %vm1625_vm10, %v12624_v1  ;;  %11175 = vmatprep.mubr.msk.f32.mxu0 %vm12265_vm1, %v14321_v9 }
 0x4a7   : > { %11205 = vmatprep.mubr.msk.f32.mxu1 %vm12265_vm1, %v14321_v9  ;;  %11174 = vmatpush3.msk.msra.mxu0 %vm12713_vm13, %v14319_v25 }
 0x4a8   : > { %11204 = vmatpush3.msk.msra.mxu1 %vm12718_vm14, %v14319_v25  ;;  %11178 = vmatprep.subr.mxu0 %v14321_v9 }
 0x4a9   : > { %11208 = vmatprep.subr.mxu1 %v14321_v9 }
 0x578   : > { %v12738_v29 = vpop.f32.mrb[2].mxu0 }
 0x579   : > { %v11142_v31 = vpop.f32.mrb[3].mxu0  ;;  %v12742_v32 = vpop.f32.mrb[4].mxu1  ;;  %v2978_v34 = vsel %vm1625_vm10, %v12738_v29, 0  ;;  %v5630_v11 = vmul.f32 %v5629_v58, %v12738_v29  ;;  %v5702_v13 = vmul.f32 %v5701_v59, %v12738_v29  ;;  %v5783_v16 = vmul.f32 %v5782_v62, %v12738_v29 }
 0x57a   : > { %v11172_v33 = vpop.f32.mrb[5].mxu1  ;;  %v3045_v36 = vand.u32 4294901760, %v2978_v34  ;;  %v4744_v52 = vsel %vm1625_vm10, %v12742_v32, 0  ;;  %v5864_v17 = vmul.f32 %v5863_v63, %v12738_v29  ;;  %v5945_v18 = vmul.f32 %v5944_v2, %v12738_v29 }
 0x57b   : > { %v12863_v53 = vand.u32 4294901760, %v4744_v52  ;;  %v6026_v19 = vmul.f32 %v6025_v3, %v12738_v29  ;;  %v13037_v20 = vmul.f32 %v6106_v8, %v12738_v29  ;;  %v13040_v21 = vmul.f32 %v6187_v10, %v12738_v29 }
 0x57c   : > { %v3046_v38 = vsub.f32 %v2978_v34, %v3045_v36  ;;  %v1156_v31 = vstv %s12996_s12  ;;  %v1158_v33 = vstv %s12998_s29  ;;  %v1160_v34 = vstv %s13000_s14  ;;  %s13102_s12 = sld [smem:[#allocation9 + $0xc]]  ;;  %s13106_s14 = sld [smem:[#allocation9 + $0x1e]] }
 0x57d   : > { %v4812_v54 = vsub.f32 %v4744_v52, %v12863_v53  ;;  %v5779_v29 = vstv %s12978_s25  ;;  %s13110_s29 = sld [smem:[#allocation9 + $0x30]]  ;;  %s13120_s25 = sld [smem:[#allocation9 + $0x17]] }
 0x57e   : > { %v3047_v40 = vand.u32 4294901760, %v3046_v38 }
 0x57f   : > { %v4813_v55 = vand.u32 4294901760, %v4812_v54 }
 0x580   : > { %v3048_v42 = vsub.f32 %v3046_v38, %v3047_v40 }
 0x581   : > { %v4814_v56 = vsub.f32 %v4812_v54, %v4813_v55 }
 0x582   : > { %v3049_v44 = vand.u32 4294901760, %v3048_v42  ;;  %v5941_v42 = vstv %s12982_s0  ;;  %s13084_s0 = sld [smem:[#allocation9 + $0x4]] }
 0x583   : > { %v4815_v57 = vand.u32 4294901760, %v4814_v56  ;;  %v6109_v56 = vstv %s13026_s23  ;;  %s13196_s23 = sld [smem:[#allocation9 + $0x2b]] }
 0x584   : > { %11176 = vmatmul.mubr.f32.vlgmr.msra.gmra.mrb[4].mxu0 %v3049_v44  ;;  %11206 = vmatmul.mubr.f32.vlgmr.msra.gmra.mrb[6].mxu1 %v3049_v44  ;;  %v6022_v44 = vstv %s12984_s2  ;;  %s13086_s2 = sld [smem:[#allocation9 + $0xd]] }
 0x585   : > { %11179 = vmatpush3.msra.mxu0 %v12756_v43  ;;  %11180 = vmatprep.mubr.msk.f32.mxu0 %vm12265_vm1, %v14321_v9 }
 0x586   : > { %11209 = vmatpush3.msra.mxu1 %v12758_v45  ;;  %11210 = vmatprep.mubr.msk.f32.mxu1 %vm12265_vm1, %v14321_v9 }
 0x587   : > { %11183 = vmatprep.subr.mxu0 %v14321_v9  ;;  %11213 = vmatprep.subr.mxu1 %v14321_v9 }
 0x58c   : > { %11181 = vmatmul.mubr.f32.vlgmr.msra.gmra.mrb[4].mxu0 %v3045_v36  ;;  %11211 = vmatmul.mubr.f32.vlgmr.msra.gmra.mrb[6].mxu1 %v3045_v36 }
 0x58d   : > { %11184 = vmatpush3.msra.mxu0 %v12736_v28  ;;  %11185 = vmatprep.mubr.msk.f32.mxu0 %vm12265_vm1, %v14321_v9 }
 0x58e   : > { %11214 = vmatpush3.msra.mxu1 %v12740_v30  ;;  %11215 = vmatprep.mubr.msk.f32.mxu1 %vm12265_vm1, %v14321_v9 }
 0x58f   : > { %11188 = vmatprep.subr.mxu0 %v14321_v9  ;;  %11218 = vmatprep.subr.mxu1 %v14321_v9 }
 0x594   : > { %11186 = vmatmul.mubr.f32.vlgmr.msra.gmra.mrb[4].mxu0 %v3046_v38  ;;  %11216 = vmatmul.mubr.f32.vlgmr.msra.gmra.mrb[6].mxu1 %v3046_v38  ;;  %v1164_v38 = vstv %s13004_s11  ;;  %s13100_s11 = sld [smem:[#allocation9 + $0x3]] }
 0x595   : > { %11189 = vmatpush3.msk.msra.mxu0 %vm12713_vm13, %v14319_v25  ;;  %11190 = vmatprep.mubr.msk.f32.mxu0 %vm12265_vm1, %v14321_v9 }
 0x596   : > { %11219 = vmatpush3.msk.msra.mxu1 %vm12718_vm14, %v14319_v25  ;;  %11220 = vmatprep.mubr.msk.f32.mxu1 %vm12265_vm1, %v14321_v9 }
 0x597   : > { %11193 = vmatprep.subr.mxu0 %v14321_v9  ;;  %11223 = vmatprep.subr.mxu1 %v14321_v9 }
 0x59c   : > { %11191 = vmatmul.mubr.f32.vlgmr.msra.gmra.mrb[4].mxu0 %v3047_v40  ;;  %11221 = vmatmul.mubr.f32.vlgmr.msra.gmra.mrb[6].mxu1 %v3047_v40  ;;  %v5698_v40 = vstv %s12976_s21  ;;  %s13194_s21 = sld [smem:[#allocation9 + $0x22]] }
 0x59d   : > { %11194 = vmatpush3.msra.mxu0 %v12747_v35  ;;  %11195 = vmatprep.mubr.msk.f32.mxu0 %vm12265_vm1, %v14321_v9 }
 0x59e   : > { %11224 = vmatpush3.msra.mxu1 %v12750_v37  ;;  %11225 = vmatprep.mubr.msk.f32.mxu1 %vm12265_vm1, %v14321_v9 }
 0x59f   : > { %11198 = vmatprep.subr.mxu0 %v14321_v9  ;;  %11228 = vmatprep.subr.mxu1 %v14321_v9 }
 0x5a4   : > { %11196 = vmatmul.mubr.f32.vlgmr.msra.gmra.mrb[4].mxu0 %v3045_v36  ;;  %11226 = vmatmul.mubr.f32.vlgmr.msra.gmra.mrb[6].mxu1 %v3045_v36 }
 0x5a5   : > { %11199 = vmatpush3.msk.msra.mxu0 %vm12713_vm13, %v14319_v25  ;;  %11200 = vmatprep.mubr.msk.f32.mxu0 %vm12265_vm1, %v14321_v9 }
 0x5a6   : > { %11229 = vmatpush3.msk.msra.mxu1 %vm12718_vm14, %v14319_v25  ;;  %11230 = vmatprep.mubr.msk.f32.mxu1 %vm12265_vm1, %v14321_v9 }
 0x5a7   : > { %11233 = vmatprep.subr.mxu0 %v14321_v9  ;;  %11263 = vmatprep.subr.mxu1 %v14321_v9 }
 0x5ac   : > { %11201 = vmatmul.mubr.f32.vlgmr.msra.gmra.mrb[4].mxu0 %v3045_v36  ;;  %11231 = vmatmul.mubr.f32.vlgmr.msra.gmra.mrb[6].mxu1 %v3045_v36  ;;  %v1162_v36 = vstv %s13002_s10  ;;  %s13116_s10 = sld [smem:[#allocation9 + $0x5]] }
 0x5ad   : > { %11234 = vmatpush3.msk.msra.mxu0 %vm12713_vm13, %v14319_v25  ;;  %11235 = vmatprep.mubr.msk.f32.mxu0 %vm12265_vm1, %v14321_v9 }
 0x5ae   : > { %11264 = vmatpush3.msk.msra.mxu1 %vm12718_vm14, %v14319_v25  ;;  %11265 = vmatprep.mubr.msk.f32.mxu1 %vm12265_vm1, %v14321_v9 }
 0x5af   : > { %11238 = vmatprep.subr.mxu0 %v14321_v9  ;;  %11268 = vmatprep.subr.mxu1 %v14321_v9 }
 0x5b0   : > { %11236 = vmatmul.mubr.f32.vlgmr.msra.gmra.mrb[6].mxu0 %v3932_v51  ;;  %11266 = vmatmul.mubr.f32.vlgmr.msra.gmra.mrb[8].mxu1 %v3932_v51  ;;  %v5866_v51 = vstv %s13016_s8  ;;  %s13096_s8 = sld [smem:[#allocation9 + $0x3a]] }
 0x5b1   : > { %11239 = vmatpush3.msra.mxu0 %v12756_v43  ;;  %11240 = vmatprep.mubr.msk.f32.mxu0 %vm12265_vm1, %v14321_v9 }
 0x5b2   : > { %11269 = vmatpush3.msra.mxu1 %v12758_v45  ;;  %11270 = vmatprep.mubr.msk.f32.mxu1 %vm12265_vm1, %v14321_v9 }
 0x5b3   : > { %11243 = vmatprep.subr.mxu0 %v14321_v9  ;;  %11273 = vmatprep.subr.mxu1 %v14321_v9 }
 0x5b8   : > { %11241 = vmatmul.mubr.f32.vlgmr.msra.gmra.mrb[6].mxu0 %v12796_v47  ;;  %11271 = vmatmul.mubr.f32.vlgmr.msra.gmra.mrb[8].mxu1 %v12796_v47 }
 0x5b9   : > { %11244 = vmatpush3.msra.mxu0 %v12736_v28  ;;  %11245 = vmatprep.mubr.msk.f32.mxu0 %vm12265_vm1, %v14321_v9 }
 0x5ba   : > { %11274 = vmatpush3.msra.mxu1 %v12740_v30  ;;  %11275 = vmatprep.mubr.msk.f32.mxu1 %vm12265_vm1, %v14321_v9 }
 0x5bb   : > { %11248 = vmatprep.subr.mxu0 %v14321_v9  ;;  %11278 = vmatprep.subr.mxu1 %v14321_v9 }
 0x5c0   : > { %11246 = vmatmul.mubr.f32.vlgmr.msra.gmra.mrb[6].mxu0 %v3929_v48  ;;  %11276 = vmatmul.mubr.f32.vlgmr.msra.gmra.mrb[8].mxu1 %v3929_v48  ;;  %v5632_v48 = vstv %s13006_s7  ;;  %s13094_s7 = sld [smem:[#allocation9 + $0x31]] }
 0x5c1   : > { %11249 = vmatpush3.msk.msra.mxu0 %vm12713_vm13, %v14319_v25  ;;  %11250 = vmatprep.mubr.msk.f32.mxu0 %vm12265_vm1, %v14321_v9 }
 0x5c2   : > { %11279 = vmatpush3.msk.msra.mxu1 %vm12718_vm14, %v14319_v25  ;;  %11280 = vmatprep.mubr.msk.f32.mxu1 %vm12265_vm1, %v14321_v9 }
 0x5c3   : > { %11253 = vmatprep.subr.mxu0 %v14321_v9  ;;  %11283 = vmatprep.subr.mxu1 %v14321_v9 }
 0x5c8   : > { %11251 = vmatmul.mubr.f32.vlgmr.msra.gmra.mrb[6].mxu0 %v3930_v49  ;;  %11281 = vmatmul.mubr.f32.vlgmr.msra.gmra.mrb[8].mxu1 %v3930_v49  ;;  %v5704_v49 = vstv %s13008_s1  ;;  %s13118_s1 = sld [smem:[#allocation9 + $0xe]] }
 0x5c9   : > { %11254 = vmatpush3.msra.mxu0 %v12747_v35  ;;  %11255 = vmatprep.mubr.msk.f32.mxu0 %vm12265_vm1, %v14321_v9 }
 0x5ca   : > { %11284 = vmatpush3.msra.mxu1 %v12750_v37  ;;  %11285 = vmatprep.mubr.msk.f32.mxu1 %vm12265_vm1, %v14321_v9 }
 0x5cb   : > { %11258 = vmatprep.subr.mxu0 %v14321_v9  ;;  %11288 = vmatprep.subr.mxu1 %v14321_v9 }
 0x5d0   : > { %11256 = vmatmul.mubr.f32.vlgmr.msra.gmra.mrb[6].mxu0 %v12796_v47  ;;  %11286 = vmatmul.mubr.f32.vlgmr.msra.gmra.mrb[8].mxu1 %v12796_v47 }
 0x5d1   : > { %11259 = vmatpush3.msk.msra.mxu0 %vm12713_vm13, %v14319_v25  ;;  %11260 = vmatprep.mubr.msk.f32.mxu0 %vm12265_vm1, %v14321_v9 }
 0x5d2   : > { %11289 = vmatpush3.msk.msra.mxu1 %vm12718_vm14, %v14319_v25  ;;  %11290 = vmatprep.mubr.msk.f32.mxu1 %vm12265_vm1, %v14321_v9 }
 0x5d3   : > { %11293 = vmatprep.subr.mxu0 %v14321_v9  ;;  %11323 = vmatprep.subr.mxu1 %v14321_v9 }
 0x5d8   : > { %11261 = vmatmul.mubr.f32.vlgmr.msra.gmra.mrb[6].mxu0 %v12796_v47  ;;  %11291 = vmatmul.mubr.f32.vlgmr.msra.gmra.mrb[8].mxu1 %v12796_v47  ;;  %v6184_v47 = vstv %s12988_s4  ;;  %s13090_s4 = sld [smem:[#allocation9 + $0x1f]] }
 0x5d9   : > { %11294 = vmatpush3.msk.msra.mxu0 %vm12713_vm13, %v14319_v25  ;;  %11295 = vmatprep.mubr.msk.f32.mxu0 %vm12265_vm1, %v14321_v9 }
 0x5da   : > { %11324 = vmatpush3.msk.msra.mxu1 %vm12718_vm14, %v14319_v25  ;;  %11325 = vmatprep.mubr.msk.f32.mxu1 %vm12265_vm1, %v14321_v9 }
 0x5db   : > { %11298 = vmatprep.subr.mxu0 %v14321_v9  ;;  %11328 = vmatprep.subr.mxu1 %v14321_v9 }
 0x5dc   : > { %11296 = vmatmul.mubr.f32.vlgmr.msra.gmra.mrb[8].mxu0 %v4815_v57  ;;  %11326 = vmatmul.mubr.f32.vlgmr.msra.gmra.mrb[10].mxu1 %v4815_v57  ;;  %v6190_v57 = vstv %s13028_s6  ;;  %s13198_s6 = sld [smem:[#allocation9 + $0x34]] }
 0x5dd   : > { %11299 = vmatpush3.msra.mxu0 %v12756_v43  ;;  %11300 = vmatprep.mubr.msk.f32.mxu0 %vm12265_vm1, %v14321_v9 }
 0x5de   : > { %11329 = vmatpush3.msra.mxu1 %v12758_v45  ;;  %11330 = vmatprep.mubr.msk.f32.mxu1 %vm12265_vm1, %v14321_v9 }
 0x5df   : > { %11303 = vmatprep.subr.mxu0 %v14321_v9  ;;  %11333 = vmatprep.subr.mxu1 %v14321_v9 }
 0x5e4   : > { %11301 = vmatmul.mubr.f32.vlgmr.msra.gmra.mrb[8].mxu0 %v12863_v53  ;;  %11331 = vmatmul.mubr.f32.vlgmr.msra.gmra.mrb[10].mxu1 %v12863_v53 }
 0x5e5   : > { %11304 = vmatpush3.msra.mxu0 %v12736_v28  ;;  %11305 = vmatprep.mubr.msk.f32.mxu0 %vm12265_vm1, %v14321_v9 }
 0x5e6   : > { %11334 = vmatpush3.msra.mxu1 %v12740_v30  ;;  %11335 = vmatprep.mubr.msk.f32.mxu1 %vm12265_vm1, %v14321_v9 }
 0x5e7   : > { %11308 = vmatprep.subr.mxu0 %v14321_v9  ;;  %11338 = vmatprep.subr.mxu1 %v14321_v9 }
 0x5ec   : > { %11306 = vmatmul.mubr.f32.vlgmr.msra.gmra.mrb[8].mxu0 %v4812_v54  ;;  %11336 = vmatmul.mubr.f32.vlgmr.msra.gmra.mrb[10].mxu1 %v4812_v54  ;;  %v5947_v54 = vstv %s13022_s30  ;;  %s13114_s30 = sld [smem:[#allocation9 + $0x42]] }
 0x5ed   : > { %11309 = vmatpush3.msk.msra.mxu0 %vm12713_vm13, %v14319_v25  ;;  %11310 = vmatprep.mubr.msk.f32.mxu0 %vm12265_vm1, %v14321_v9 }
 0x5ee   : > { %11339 = vmatpush3.msk.msra.mxu1 %vm12718_vm14, %v14319_v25  ;;  %11340 = vmatprep.mubr.msk.f32.mxu1 %vm12265_vm1, %v14321_v9 }
 0x5ef   : > { %11313 = vmatprep.subr.mxu0 %v14321_v9  ;;  %11343 = vmatprep.subr.mxu1 %v14321_v9 }
 0x5f4   : > { %11311 = vmatmul.mubr.f32.vlgmr.msra.gmra.mrb[8].mxu0 %v4813_v55  ;;  %11341 = vmatmul.mubr.f32.vlgmr.msra.gmra.mrb[10].mxu1 %v4813_v55  ;;  %v6028_v55 = vstv %s13024_s17  ;;  %s13108_s17 = sld [smem:[#allocation9 + $0x27]] }
 0x5f5   : > { %11314 = vmatpush3.msra.mxu0 %v12747_v35  ;;  %11315 = vmatprep.mubr.msk.f32.mxu0 %vm12265_vm1, %v14321_v9 }
 0x5f6   : > { %11344 = vmatpush3.msra.mxu1 %v12750_v37  ;;  %11345 = vmatprep.mubr.msk.f32.mxu1 %vm12265_vm1, %v14321_v9 }
 0x5f7   : > { %11318 = vmatprep.subr.mxu0 %v14321_v9  ;;  %11348 = vmatprep.subr.mxu1 %v14321_v9 }
 0x5fc   : > { %11316 = vmatmul.mubr.f32.vlgmr.msra.gmra.mrb[8].mxu0 %v12863_v53  ;;  %11346 = vmatmul.mubr.f32.vlgmr.msra.gmra.mrb[10].mxu1 %v12863_v53 }
 0x5fd   : > { %11319 = vmatpush3.msk.msra.mxu0 %vm12713_vm13, %v14319_v25  ;;  %11320 = vmatprep.mubr.msk.f32.mxu0 %vm12265_vm1, %v14321_v9 }
 0x5fe   : > { %11349 = vmatpush3.msk.msra.mxu1 %vm12718_vm14, %v14319_v25  ;;  %11350 = vmatprep.mubr.msk.f32.mxu1 %vm12265_vm1, %v14321_v9 }
 0x5ff   : > { %11353 = vmatprep.subr.mxu0 %v14321_v9  ;;  %11413 = vmatprep.subr.mxu1 %v14321_v9 }
 0x604   : > { %11321 = vmatmul.mubr.f32.vlgmr.msra.gmra.mrb[8].mxu0 %v12863_v53  ;;  %11351 = vmatmul.mubr.f32.vlgmr.msra.gmra.mrb[10].mxu1 %v12863_v53 }
 0x605   : > { %11354 = vmatpush3.msk.msra.mxu0 %vm12713_vm13, %v14319_v25  ;;  %11355 = vmatprep.mubr.msk.f32.mxu0 %vm12265_vm1, %v14321_v9 }
 0x606   : > { %11358 = vmatprep.subr.mxu0 %v14321_v9  ;;  %11415 = vmatprep.mubr.msk.f32.mxu1 %vm12265_vm1, %v14321_v9 }
 0x67f   : > { %v3416_v52 = vpop.f32.mrb[4].mxu0  ;;  %v3856_v53 = vpop.f32.mrb[6].mxu1 }
 0x680   : > { %v5627_v58 = vmul.f32 %v5626_v39, %v3416_v52  ;;  %v5699_v59 = vmul.f32 %v5698_v40, %v3416_v52  ;;  %v5780_v62 = vmul.f32 %v5779_v29, %v3416_v52  ;;  %v5861_v63 = vmul.f32 %v5860_v41, %v3416_v52  ;;  %v11202_v2 = vpop.f32.mrb[5].mxu0  ;;  %v11232_v3 = vpop.f32.mrb[7].mxu1 }
 0x681   : > { %v5942_v8 = vmul.f32 %v5941_v42, %v3416_v52  ;;  %v6023_v10 = vmul.f32 %v6022_v44, %v3416_v52  ;;  %v6104_v25 = vmul.f32 %v6103_v46, %v3416_v52  ;;  %v6185_v9 = vmul.f32 %v6184_v47, %v3416_v52 }
 0x682   : > { %v5628_v60 = vadd.f32 %v5627_v58, %v1150_v22  ;;  %v5700_v61 = vadd.f32 %v5699_v59, %v1152_v26  ;;  %v5781_v7 = vadd.f32 %v5780_v62, %v1154_v27  ;;  %v5862_v5 = vadd.f32 %v5861_v63, %v1156_v31 }
 0x683   : > { %v5943_v1 = vadd.f32 %v5942_v8, %v1158_v33  ;;  %v6024_v15 = vadd.f32 %v6023_v10, %v1160_v34  ;;  %v6105_v6 = vadd.f32 %v6104_v25, %v1162_v36  ;;  %v6186_v4 = vadd.f32 %v6185_v9, %v1164_v38 }
 0x684   : > { %v5631_v0 = vadd.f32 %v5630_v11, %v5628_v60  ;;  %v5633_v14 = vmul.f32 %v5632_v48, %v3856_v53  ;;  %v5703_v39 = vadd.f32 %v5702_v13, %v5700_v61  ;;  %v5705_v40 = vmul.f32 %v5704_v49, %v3856_v53 }
 0x685   : > { %v5784_v29 = vadd.f32 %v5783_v16, %v5781_v7  ;;  %v5786_v41 = vmul.f32 %v5785_v50, %v3856_v53  ;;  %v5865_v2 = vadd.f32 %v5864_v17, %v5862_v5  ;;  %v5867_v3 = vmul.f32 %v5866_v51, %v3856_v53 }
 0x686   : > { %v13066_v42 = vadd.f32 %v5633_v14, %v5631_v0  ;;  %v13068_v44 = vadd.f32 %v5705_v40, %v5703_v39  ;;  %v5946_v22 = vadd.f32 %v5945_v18, %v5943_v1  ;;  %v5948_v26 = vmul.f32 %v5947_v54, %v3856_v53 }
 0x687   : > { %v13070_v27 = vadd.f32 %v5786_v41, %v5784_v29  ;;  %v13072_v31 = vadd.f32 %v5867_v3, %v5865_v2  ;;  %v6027_v25 = vadd.f32 %v6026_v19, %v6024_v15  ;;  %v6029_v9 = vmul.f32 %v6028_v55, %v3856_v53 }
 0x688   : > { %v13074_v60 = vadd.f32 %v5948_v26, %v5946_v22  ;;  %v6108_v61 = vadd.f32 %v13037_v20, %v6105_v6  ;;  %v6110_v7 = vmul.f32 %v6109_v56, %v3856_v53  ;;  %v6189_v5 = vadd.f32 %v13040_v21, %v6186_v4 }
 0x689   : > { %v13078_v11 = vadd.f32 %v6029_v9, %v6027_v25  ;;  %v6191_v0 = vmul.f32 %v6190_v57, %v3856_v53  ;;  %v5638_v4 = vstv %s13084_s0  ;;  %v5710_v6 = vstv %s13086_s2  ;;  %s13200_s0 = sld [smem:[#allocation9 + $0x3d]]  ;;  %s13202_s2 = sld [smem:[#allocation9 + $0x46]] }
 0x68a   : > { %v13080_v14 = vadd.f32 %v6110_v7, %v6108_v61  ;;  %v5791_v15 = vstv %s13088_s3  ;;  %v5872_v13 = vstv %s13090_s4  ;;  %v5953_v16 = vstv %s13092_s5  ;;  %s13204_s3 = sld [smem:[#allocation9 + $0x6]]  ;;  %s13206_s4 = sld [smem:[#allocation9 + $0xf]] }
 0x68b   : > { %v13082_v1 = vadd.f32 %v6191_v0, %v6189_v5  ;;  %v6034_v17 = vstv %s13094_s7  ;;  %v6115_v18 = vstv %s13096_s8  ;;  %v6196_v19 = vstv %s13098_s9  ;;  %s13208_s5 = sld [smem:[#allocation9 + $0x18]]  ;;  %s13210_s7 = sld [smem:[#allocation9 + $0x21]] }
 0x68c   : > { %v5639_v20 = vmul.f32 %v5638_v4, %v12644_v12  ;;  %v5711_v21 = vmul.f32 %v5710_v6, %v12644_v12  ;;  %v5792_v33 = vmul.f32 %v5791_v15, %v12644_v12  ;;  %v5873_v34 = vmul.f32 %v5872_v13, %v12644_v12  ;;  %s13212_s8 = sld [smem:[#allocation9 + $0x2a]]  ;;  %s13214_s9 = sld [smem:[#allocation9 + $0x33]] }
 0x68d   : > { %v5954_v36 = vmul.f32 %v5953_v16, %v12644_v12  ;;  %v6035_v38 = vmul.f32 %v6034_v17, %v12644_v12  ;;  %v6116_v46 = vmul.f32 %v6115_v18, %v12644_v12  ;;  %v6197_v47 = vmul.f32 %v6196_v19, %v12644_v12 }
 0x68e   : > { %v5635_v48 = vstv %s13100_s11  ;;  %v5707_v49 = vstv %s13102_s12  ;;  %v5788_v50 = vstv %s13104_s13  ;;  %v5869_v51 = vstv %s13106_s14  ;;  %s13216_s11 = sld [smem:[#allocation9 + $0x3c]]  ;;  %s13218_s12 = sld [smem:[#allocation9 + $0x45]] }
 0x68f   : > { %v5950_v52 = vstv %s13108_s17  ;;  %v6031_v53 = vstv %s13110_s29  ;;  %v6112_v54 = vstv %s13112_s16  ;;  %v6193_v55 = vstv %s13114_s30  ;;  %s13220_s13 = sld [smem:[#allocation9 + $0x8]]  ;;  %s13222_s14 = sld [smem:[#allocation9 + $0x11]] }
 0x690   : > { %v5641_v56 = vstv %s13116_s10  ;;  %v5713_v57 = vstv %s13118_s1  ;;  %v5794_v58 = vstv %s13120_s25  ;;  %v5875_v59 = vstv %s13122_s28  ;;  %s13224_s17 = sld [smem:[#allocation9 + $0x1a]]  ;;  %s13226_s29 = sld [smem:[#allocation9 + $0x23]] }
 0x691   : > { %v5956_v8 = vstv %s13124_s15  ;;  %v6037_v10 = vstv %s13126_s26  ;;  %v6118_v12 = vstv %s13128_s22  ;;  %v6199_v39 = vstv %s13130_s18  ;;  %s13228_s16 = sld [smem:[#allocation9 + $0x2c]]  ;;  %s13230_s30 = sld [smem:[#allocation9 + $0x35]] }
 0x692   : > { %s13232_s10 = sld [smem:[#allocation9 + $0x3e]]  ;;  %s13234_s1 = sld [smem:[#allocation9 + $0x47]] }
 0x693   : > { %s13236_s25 = sld [smem:[#allocation12]]  ;;  %s13238_s28 = sld [smem:[#allocation12 + $0x9]] }
 0x694   : > { %s13240_s15 = sld [smem:[#allocation12 + $0x12]]  ;;  %s13242_s26 = sld [smem:[#allocation12 + $0x1b]] }
 0x695   : > { %s13244_s22 = sld [smem:[#allocation12 + $0x24]]  ;;  %s13246_s18 = sld [smem:[#allocation12 + $0x2d]] }
 0x698   : > { %14419 = sst [smem:[#allocation44_spill]] %s13232_s10  ;;  %s13250_s10 = sld [smem:[#allocation12 + $0x3f]] }
 0x699   : > { %14420 = sst [smem:[#allocation45_spill]] %s13234_s1  ;;  %s13252_s1 = sld [smem:[#allocation12 + $0x2]] }
 0x69a   : > { %14421 = sst [smem:[#allocation46_spill]] %s13236_s25  ;;  %s13259_s25 = sld [smem:[#allocation12 + $0x14]] }
 0x69b   : > { %14422 = sst [smem:[#allocation47_spill]] %s13238_s28  ;;  %s13257_s28 = sld [smem:[#allocation12 + $0xb]] }
 0x69c   : > { %14423 = sst [smem:[#allocation48_spill]] %s13240_s15 }
 0x69d   : > { %14424 = sst [smem:[#allocation49_spill]] %s13244_s22  ;;  %s13265_s22 = sld [smem:[#allocation12 + $0x1d]] }
 0x69e   : > { %14425 = sst [smem:[#allocation50_spill]] %s13246_s18  ;;  %s13267_s18 = sld [smem:[#allocation12 + $0x26]] }
 0x69f   : > { %14427 = sst [smem:[#allocation52_spill]] %s13250_s10  ;;  %s13270_s10 = sld [smem:[#allocation12 + $0x2f]] }
 0x6a4   : > { %14428 = sst [smem:[#allocation53_spill]] %s13267_s18  ;;  %s13397_s18 = sld [smem:[#allocation12 + $0x13]] }
 0x6a5   : > { %14429 = sst [smem:[#allocation54_spill]] %s13270_s10  ;;  %s13385_s10 = sld [smem:[#allocation12 + $0x1]] }
 0x6ab   : > { %v4299_v62 = vpop.f32.mrb[6].mxu0  ;;  %v4739_v63 = vpop.f32.mrb[8].mxu1 }
 0x6ac   : > { %v5636_v40 = vmul.f32 %v5635_v48, %v4299_v62  ;;  %v5708_v29 = vmul.f32 %v5707_v49, %v4299_v62  ;;  %v5789_v41 = vmul.f32 %v5788_v50, %v4299_v62  ;;  %v5870_v2 = vmul.f32 %v5869_v51, %v4299_v62  ;;  %v11262_v3 = vpop.f32.mrb[7].mxu0  ;;  %v11292_v22 = vpop.f32.mrb[9].mxu1 }
 0x6ad   : > { %v5951_v26 = vmul.f32 %v5950_v52, %v4299_v62  ;;  %v6032_v25 = vmul.f32 %v6031_v53, %v4299_v62  ;;  %v6113_v9 = vmul.f32 %v6112_v54, %v4299_v62  ;;  %v6194_v61 = vmul.f32 %v6193_v55, %v4299_v62 }
 0x6ae   : > { %v5637_v7 = vadd.f32 %v5636_v40, %v13066_v42  ;;  %v5709_v5 = vadd.f32 %v5708_v29, %v13068_v44  ;;  %v5790_v0 = vadd.f32 %v5789_v41, %v13070_v27  ;;  %v5871_v4 = vadd.f32 %v5870_v2, %v13072_v31 }
 0x6af   : > { %v5952_v6 = vadd.f32 %v5951_v26, %v13074_v60  ;;  %v6033_v15 = vadd.f32 %v6032_v25, %v13078_v11  ;;  %v6114_v13 = vadd.f32 %v6113_v9, %v13080_v14  ;;  %v6195_v16 = vadd.f32 %v6194_v61, %v13082_v1 }
 0x6b0   : > { %v5640_v17 = vadd.f32 %v5639_v20, %v5637_v7  ;;  %v5642_v18 = vmul.f32 %v5641_v56, %v4739_v63  ;;  %v5712_v19 = vadd.f32 %v5711_v21, %v5709_v5  ;;  %v5714_v48 = vmul.f32 %v5713_v57, %v4739_v63 }
 0x6b1   : > { %v5793_v49 = vadd.f32 %v5792_v33, %v5790_v0  ;;  %v5795_v42 = vmul.f32 %v5794_v58, %v4739_v63  ;;  %v5874_v50 = vadd.f32 %v5873_v34, %v5871_v4  ;;  %v5876_v44 = vmul.f32 %v5875_v59, %v4739_v63 }
 0x6b2   : > { %v13172_v51 = vadd.f32 %v5642_v18, %v5640_v17  ;;  %v13174_v27 = vadd.f32 %v5714_v48, %v5712_v19  ;;  %v5955_v31 = vadd.f32 %v5954_v36, %v5952_v6  ;;  %v5957_v60 = vmul.f32 %v5956_v8, %v4739_v63 }
 0x6b3   : > { %v13176_v52 = vadd.f32 %v5795_v42, %v5793_v49  ;;  %v13178_v11 = vadd.f32 %v5876_v44, %v5874_v50  ;;  %v6036_v14 = vadd.f32 %v6035_v38, %v6033_v15  ;;  %v6038_v1 = vmul.f32 %v6037_v10, %v4739_v63 }
 0x6b4   : > { %v13180_v20 = vadd.f32 %v5957_v60, %v5955_v31  ;;  %v6117_v21 = vadd.f32 %v6116_v46, %v6114_v13  ;;  %v6119_v53 = vmul.f32 %v6118_v12, %v4739_v63  ;;  %v6198_v33 = vadd.f32 %v6197_v47, %v6195_v16 }
 0x6b5   : > { %v13182_v54 = vadd.f32 %v6038_v1, %v6036_v14  ;;  %v6200_v34 = vmul.f32 %v6199_v39, %v4739_v63  ;;  %v5647_v36 = vstv %s13188_s24  ;;  %v5719_v38 = vstv %s13190_s27  ;;  %s13272_s24 = sld [smem:[#allocation12 + $0x38]]  ;;  %s13283_s27 = sld [smem:[#allocation12 + $0x41]] }
 0x6b6   : > { %v13184_v55 = vadd.f32 %v6119_v53, %v6117_v21  ;;  %v5800_v46 = vstv %s13192_s20  ;;  %v5881_v47 = vstv %s13194_s21  ;;  %v5962_v57 = vstv %s13196_s23  ;;  %s13285_s20 = sld [smem:[#allocation12 + $0x6]]  ;;  %s13299_s21 = sld [smem:[#allocation12 + $0xf]] }
 0x6b7   : > { %v13186_v56 = vadd.f32 %v6200_v34, %v6198_v33  ;;  %v6043_v58 = vstv %s13198_s6  ;;  %v6124_v59 = vstv %s13200_s0  ;;  %v6205_v62 = vstv %s13202_s2  ;;  %s13301_s23 = sld [smem:[#allocation12 + $0x18]]  ;;  %s14435_s6 = sld [smem:[#allocation44_spill]] }
 0x6b8   : > { %v13275_v63 = vmul.f32 %v5647_v36, %v12742_v32  ;;  %v13278_v8 = vmul.f32 %v5719_v38, %v12742_v32  ;;  %v13281_v10 = vmul.f32 %v5800_v46, %v12742_v32  ;;  %v13288_v12 = vmul.f32 %v5881_v47, %v12742_v32  ;;  %s13309_s0 = sld [smem:[#allocation12 + $0x21]]  ;;  %s14437_s2 = sld [smem:[#allocation45_spill]] }
 0x6b9   : > { %v13291_v39 = vmul.f32 %v5962_v57, %v12742_v32  ;;  %v13294_v40 = vmul.f32 %v6043_v58, %v12742_v32  ;;  %v13297_v29 = vmul.f32 %v6124_v59, %v12742_v32  ;;  %v13304_v41 = vmul.f32 %v6205_v62, %v12742_v32 }
 0x6ba   : > { %v5644_v2 = vstv %s13204_s3  ;;  %v5716_v3 = vstv %s13206_s4  ;;  %v5797_v22 = vstv %s13208_s5  ;;  %v5878_v26 = vstv %s13210_s7  ;;  %s13317_s3 = sld [smem:[#allocation12 + $0x33]]  ;;  %s13357_s5 = sld [smem:[#allocation12 + $0x8]] }
 0x6bb   : > { %14430 = sst [smem:[#allocation55_spill]] %s13272_s24  ;;  %v5959_v25 = vstv %s13212_s8  ;;  %v6040_v9 = vstv %s13214_s9  ;;  %v6121_v32 = vstv %s13216_s11  ;;  %s13319_s24 = sld [smem:[#allocation12 + $0x3c]]  ;;  %v6202_v61 = vstv %s13218_s12 }
 0x6bc   : > { %14431 = sst [smem:[#allocation56_spill]] %s13283_s27  ;;  %s14440_s27 = sld [smem:[#allocation47_spill]]  ;;  %v5650_v7 = vstv %s13220_s13  ;;  %v5722_v5 = vstv %s13222_s14  ;;  %v5803_v0 = vstv %s13224_s17  ;;  %v5884_v4 = vstv %s13226_s29 }
 0x6bd   : > { %14432 = sst [smem:[#allocation57_spill]] %s13285_s20  ;;  %s13311_s20 = sld [smem:[#allocation12 + $0x2a]]  ;;  %v5965_v6 = vstv %s13228_s16  ;;  %v6046_v15 = vstv %s13230_s30  ;;  %v6127_v13 = vstv %s14435_s6  ;;  %v5833_v19 = vstv %s13240_s15 }
 0x6be   : > { %14433 = sst [smem:[#allocation58_spill]] %s13299_s21  ;;  %s14439_s21 = sld [smem:[#allocation46_spill]]  ;;  %v6208_v16 = vstv %s14437_s2  ;;  %v5914_v48 = vstv %s13242_s26  ;;  %v5684_v31 = vstv %s13252_s1  ;;  %v5758_v60 = vstv %s13257_s28 }
 0x6bf   : > { %14434 = sst [smem:[#allocation59_spill]] %s13301_s23  ;;  %s14441_s23 = sld [smem:[#allocation49_spill]]  ;;  %v5839_v14 = vstv %s13259_s25 }
 0x6c0   : > { %14436 = sst [smem:[#allocation44_spill]] %s13309_s0  ;;  %s14448_s9 = sld [smem:[#allocation57_spill]] }
 0x6c1   : > { %14442 = sst [smem:[#allocation46_spill]] %s13317_s3  ;;  %s13361_s8 = sld [smem:[#allocation12 + $0x1a]] }
 0x6c2   : > { %14444 = sst [smem:[#allocation47_spill]] %s13319_s24  ;;  %v5752_v18 = vstv %s14440_s27  ;;  %s13346_s15 = sld [smem:[#allocation12 + $0x45]] }
 0x6c3   : > { %14438 = sst [smem:[#allocation45_spill]] %s13311_s20  ;;  %s13363_s7 = sld [smem:[#allocation12 + $0x23]] }
 0x6c4   : > { %v5680_v17 = vstv %s14439_s21  ;;  %s13365_s24 = sld [smem:[#allocation12 + $0x2c]]  ;;  %s13367_s3 = sld [smem:[#allocation12 + $0x35]] }
 0x6c5   : > { %s13373_s20 = sld [smem:[#allocation12 + $0x3e]]  ;;  %s13375_s0 = sld [smem:[#allocation12 + $0x47]] }
 0x6c6   : > { %s13387_s12 = sld [smem:[#allocation12 + $0xa]]  ;;  %s13399_s4 = sld [smem:[#allocation12 + $0x1c]] }
 0x6c7   : > { %14452 = sst [smem:[#allocation57_spill]] %s13361_s8  ;;  %s13409_s13 = sld [smem:[#allocation12 + $0x25]] }
 0x6c8   : > { %14451 = sst [smem:[#allocation49_spill]] %s13346_s15  ;;  %s13411_s14 = sld [smem:[#allocation12 + $0x2e]] }
 0x6c9   : > { %s13419_s17 = sld [smem:[#allocation12 + $0x37]]  ;;  %s13427_s29 = sld [smem:[#allocation12 + $0x40]] }
 0x6ca   : > { %14453 = sst [smem:[#allocation60_spill]] %s13365_s24  ;;  %s13447_s15 = sld [smem:[#allocation12 + $0xc]] }
 0x6cb   : > { %14454 = sst [smem:[#allocation61_spill]] %s13373_s20  ;;  %s13429_s11 = sld [smem:[#allocation12 + $0x3]] }
 0x6cc   : > { %14455 = sst [smem:[#allocation62_spill]] %s13375_s0  ;;  %s13459_s24 = sld [smem:[#allocation12 + $0x1e]] }
 0x6cd   : > { %s13453_s8 = sld [smem:[#allocation12 + $0x15]]  ;;  %s13474_s0 = sld [smem:[#allocation12 + $0x27]] }
 0x6ce   : > { %s13476_s20 = sld [smem:[#allocation12 + $0x30]]  ;;  %s13633_s30 = sld [smem:[#allocation12 + $0x39]] }
 0x6cf   : > { %s14457_s1 = sld [smem:[#allocation58_spill]]  ;;  %s14459_s25 = sld [smem:[#allocation53_spill]] }
 0x6d0   : > { %s14458_s27 = sld [smem:[#allocation50_spill]]  ;;  %s14462_s28 = sld [smem:[#allocation59_spill]] }
 0x6d1   : > { %s14463_s26 = sld [smem:[#allocation54_spill]]  ;;  %s14470_s21 = sld [smem:[#allocation45_spill]] }
 0x6d2   : > { %s14473_s6 = sld [smem:[#allocation55_spill]]  ;;  %s14474_s2 = sld [smem:[#allocation46_spill]] }
 0x6d3   : > { %s13681_s16 = sld [smem:[#allocation12 + $0x7]] }
 0x6d7   : > { %v5182_v47 = vpop.f32.mrb[8].mxu0  ;;  %v13351_v57 = vpop.f32.mrb[10].mxu1 }
 0x6d8   : > { %v5645_v50 = vmul.f32 %v5644_v2, %v5182_v47  ;;  %v5717_v53 = vmul.f32 %v5716_v3, %v5182_v47  ;;  %v5798_v33 = vmul.f32 %v5797_v22, %v5182_v47  ;;  %v5879_v34 = vmul.f32 %v5878_v26, %v5182_v47  ;;  %v11322_v21 = vpop.f32.mrb[9].mxu0  ;;  %v11352_v42 = vpop.f32.mrb[11].mxu1 }
 0x6d9   : > { %v5960_v46 = vmul.f32 %v5959_v25, %v5182_v47  ;;  %v6041_v38 = vmul.f32 %v6040_v9, %v5182_v47  ;;  %v6122_v58 = vmul.f32 %v6121_v32, %v5182_v47  ;;  %v6203_v59 = vmul.f32 %v6202_v61, %v5182_v47 }
 0x6da   : > { %v5646_v2 = vadd.f32 %v5645_v50, %v13172_v51  ;;  %v5718_v3 = vadd.f32 %v5717_v53, %v13174_v27  ;;  %v5799_v22 = vadd.f32 %v5798_v33, %v13176_v52  ;;  %v5880_v26 = vadd.f32 %v5879_v34, %v13178_v11 }
 0x6db   : > { %v5961_v25 = vadd.f32 %v5960_v46, %v13180_v20  ;;  %v6042_v9 = vadd.f32 %v6041_v38, %v13182_v54  ;;  %v13380_v32 = vadd.f32 %v6122_v58, %v13184_v55  ;;  %v13383_v51 = vadd.f32 %v6203_v59, %v13186_v56 }
 0x6dc   : > { %v5649_v27 = vadd.f32 %v13275_v63, %v5646_v2  ;;  %v5651_v52 = vmul.f32 %v5650_v7, %v13351_v57  ;;  %v5721_v11 = vadd.f32 %v13278_v8, %v5718_v3  ;;  %v5723_v20 = vmul.f32 %v5722_v5, %v13351_v57 }
 0x6dd   : > { %v5802_v54 = vadd.f32 %v13281_v10, %v5799_v22  ;;  %v5804_v55 = vmul.f32 %v5803_v0, %v13351_v57  ;;  %v5883_v56 = vadd.f32 %v13288_v12, %v5880_v26  ;;  %v5885_v63 = vmul.f32 %v5884_v4, %v13351_v57 }
 0x6de   : > { %v13413_v8 = vadd.f32 %v5651_v52, %v5649_v27  ;;  %v13415_v61 = vadd.f32 %v5723_v20, %v5721_v11  ;;  %v5964_v10 = vadd.f32 %v13291_v39, %v5961_v25  ;;  %v6045_v0 = vadd.f32 %v13294_v40, %v6042_v9 }
 0x6df   : > { %v13421_v12 = vadd.f32 %v5804_v55, %v5802_v54  ;;  %v13423_v5 = vadd.f32 %v5885_v63, %v5883_v56  ;;  %v5966_v3 = vmul.f32 %v5965_v6, %v13351_v57  ;;  %v6047_v7 = vmul.f32 %v6046_v15, %v13351_v57 }
 0x6e0   : > { %v13432_v42 = vmul.f32 0.70710677, %v13413_v8  ;;  %v13435_v39 = vmul.f32 0.70710677, %v13415_v61  ;;  %v6126_v34 = vadd.f32 %v13297_v29, %v13380_v32 }
 0x6e1   : > { %v13440_v53 = vmul.f32 0.70710677, %v13421_v12  ;;  %v13443_v40 = vmul.f32 0.70710677, %v13423_v5  ;;  %v5967_v54 = vadd.f32 %v5966_v3, %v5964_v10  ;;  %v13479_v6 = vadd.f32 %v6047_v7, %v6045_v0 }
 0x6e2   : > { %v5655_v38 = vand.u32 2147483647, %v13432_v42  ;;  %v5727_v46 = vand.u32 2147483647, %v13435_v39  ;;  %v13502_v3 = vmul.f32 0.5, %v13413_v8  ;;  %vm5675_vm15 = vcmp.lt.f32.partialorder %v13432_v42, 0.0 }
 0x6e3   : > { %v5808_v59 = vand.u32 2147483647, %v13440_v53  ;;  %v5889_v2 = vand.u32 2147483647, %v13443_v40  ;;  %v13482_v47 = vmul.f32 0.70710677, %v5967_v54 }
 0x6e4   : > { %v5656_v26 = vmul.f32 0.3275911, %v5655_v38  ;;  %v5728_v25 = vmul.f32 0.3275911, %v5727_v46  ;;  %v5741_v11 = vsub.f32 0.0, %v5727_v46  ;;  %vm5747_vm0 = vcmp.lt.f32.partialorder %v13435_v39, 0.0 }
 0x6e5   : > { %v5809_v52 = vmul.f32 0.3275911, %v5808_v59  ;;  %v5890_v63 = vmul.f32 0.3275911, %v5889_v2  ;;  %v5822_v15 = vsub.f32 0.0, %v5808_v59  ;;  %v5903_v29 = vsub.f32 0.0, %v5889_v2 }
 0x6e6   : > { %v5657_v55 = vadd.f32 1.0, %v5656_v26  ;;  %v5729_v56 = vadd.f32 1.0, %v5728_v25  ;;  %v5669_v26 = vsub.f32 0.0, %v5655_v38  ;;  %v13487_v20 = vmul.f32 0.70710677, %v13479_v6 }
 0x6e7   : > { %v5810_v25 = vadd.f32 1.0, %v5809_v52  ;;  %v5891_v58 = vadd.f32 1.0, %v5890_v63  ;;  %v6128_v52 = vmul.f32 %v6127_v13, %v13351_v57  ;;  %v5970_v0 = vand.u32 2147483647, %v13482_v47 }
 0x6e8   : > { %11982 = vrcp.f32 %v5657_v55  ;;  %v5670_v7 = vmul.f32 %v5669_v26, %v5655_v38  ;;  %v6207_v55 = vadd.f32 %v13304_v41, %v13383_v51  ;;  %v6051_v32 = vand.u32 2147483647, %v13487_v20 }
 0x6e9   : > { %11984 = vrcp.f32 %v5729_v56  ;;  %v5742_v56 = vmul.f32 %v5741_v11, %v5727_v46  ;;  %v6129_v63 = vadd.f32 %v6128_v52, %v6126_v34  ;;  %v5823_v27 = vmul.f32 %v5822_v15, %v5808_v59 }
 0x6ea   : > { %11986 = vrcp.f32 %v5810_v25  ;;  %v5971_v9 = vmul.f32 0.3275911, %v5970_v0  ;;  %v6209_v13 = vmul.f32 %v6208_v16, %v13351_v57  ;;  %v6052_v38 = vmul.f32 0.3275911, %v6051_v32 }
 0x6eb   : > { %11988 = vrcp.f32 %v5891_v58  ;;  %v5671_v10 = vmul.f32 1.442695, %v5670_v7  ;;  %v13506_v41 = vmul.f32 0.70710677, %v6129_v63  ;;  %v13511_v34 = vmul.f32 0.5, %v13415_v61 }
 0x6ec   : > { %v5972_v22 = vadd.f32 1.0, %v5971_v9  ;;  %v13508_v51 = vadd.f32 %v6209_v13, %v6207_v55  ;;  %v5743_v46 = vmul.f32 1.442695, %v5742_v56  ;;  %v5904_v58 = vmul.f32 %v5903_v29, %v5889_v2 }
 0x6ed   : > { %v6053_v59 = vadd.f32 1.0, %v6052_v38  ;;  %v13516_v16 = vmul.f32 0.5, %v13421_v12  ;;  %v5824_v57 = vmul.f32 1.442695, %v5823_v27  ;;  %v6132_v8 = vand.u32 2147483647, %v13506_v41 }
 0x6ee   : > { %11990 = vrcp.f32 %v5972_v22  ;;  %v13523_v52 = vmul.f32 0.5, %v13423_v5  ;;  %v5984_v61 = vsub.f32 0.0, %v5970_v0  ;;  %v6065_v7 = vsub.f32 0.0, %v6051_v32 }
 0x6ef   : > { %11992 = vrcp.f32 %v6053_v59  ;;  %v6133_v55 = vmul.f32 0.3275911, %v6132_v8  ;;  %v5905_v27 = vmul.f32 1.442695, %v5904_v58  ;;  %v13527_v22 = vmul.f32 0.70710677, %v13508_v51 }
 0x6f0   : > { %11994 = vpow2.f32 %v5671_v10  ;;  %v13531_v13 = vmul.f32 0.5, %v5967_v54  ;;  %v5985_v59 = vmul.f32 %v5984_v61, %v5970_v0  ;;  %v13540_v58 = vmul.f32 0.5, %v13479_v6 }
 0x6f1   : > { %11996 = vpow2.f32 %v5743_v46  ;;  %v6134_v5 = vadd.f32 1.0, %v6133_v55  ;;  %v6213_v25 = vand.u32 2147483647, %v13527_v22  ;;  %v6066_v26 = vmul.f32 %v6065_v7, %v6051_v32 }
 0x6f2   : > { %v13513_v11 = vpop.eup %11982  ;;  %11998 = vpow2.f32 %v5824_v57  ;;  %v6146_v0 = vsub.f32 0.0, %v6132_v8  ;;  %v5986_v21 = vmul.f32 1.442695, %v5985_v59  ;;  %vm5828_vm2 = vcmp.lt.f32.partialorder %v13440_v53, 0.0 }
 0x6f3   : > { %v13519_v9 = vpop.eup %11984  ;;  %v5660_v15 = vmul.f32 1.0614054, %v13513_v11  ;;  %12000 = vrcp.f32 %v6134_v5  ;;  %v6214_v61 = vmul.f32 0.3275911, %v6213_v25  ;;  %v6067_v7 = vmul.f32 1.442695, %v6066_v26 }
 0x6f4   : > { %v5732_v2 = vmul.f32 1.0614054, %v13519_v9  ;;  %v13529_v56 = vpop.eup %11986  ;;  %12002 = vpow2.f32 %v5905_v27  ;;  %v6147_v59 = vmul.f32 %v6146_v0, %v6132_v8  ;;  %vm5909_vm3 = vcmp.lt.f32.partialorder %v13443_v40, 0.0 }
 0x6f5   : > { %v5661_v12 = vadd.f32 -1.4531521, %v5660_v15  ;;  %v5813_v10 = vmul.f32 1.0614054, %v13529_v56  ;;  %v13536_v15 = vpop.eup %11988  ;;  %v6215_v5 = vadd.f32 1.0, %v6214_v61  ;;  %vm5990_vm4 = vcmp.lt.f32.partialorder %v13482_v47, 0.0 }
 0x6f6   : > { %v5733_v29 = vadd.f32 -1.4531521, %v5732_v2  ;;  %v5894_v2 = vmul.f32 1.0614054, %v13536_v15  ;;  %vm6071_vm5 = vcmp.lt.f32.partialorder %v13487_v20, 0.0  ;;  %v14460_v20 = vstv %s13265_s22  ;;  %s14466_s22 = sld [smem:[#allocation44_spill]] }
 0x6f7   : > { %v5662_v38 = vmul.f32 %v13513_v11, %v5661_v12  ;;  %v5814_v54 = vadd.f32 -1.4531521, %v5813_v10  ;;  %v13543_v12 = vmul.f32 0.5, %v6129_v63  ;;  %12004 = vrcp.f32 %v6215_v5 }
 0x6f8   : > { %v5734_v46 = vmul.f32 %v13519_v9, %v5733_v29  ;;  %v5895_v29 = vadd.f32 -1.4531521, %v5894_v2  ;;  %v13547_v6 = vpop.eup %11990  ;;  %12006 = vpow2.f32 %v5986_v21  ;;  %vm6152_vm6 = vcmp.lt.f32.partialorder %v13506_v41, 0.0 }
 0x6f9   : > { %v5663_v57 = vadd.f32 1.4214138, %v5662_v38  ;;  %v5815_v33 = vmul.f32 %v13529_v56, %v5814_v54  ;;  %v6227_v38 = vsub.f32 0.0, %v6213_v25  ;;  %v13550_v10 = vpop.eup %11992  ;;  %v5975_v62 = vmul.f32 1.0614054, %v13547_v6 }
 0x6fa   : > { %v5735_v55 = vadd.f32 1.4214138, %v5734_v46  ;;  %v5896_v46 = vmul.f32 %v13536_v15, %v5895_v29  ;;  %v6056_v54 = vmul.f32 1.0614054, %v13550_v10  ;;  %12008 = vpow2.f32 %v6067_v7 }
 0x6fb   : > { %v5664_v44 = vmul.f32 %v13513_v11, %v5663_v57  ;;  %v5816_v63 = vadd.f32 1.4214138, %v5815_v33  ;;  %v11995_v57 = vpop.eup %11994  ;;  %v5976_v4 = vadd.f32 -1.4531521, %v5975_v62  ;;  %v6228_v29 = vmul.f32 %v6227_v38, %v6213_v25 }
 0x6fc   : > { %v5736_v32 = vmul.f32 %v13519_v9, %v5735_v55  ;;  %v11997_v2 = vpop.eup %11996  ;;  %v5897_v61 = vadd.f32 1.4214138, %v5896_v46  ;;  %v6057_v33 = vadd.f32 -1.4531521, %v6056_v54  ;;  %v6148_v62 = vmul.f32 1.442695, %v6147_v59 }
 0x6fd   : > { %v5665_v27 = vadd.f32 -0.28449672, %v5664_v44  ;;  %v5817_v26 = vmul.f32 %v13529_v56, %v5816_v63  ;;  %v11999_v49 = vpop.eup %11998  ;;  %v5977_v8 = vmul.f32 %v13547_v6, %v5976_v4  ;;  %vm6233_vm7 = vcmp.lt.f32.partialorder %v13527_v22, 0.0 }
 0x6fe   : > { %v5737_v50 = vadd.f32 -0.28449672, %v5736_v32  ;;  %v5898_v32 = vmul.f32 %v13536_v15, %v5897_v61  ;;  %v13560_v0 = vpop.eup %12000  ;;  %12010 = vpow2.f32 %v6148_v62 }
 0x6ff   : > { %v5666_v55 = vmul.f32 %v13513_v11, %v5665_v27  ;;  %v5818_v1 = vadd.f32 -0.28449672, %v5817_v26  ;;  %v6058_v27 = vmul.f32 %v13550_v10, %v6057_v33  ;;  %v12003_v63 = vpop.eup %12002  ;;  %v5978_v38 = vadd.f32 1.4214138, %v5977_v8 }
 0x700   : > { %v5738_v44 = vmul.f32 %v13519_v9, %v5737_v50  ;;  %v5899_v25 = vadd.f32 -0.28449672, %v5898_v32  ;;  %v6137_v54 = vmul.f32 1.0614054, %v13560_v0 }
 0x701   : > { %v5667_v36 = vadd.f32 0.2548296, %v5666_v55  ;;  %v5819_v21 = vmul.f32 %v13529_v56, %v5818_v1  ;;  %v6059_v46 = vadd.f32 1.4214138, %v6058_v27  ;;  %v6229_v55 = vmul.f32 1.442695, %v6228_v29  ;;  %v13574_v8 = vpop.eup %12004 }
 0x702   : > { %v5739_v5 = vadd.f32 0.2548296, %v5738_v44  ;;  %v5900_v7 = vmul.f32 %v13536_v15, %v5899_v25  ;;  %v5979_v59 = vmul.f32 %v13547_v6, %v5978_v38  ;;  %v6138_v1 = vadd.f32 -1.4531521, %v6137_v54 }
 0x703   : > { %v5668_v50 = vmul.f32 %v13513_v11, %v5667_v36  ;;  %v5820_v61 = vadd.f32 0.2548296, %v5819_v21  ;;  %v6060_v36 = vmul.f32 %v13550_v10, %v6059_v46  ;;  %12012 = vpow2.f32 %v6229_v55  ;;  %v12007_v21 = vpop.eup %12006 }
 0x704   : > { %v5740_v4 = vmul.f32 %v13519_v9, %v5739_v5  ;;  %v5901_v33 = vadd.f32 0.2548296, %v5900_v7  ;;  %v5980_v32 = vadd.f32 -0.28449672, %v5979_v59  ;;  %v6139_v5 = vmul.f32 %v13560_v0, %v6138_v1  ;;  %v12009_v55 = vpop.eup %12008 }
 0x705   : > { %v5673_v26 = vmul.f32 %v11995_v57, %v5668_v50  ;;  %v5821_v9 = vmul.f32 %v13529_v56, %v5820_v61  ;;  %v6061_v29 = vadd.f32 -0.28449672, %v6060_v36 }
 0x706   : > { %v5745_v44 = vmul.f32 %v11997_v2, %v5740_v4  ;;  %v5902_v50 = vmul.f32 %v13536_v15, %v5901_v33  ;;  %v5981_v62 = vmul.f32 %v13547_v6, %v5980_v32  ;;  %v6140_v38 = vadd.f32 1.4214138, %v6139_v5 }
 0x707   : > { %v5674_v11 = vsub.f32 1.0, %v5673_v26  ;;  %v5826_v27 = vmul.f32 %v11999_v49, %v5821_v9  ;;  %v6062_v56 = vmul.f32 %v13550_v10, %v6061_v29  ;;  %v6218_v4 = vmul.f32 1.0614054, %v13574_v8 }
 0x708   : > { %v5746_v57 = vsub.f32 1.0, %v5745_v44  ;;  %v5907_v26 = vmul.f32 %v12003_v63, %v5902_v50  ;;  %v5982_v61 = vadd.f32 0.2548296, %v5981_v62  ;;  %v6141_v59 = vmul.f32 %v13560_v0, %v6140_v38 }
 0x709   : > { %v5676_v2 = vsub.f32 0.0, %v5674_v11  ;;  %v5827_v54 = vsub.f32 1.0, %v5826_v27  ;;  %v6063_v15 = vadd.f32 0.2548296, %v6062_v56 }
 0x70a   : > { %v5748_v25 = vsub.f32 0.0, %v5746_v57  ;;  %v5908_v1 = vsub.f32 1.0, %v5907_v26  ;;  %v5983_v9 = vmul.f32 %v13547_v6, %v5982_v61  ;;  %v6142_v63 = vadd.f32 -0.28449672, %v6141_v59  ;;  %v12011_v6 = vpop.eup %12010 }
 0x70b   : > { %v5677_v46 = vsel %vm5675_vm15, %v5676_v2, %v5674_v11  ;;  %v5829_v36 = vsub.f32 0.0, %v5827_v54  ;;  %v6064_v39 = vmul.f32 %v13550_v10, %v6063_v15  ;;  %v6219_v11 = vadd.f32 -1.4531521, %v6218_v4 }
 0x70c   : > { %v5678_v7 = vadd.f32 1.0, %v5677_v46  ;;  %v5749_v49 = vsel %vm5747_vm0, %v5748_v25, %v5746_v57  ;;  %v5910_v57 = vsub.f32 0.0, %v5908_v1  ;;  %v5988_v29 = vmul.f32 %v12007_v21, %v5983_v9 }
 0x70d   : > { %v5750_v44 = vadd.f32 1.0, %v5749_v49  ;;  %v5830_v32 = vsel %vm5828_vm2, %v5829_v36, %v5827_v54  ;;  %v6069_v2 = vmul.f32 %v12009_v55, %v6064_v39  ;;  %v6220_v27 = vmul.f32 %v13574_v8, %v6219_v11  ;;  %v12013_v62 = vpop.eup %12012 }
 0x70e   : > { %v13591_v42 = vmul.f32 %v5678_v7, %v13502_v3  ;;  %v5831_v5 = vadd.f32 1.0, %v5830_v32  ;;  %v6143_v3 = vmul.f32 %v13560_v0, %v6142_v63  ;;  %v5911_v10 = vsel %vm5909_vm3, %v5910_v57, %v5908_v1 }
 0x70f   : > { %v13595_v33 = vmul.f32 %v5750_v44, %v13511_v34  ;;  %v5989_v50 = vsub.f32 1.0, %v5988_v29  ;;  %v5912_v25 = vadd.f32 1.0, %v5911_v10  ;;  %v6070_v56 = vsub.f32 1.0, %v6069_v2 }
 0x710   : > { %v5681_v34 = vmul.f32 %v5680_v17, %v13591_v42  ;;  %v13610_v21 = vmul.f32 %v5831_v5, %v13516_v16  ;;  %v6144_v38 = vadd.f32 0.2548296, %v6143_v3  ;;  %v6221_v40 = vadd.f32 1.4214138, %v6220_v27 }
 0x711   : > { %v5753_v53 = vmul.f32 %v5752_v18, %v13595_v33  ;;  %v5991_v4 = vsub.f32 0.0, %v5989_v50  ;;  %v5685_v54 = vmul.f32 %v5684_v31, %v13591_v42  ;;  %v13616_v17 = vmul.f32 %v5912_v25, %v13523_v52 }
 0x712   : > { %v6072_v18 = vsub.f32 0.0, %v6070_v56  ;;  %v6145_v26 = vmul.f32 %v13560_v0, %v6144_v38  ;;  %v5834_v16 = vmul.f32 %v5833_v19, %v13610_v21  ;;  %v6222_v55 = vmul.f32 %v13574_v8, %v6221_v40 }
 0x713   : > { %v5754_v46 = vadd.f32 %v5753_v53, %v5681_v34  ;;  %v5992_v61 = vsel %vm5990_vm4, %v5991_v4, %v5989_v50  ;;  %v5759_v31 = vmul.f32 %v5758_v60, %v13595_v33  ;;  %v5840_v52 = vmul.f32 %v5839_v14, %v13610_v21 }
 0x714   : > { %v5993_v7 = vadd.f32 1.0, %v5992_v61  ;;  %v6073_v0 = vsel %vm6071_vm5, %v6072_v18, %v6070_v56  ;;  %v6150_v49 = vmul.f32 %v12011_v6, %v6145_v26  ;;  %v6223_v47 = vadd.f32 -0.28449672, %v6222_v55 }
 0x715   : > { %v5835_v15 = vadd.f32 %v5834_v16, %v5754_v46  ;;  %v6074_v19 = vadd.f32 1.0, %v6073_v0  ;;  %v5915_v59 = vmul.f32 %v5914_v48, %v13616_v17  ;;  %v5760_v60 = vadd.f32 %v5759_v31, %v5685_v54 }
 0x716   : > { %v13639_v14 = vmul.f32 %v5993_v7, %v13531_v13  ;;  %v6151_v44 = vsub.f32 1.0, %v6150_v49  ;;  %v5921_v36 = vmul.f32 %v14460_v20, %v13616_v17  ;;  %v14461_v1 = vstv %s14448_s9  ;;  %s14476_s9 = sld [smem:[#allocation57_spill]] }
 0x717   : > { %v5693_v9 = vmul.f32 %v14461_v1, %v13591_v42  ;;  %v13648_v39 = vmul.f32 %v6074_v19, %v13540_v58  ;;  %v6224_v63 = vmul.f32 %v13574_v8, %v6223_v47  ;;  %v5916_v11 = vadd.f32 %v5915_v59, %v5835_v15 }
 0x718   : > { %v5841_v48 = vadd.f32 %v5840_v52, %v5760_v60  ;;  %v6153_v13 = vsub.f32 0.0, %v6151_v44  ;;  %v14464_v32 = vstv %s14441_s23  ;;  %v14465_v29 = vstv %s14457_s1  ;;  %s14472_s23 = sld [smem:[#allocation51_spill]]  ;;  %s14478_s1 = sld [smem:[#allocation47_spill]] }
 0x719   : > { %v5996_v57 = vmul.f32 %v14464_v32, %v13639_v14  ;;  %v5771_v6 = vmul.f32 %v14465_v29, %v13595_v33  ;;  %v6225_v5 = vadd.f32 0.2548296, %v6224_v63  ;;  %v14467_v58 = vstv %s14458_s27  ;;  %s14495_s27 = sld [smem:[#allocation56_spill]] }
 0x71a   : > { %v6077_v2 = vmul.f32 %v14467_v58, %v13648_v39  ;;  %v5922_v3 = vadd.f32 %v5921_v36, %v5841_v48  ;;  %v14468_v27 = vstv %s14459_s25  ;;  %v6154_v50 = vsel %vm6152_vm6, %v6153_v13, %v6151_v44  ;;  %s14499_s25 = sld [smem:[#allocation62_spill]] }
 0x71b   : > { %v6002_v10 = vmul.f32 %v14468_v27, %v13639_v14  ;;  %v5997_v41 = vadd.f32 %v5996_v57, %v5916_v11  ;;  %v5772_v34 = vadd.f32 %v5771_v6, %v5693_v9  ;;  %v14469_v53 = vstv %s14462_s28  ;;  %s13736_s28 = sld [smem:[#allocation12 + $0x19]] }
 0x71c   : > { %v5852_v25 = vmul.f32 %v14469_v53, %v13610_v21  ;;  %v6155_v56 = vadd.f32 1.0, %v6154_v50  ;;  %v6226_v38 = vmul.f32 %v13574_v8, %v6225_v5  ;;  %v14471_v40 = vstv %s14463_s26  ;;  %s13845_s26 = sld [smem:[#allocation12 + $0x32]] }
 0x71d   : > { %v6003_v4 = vadd.f32 %v6002_v10, %v5922_v3  ;;  %v6083_v46 = vmul.f32 %v14471_v40, %v13648_v39  ;;  %v6078_v54 = vadd.f32 %v6077_v2, %v5997_v41  ;;  %v14475_v26 = vstv %s14466_s22  ;;  %s13848_s22 = sld [smem:[#allocation12 + $0x1f]] }
 0x71e   : > { %v5853_v18 = vadd.f32 %v5852_v25, %v5772_v34  ;;  %v5933_v16 = vmul.f32 %v14475_v26, %v13616_v17  ;;  %v6166_v61 = vstv %s13633_s30  ;;  %v13676_v55 = vmul.f32 %v6155_v56, %v13543_v12  ;;  %s13835_s30 = sld [smem:[#allocation12 + $0x16]] }
 0x71f   : > { %v6231_v31 = vmul.f32 %v12013_v62, %v6226_v38  ;;  %v6084_v8 = vadd.f32 %v6083_v46, %v6003_v4  ;;  %v14477_v52 = vstv %s13357_s5  ;;  %v14479_v49 = vstv %s14470_s21  ;;  %s14484_s5 = sld [smem:[#allocation60_spill]] }
 0x720   : > { %v5697_v7 = vmul.f32 %v14477_v52, %v13591_v42  ;;  %v5934_v0 = vadd.f32 %v5933_v16, %v5853_v18  ;;  %v6014_v15 = vmul.f32 %v14479_v49, %v13639_v14  ;;  %v14480_v19 = vstv %s13359_s19  ;;  %s14491_s19 = sld [smem:[#allocation61_spill]]  ;;  %s13852_s21 = sld [smem:[#allocation12 + $0x3b]] }
 0x721   : > { %v5777_v12 = vmul.f32 %v14480_v19, %v13595_v33  ;;  %v6232_v47 = vsub.f32 1.0, %v6231_v31  ;;  %v14481_v62 = vstv %s14472_s23  ;;  %v14482_v60 = vstv %s14473_s6  ;;  %s13855_s23 = sld [smem:[#allocation12 + $0x28]]  ;;  %s13865_s6 = sld [smem:[#allocation12 + $0x44]] }
 0x722   : > { %v6158_v59 = vmul.f32 %v14481_v62, %v13676_v55  ;;  %v6164_v44 = vmul.f32 %v14482_v60, %v13676_v55  ;;  %v14483_v20 = vstv %s14474_s2  ;;  %v6015_v1 = vadd.f32 %v6014_v15, %v5934_v0  ;;  %s13868_s2 = sld [smem:[#allocation12 + $0x31]] }
 0x723   : > { %v6095_v36 = vmul.f32 %v14483_v20, %v13648_v39  ;;  %v5778_v9 = vadd.f32 %v5777_v12, %v5697_v7  ;;  %v14485_v63 = vstv %s14476_s9  ;;  %v14486_v48 = vstv %s13363_s7  ;;  %s13723_s7 = sld [smem:[#allocation12 + $0x10]]  ;;  %s13875_s9 = sld [smem:[#allocation12 + $0x3a]] }
 0x724   : > { %v5858_v11 = vmul.f32 %v14485_v63, %v13610_v21  ;;  %v5939_v13 = vmul.f32 %v14486_v48, %v13616_v17  ;;  %v6234_v32 = vsub.f32 0.0, %v6232_v47  ;;  %v6159_v57 = vadd.f32 %v6158_v59, %v6078_v54 }
 0x725   : > { %v6165_v29 = vadd.f32 %v6164_v44, %v6084_v8  ;;  %v14487_v6 = vstv %s14478_s1  ;;  %v6096_v58 = vadd.f32 %v6095_v36, %v6015_v1  ;;  %v14488_v3 = vstv %s13385_s10  ;;  %s14493_s10 = sld [smem:[#allocation52_spill]]  ;;  %s1165_s1 = sld [smem:[#allocation2]] }
 0x726   : > { %v6176_v5 = vmul.f32 %v14487_v6, %v13676_v55  ;;  %v5859_v2 = vadd.f32 %v5858_v11, %v5778_v9  ;;  %v5683_v27 = vmul.f32 %v14488_v3, %v13591_v42  ;;  %v14489_v10 = vstv %s13387_s12  ;;  %s13725_s12 = sld [smem:[#allocation12 + $0x42]] }
 0x727   : > { %v5756_v50 = vmul.f32 %v14489_v10, %v13595_v33  ;;  %v6211_v41 = vmul.f32 0.5, %v13508_v51  ;;  %v6235_v34 = vsel %vm6233_vm7, %v6234_v32, %v6232_v47  ;;  %v14490_v53 = vstv %s14484_s5  ;;  %s14526_s5 = sld [smem:[#allocation33_spill]] }
 0x728   : > { %v6020_v25 = vmul.f32 %v14490_v53, %v13639_v14  ;;  %v14492_v56 = vstv %s13397_s18  ;;  %v6236_v4 = vadd.f32 1.0, %v6235_v34  ;;  %v6177_v40 = vadd.f32 %v6176_v5, %v6096_v58  ;;  %s14497_s18 = sld [smem:[#allocation49_spill]] }
 0x729   : > { %v5837_v38 = vmul.f32 %v14492_v56, %v13610_v21  ;;  %v5940_v46 = vadd.f32 %v5939_v13, %v5859_v2  ;;  %v5757_v54 = vadd.f32 %v5756_v50, %v5683_v27  ;;  %v14494_v51 = vstv %s13367_s3  ;;  %s13770_s3 = sld [smem:[#allocation12 + $0x2b]] }
 0x72a   : > { %v6101_v22 = vmul.f32 %v14494_v51, %v13648_v39  ;;  %v14496_v18 = vstv %s13429_s11  ;;  %v14498_v16 = vstv %s13447_s15  ;;  %v5694_v8 = vstv %s13681_s16  ;;  %s13753_s15 = sld [smem:[#allocation12 + $0x22]]  ;;  %s13798_s11 = sld [smem:[#allocation12 + $0x3d]] }
 0x72b   : > { %v5687_v26 = vmul.f32 %v14496_v18, %v13591_v42  ;;  %v5762_v31 = vmul.f32 %v14498_v16, %v13595_v33  ;;  %v13739_v52 = vmul.f32 %v6236_v4, %v6211_v41  ;;  %v6021_v7 = vadd.f32 %v6020_v25, %v5940_v46  ;;  %s13884_s16 = sld [smem:[#allocation12 + $0x43]] }
 0x72c   : > { %v14500_v0 = vstv %s14491_s19  ;;  %v5838_v15 = vadd.f32 %v5837_v38, %v5757_v54  ;;  %v14501_v19 = vstv %s13399_s4  ;;  %v14502_v47 = vstv %s13409_s13  ;;  %s13779_s4 = sld [smem:[#allocation12 + $0x34]]  ;;  %s13817_s13 = sld [smem:[#allocation12 + $0x46]] }
 0x72d   : > { %v6182_v49 = vmul.f32 %v14500_v0, %v13676_v55  ;;  %v5918_v12 = vmul.f32 %v14501_v19, %v13616_v17  ;;  %v5999_v62 = vmul.f32 %v14502_v47, %v13639_v14  ;;  %v5763_v59 = vadd.f32 %v5762_v31, %v5687_v26  ;;  %s14527_s19 = sld [smem:[#allocation27_spill]] }
 0x72e   : > { %v14503_v60 = vstv %s13453_s8  ;;  %v14504_v20 = vstv %s14493_s10  ;;  %v14505_v1 = vstv %s14495_s27  ;;  %v14506_v63 = vstv %s14497_s18  ;;  %s13791_s8 = sld [smem:[#allocation12 + $0xe]]  ;;  %s14529_s10 = scalar_lea.vmem [#allocation16], %s14526_s5 }
 0x72f   : > { %v5843_v44 = vmul.f32 %v14503_v60, %v13610_v21  ;;  %v6239_v36 = vmul.f32 %v14504_v20, %v13739_v52  ;;  %v6245_v9 = vmul.f32 %v14505_v1, %v13739_v52  ;;  %v6257_v11 = vmul.f32 %v14506_v63, %v13739_v52 }
 0x730   : > { %v6102_v48 = vadd.f32 %v6101_v22, %v6021_v7  ;;  %v14507_v13 = vstv %s14499_s25  ;;  %v5919_v6 = vadd.f32 %v5918_v12, %v5838_v15  ;;  %v14508_v58 = vstv %s13459_s24  ;;  %s13782_s24 = sld [smem:[#allocation12 + $0x5]] }
 0x731   : > { %v6263_v32 = vmul.f32 %v14507_v13, %v13739_v52  ;;  %v5844_v5 = vadd.f32 %v5843_v44, %v5763_v59  ;;  %v5924_v2 = vmul.f32 %v14508_v58, %v13616_v17  ;;  %v6240_v3 = vadd.f32 %v6239_v36, %v6159_v57 }
 0x732   : > { %v13772_v27 = vadd.f32 %v6245_v9, %v6165_v29  ;;  %v13774_v10 = vadd.f32 %v6257_v11, %v6177_v40  ;;  %v6183_v50 = vadd.f32 %v6182_v49, %v6102_v48  ;;  %v6000_v41 = vadd.f32 %v5999_v62, %v5919_v6 }
 0x733   : > { %v14509_v34 = vstv %s13411_s14  ;;  %v5925_v25 = vadd.f32 %v5924_v2, %v5844_v5  ;;  %v5773_v56 = vstv %s13723_s7  ;;  %v6266_v57 = vsel %vm1625_vm10, %v6240_v3, 0  ;;  %s13823_s14 = sld [smem:[#allocation12 + $0x20]]  ;;  %s14528_s7 = sld [smem:[#allocation30_spill]] }
 0x734   : > { %v6080_v53 = vmul.f32 %v14509_v34, %v13648_v39  ;;  %v13785_v29 = vadd.f32 %v6263_v32, %v6183_v50  ;;  %v14510_v38 = vstv %s13474_s0  ;;  %v6247_v40 = vstv %s13725_s12  ;;  %s13806_s0 = sld [smem:[#allocation12 + $0x17]]  ;;  %s10328_s12 = sshll.u32 %s14529_s10, 4  ;;  %s14189_s12 = int_to_ptr.vmem [resolvable:$true] %s10328_s12 }
 0x735   : > { %v6005_v4 = vmul.f32 %v14510_v38, %v13639_v14  ;;  %v13793_v46 = vand.u32 4294901760, %v6266_v57  ;;  %v14511_v51 = vstv %s13419_s17  ;;  %v5854_v18 = vstv %s13736_s28  ;;  %s13825_s17 = sld [smem:[#allocation12 + $0xd]]  ;;  %s10283_s27 = sand.u32 1, %s14527_s19  }
 0x736   : > { %v6081_v54 = vadd.f32 %v6080_v53, %v6000_v41  ;;  %v6161_v22 = vmul.f32 %v14511_v51, %v13676_v55  ;;  %v14512_v16 = vstv %s13476_s20  ;;  %v5695_v7 = vmul.f32 %v5694_v8, %v13591_v42  ;;  %s13820_s20 = sld [smem:[#allocation12 + $0x4]]  ;;  %s14179_s18 = sshll.u32 %s14527_s19, 7 }
 0x737   : > { %v6006_v26 = vadd.f32 %v6005_v4, %v5925_v25  ;;  %v6086_v31 = vmul.f32 %v14512_v16, %v13648_v39  ;;  %v5774_v0 = vmul.f32 %v5773_v56, %v13595_v33  ;;  %v13809_v49 = vsub.f32 %v6266_v57, %v13793_v46 }
 0x738   : > { %v14513_v15 = vstv %s13427_s29  ;;  %v6167_v12 = vmul.f32 %v6166_v61, %v13676_v55  ;;  %v5935_v47 = vstv %s13753_s15  ;;  %v6162_v8 = vadd.f32 %v6161_v22, %v6081_v54  ;;  %s13830_s29 = sld [smem:[#allocation12 + $0x29]]  ;;  %s14530_s15 = sld [smem:[#allocation70_spill]] }
 0x739   : > { %v6242_v19 = vmul.f32 %v14513_v15, %v13739_v52  ;;  %v6087_v62 = vadd.f32 %v6086_v31, %v6006_v26  ;;  %v5775_v59 = vadd.f32 %v5774_v0, %v5695_v7  ;;  %v5855_v60 = vmul.f32 %v5854_v18, %v13610_v21  ;;  %p14532_p7 = scmp.ne.s32.totalorder %s14528_s7, 0 }
 0x73a   : > { %v6335_v44 = vand.u32 4294901760, %v13809_v49  ;;  %v6248_v61 = vmul.f32 %v6247_v40, %v13739_v52  ;;  %v6016_v20 = vstv %s13770_s3  ;;  %v5936_v63 = vmul.f32 %v5935_v47, %v13616_v17 }
 0x73b   : > { %v13832_v36 = vadd.f32 %v6242_v19, %v6162_v8  ;;  %v6168_v1 = vadd.f32 %v6167_v12, %v6087_v62  ;;  %v5856_v9 = vadd.f32 %v5855_v60, %v5775_v59  ;;  %v6097_v48 = vstv %s13779_s4  ;;  %s14531_s4 = scalar_lea.vmem [#allocation14], %s14526_s5 }
 0x73c   : > { %v6336_v11 = vsub.f32 %v13809_v49, %v6335_v44  ;;  %v5690_v13 = vstv %s13782_s24  ;;  %v6017_v5 = vmul.f32 %v6016_v20, %v13639_v14  ;;  %v5767_v58 = vstv %s13791_s8  ;;  %s10315_s24 = sshll.u32 %s14531_s4, 4  ;;  %s14191_s8 = scalar_lea.sflag [#allocation15], %s10283_s27  ;;  %s10316_s24 = int_to_ptr.vmem [resolvable:$true] %s10315_s24 }
 0x73d   : > { %v13842_v32 = vadd.f32 %v6248_v61, %v6168_v1  ;;  %v5937_v6 = vadd.f32 %v5936_v63, %v5856_v9  ;;  %v6178_v3 = vstv %s13798_s11  ;;  %v6098_v41 = vmul.f32 %v6097_v48, %v13648_v39  ;;  %s12117_s11 = scalar_lea.vmem %s10316_s24, 128 }
 0x73e   : > { %v6337_v2 = vand.u32 4294901760, %v6336_v11  ;;  %v5848_v34 = vstv %s13806_s0  ;;  %v6259_v53 = vstv %s13817_s13  ;;  %v5691_v25 = vmul.f32 %v5690_v13, %v13591_v42  ;;  %s14185_s3 = scalar_lea.hbm %s14530_s15, %s14179_s18  ;;  %p12118_p13 = scmp.ne.s32.totalorder %s10316_s24, %s12117_s11 }
 0x73f   : > { %v6018_v50 = vadd.f32 %v6017_v5, %v5937_v6  ;;  %v5768_v56 = vmul.f32 %v5767_v58, %v13595_v33  ;;  %v5688_v57 = vstv %s13820_s20  ;;  %v14514_v38 = vmov 0.0   ;;  %s12271_s0 = smov [#allocation14]  }
 0x740   : > { %11356 = vmatmul.mubr.f32.vlgmr.msra.gmra.mrb[10].mxu0 %v6337_v2  ;;  %v6179_v40 = vmul.f32 %v6178_v3, %v13676_v55  ;;  %v5929_v54 = vstv %s13823_s14  ;;  %v5764_v51 = vstv %s13825_s17  ;;  %v5849_v18 = vmul.f32 %v5848_v34, %v13610_v21  ;;  %p12119_p8 = pnand %p12118_p13, %p14532_p7  ;;  %s12121_s13 = sshll.u32 %s12271_s0, 4  ;;  %s12122_s13 = int_to_ptr.vmem [resolvable:$false] %s12121_s13 }
 0x741   : > { %11359 = vmatpush3.msra.mxu0 %v12756_v43  ;;  %11360 = vmatprep.mubr.msk.f32.mxu0 %vm12265_vm1, %v14514_v38  ;;  %v6099_v4 = vadd.f32 %v6098_v41, %v6018_v50  ;;  %v5769_v22 = vadd.f32 %v5768_v56, %v5691_v25  ;;  %v6010_v26 = vstv %s13830_s29  ;;  %v6260_v31 = vmul.f32 %v6259_v53, %v13739_v52  ;;  %s12123_s20 = scalar_lea.vmem %s12122_s13, 256  ;;  %p12124_p0 = scmp.lt.s32.totalorder %s10316_s24, %s12122_s13 }
 0x742   : > { %11363 = vmatprep.subr.mxu0 %v14514_v38  ;;  %v5689_v7 = vmul.f32 %v5688_v57, %v13591_v42  ;;  %v5845_v0 = vstv %s13835_s30  ;;  %v5930_v19 = vmul.f32 %v5929_v54, %v13616_v17  ;;  %v5765_v12 = vmul.f32 %v5764_v51, %v13595_v33  ;;  %p12120_p12 = pneg %p12119_p8  ;;  %p12125_p2 = scmp.lt.s32.totalorder %s12123_s20, %s12117_s11 }
 0x743   : > { %v6180_v16 = vadd.f32 %v6179_v40, %v6099_v4  ;;  %v5850_v15 = vadd.f32 %v5849_v18, %v5769_v22  ;;  %v6091_v8 = vstv %s13845_s26  ;;  %v5926_v62 = vstv %s13848_s22 }
 0x744   : > { %v6011_v60 = vmul.f32 %v6010_v26, %v13639_v14  ;;  %v5766_v61 = vadd.f32 %v5765_v12, %v5689_v7  ;;  %v5846_v42 = vmul.f32 %v5845_v0, %v13610_v21  ;;  %v6172_v20 = vstv %s13852_s21  ;;  %p12126_p5 = por %p12125_p2, %p12124_p0 }
 0x745   : > { %v13881_v47 = vadd.f32 %v6260_v31, %v6180_v16  ;;  %v5931_v59 = vadd.f32 %v5930_v19, %v5850_v15  ;;  %v6007_v1 = vstv %s13855_s23  ;;  %v6092_v9 = vmul.f32 %v6091_v8, %v13648_v39 }
 0x746   : > { %v5847_v63 = vadd.f32 %v5846_v42, %v5766_v61  ;;  %v5927_v11 = vmul.f32 %v5926_v62, %v13616_v17  ;;  %v6253_v48 = vstv %s13865_s6  ;;  %v6088_v13 = vstv %s13868_s2  ;;  %p12127_p1 = pnand %p12126_p5, %p12120_p12 }
 0x747   : > { %v6012_v33 = vadd.f32 %v6011_v60, %v5931_v59  ;;  %v6173_v6 = vmul.f32 %v6172_v20, %v13676_v55  ;;  %v6008_v58 = vmul.f32 %v6007_v1, %v13639_v14  ;;  %v6169_v2 = vstv %s13875_s9  ;;  %v14516_v59 = vld [vmem:[#allocation42_spill] sm:$0xff]  ;;  %v14517_v20 = vld [vmem:[#allocation36_spill] sm:$0xff] }
 0x748   : > { %11361 = vmatmul.mubr.f32.vlgmr.msra.gmra.mrb[10].mxu0 %v13793_v46  ;;  %v5928_v5 = vadd.f32 %v5927_v11, %v5847_v63  ;;  %v6254_v50 = vmul.f32 %v6253_v48, %v13739_v52  ;;  %v6089_v41 = vmul.f32 %v6088_v13, %v13648_v39  ;;  %v6250_v34 = vstv %s13884_s16  ;;  %v14519_v1 = vld [vmem:[#allocation40_spill] sm:$0xff] }
 0x749   : > { %11364 = vmatpush3.msra.mxu0 %v12736_v28  ;;  %11365 = vmatprep.mubr.msk.f32.mxu0 %vm12265_vm1, %v14514_v38  ;;  %v6093_v21 = vadd.f32 %v6092_v9, %v6012_v33  ;;  %v6170_v56 = vmul.f32 %v6169_v2, %v13676_v55  ;;  %v6251_v4 = vmul.f32 %v6250_v34, %v13739_v52  ;;  %v14515_v40 = vmov 1.0   ;;  %v14525_v34 = vld [vmem:[#allocation34_spill] sm:$0xff] }
 0x74a   : > { %11368 = vmatprep.subr.mxu0 %v14514_v38  ;;  %v6009_v17 = vadd.f32 %v6008_v58, %v5928_v5  ;;  %v6709_v39 = vsel %vm1625_vm10, %v13772_v27, 0  ;;  %v8931_v26 = vsel %vm1625_vm10, %v13785_v29, 0  ;;  %v7600_v33 = vsel %vm1625_vm10, %v13842_v32, 0 }
 0x74b   : > { %v6174_v3 = vadd.f32 %v6173_v6, %v6093_v21  ;;  %v6776_v55 = vand.u32 4294901760, %v6709_v39  ;;  %v8998_v16 = vand.u32 4294901760, %v8931_v26  ;;  %v7667_v9 = vand.u32 4294901760, %v7600_v33 }
 0x74c   : > { %v6090_v25 = vadd.f32 %v6089_v41, %v6009_v17  ;;  %v14523_v17 = vld [vmem:[#allocation41_spill] sm:$0xff]  ;;  %v14524_v41 = vld [vmem:[#allocation35_spill] sm:$0xff] }
 0x74d   : > { %v13906_v53 = vadd.f32 %v6254_v50, %v6174_v3  ;;  %v6777_v52 = vsub.f32 %v6709_v39, %v6776_v55  ;;  %v8999_v31 = vsub.f32 %v8931_v26, %v8998_v16  ;;  %v7668_v63 = vsub.f32 %v7600_v33, %v7667_v9  ;;  %v14520_v3 = vld [vmem:[#allocation43_spill] sm:$0xff] }
 0x74e   : > { %v6171_v57 = vadd.f32 %v6170_v56, %v6090_v25  ;;  %v14522_v50 = vld [vmem:[#allocation39_spill] sm:$0xff]  ;;  %vm1002_vm8 = vcmp.eq.s32.totalorder %v14525_v34, %v14524_v41 }
 0x74f   : > { %v9000_v7 = vand.u32 4294901760, %v8999_v31  ;;  %v7669_v11 = vand.u32 4294901760, %v7668_v63 }
 0x750   : > { %11366 = vmatmul.mubr.f32.vlgmr.msra.gmra.mrb[10].mxu0 %v13809_v49  ;;  %v13917_v14 = vadd.f32 %v6251_v4, %v6171_v57  ;;  %v6778_v49 = vand.u32 4294901760, %v6777_v52  ;;  %v1166_v57 = vstv %s1165_s1 }
 0x751   : > { %11369 = vmatpush3.msk.msra.mxu0 %vm12713_vm13, %v14515_v40  ;;  %11370 = vmatprep.mubr.msk.f32.mxu0 %vm12265_vm1, %v14514_v38  ;;  %v9001_v29 = vsub.f32 %v8999_v31, %v9000_v7  ;;  %v7670_v32 = vsub.f32 %v7668_v63, %v7669_v11 }
 0x752   : > { %11373 = vmatprep.subr.mxu0 %v14514_v38  ;;  %v6779_v27 = vsub.f32 %v6777_v52, %v6778_v49 }
 0x753   : > { %v9002_v0 = vand.u32 4294901760, %v9001_v29  ;;  %v7671_v48 = vand.u32 4294901760, %v7670_v32 }
 0x758   : > { %11371 = vmatmul.mubr.f32.vlgmr.msra.gmra.mrb[10].mxu0 %v6335_v44  ;;  %v6780_v44 = vand.u32 4294901760, %v6779_v27 }
 0x759   : > { %11374 = vmatpush3.msra.mxu0 %v12747_v35  ;;  %11375 = vmatprep.mubr.msk.f32.mxu0 %vm12265_vm1, %v14514_v38 }
 0x75a   : > { %11378 = vmatprep.subr.mxu0 %v14514_v38 }
 0x760   : > { %11376 = vmatmul.mubr.f32.vlgmr.msra.gmra.mrb[10].mxu0 %v13793_v46 }
 0x761   : > { %11379 = vmatpush3.msk.msra.mxu0 %vm12713_vm13, %v14515_v40  ;;  %11380 = vmatprep.mubr.msk.f32.mxu0 %vm12265_vm1, %v14514_v38 }
 0x762   : > { %11383 = vmatprep.subr.mxu0 %v14514_v38 }
 0x768   : > { %11381 = vmatmul.mubr.f32.vlgmr.msra.gmra.mrb[10].mxu0 %v13793_v46  ;;  %v8488_v46 = vsel %vm1625_vm10, %v13774_v10, 0 }
 0x769   : > { %11384 = vmatpush3.msk.msra.mxu0 %vm12718_vm14, %v14515_v40  ;;  %11385 = vmatprep.mubr.msk.f32.mxu0 %vm12265_vm1, %v14514_v38  ;;  %v8555_v54 = vand.u32 4294901760, %v8488_v46 }
 0x76a   : > { %11388 = vmatprep.subr.mxu0 %v14514_v38 }
 0x76b   : > { %v8556_v51 = vsub.f32 %v8488_v46, %v8555_v54 }
 0x76d   : > { %v8557_v10 = vand.u32 4294901760, %v8556_v51 }
 0x76f   : > { %v8558_v22 = vsub.f32 %v8556_v51, %v8557_v10 }
 0x770   : > { %11386 = vmatmul.mubr.f32.vlgmr.msra.gmra.mrb[10].mxu0 %v6780_v44 }
 0x771   : > { %11389 = vmatpush3.msra.mxu0 %v12758_v45  ;;  %11390 = vmatprep.mubr.msk.f32.mxu0 %vm12265_vm1, %v14514_v38  ;;  %v8559_v18 = vand.u32 4294901760, %v8558_v22 }
 0x772   : > { %11393 = vmatprep.subr.mxu0 %v14514_v38 }
 0x778   : > { %11391 = vmatmul.mubr.f32.vlgmr.msra.gmra.mrb[10].mxu0 %v6776_v55 }
 0x779   : > { %11394 = vmatpush3.msra.mxu0 %v12740_v30  ;;  %11395 = vmatprep.mubr.msk.f32.mxu0 %vm12265_vm1, %v14514_v38 }
 0x77a   : > { %11398 = vmatprep.subr.mxu0 %v14514_v38 }
 0x780   : > { %11396 = vmatmul.mubr.f32.vlgmr.msra.gmra.mrb[10].mxu0 %v6777_v52 }
 0x781   : > { %11399 = vmatpush3.msk.msra.mxu0 %vm12718_vm14, %v14515_v40  ;;  %11400 = vmatprep.mubr.msk.f32.mxu0 %vm12265_vm1, %v14514_v38 }
 0x782   : > { %11403 = vmatprep.subr.mxu0 %v14514_v38 }
 0x788   : > { %11401 = vmatmul.mubr.f32.vlgmr.msra.gmra.mrb[10].mxu0 %v6778_v49 }
 0x789   : > { %11404 = vmatpush3.msra.mxu0 %v12750_v37  ;;  %11405 = vmatprep.mubr.msk.f32.mxu0 %vm12265_vm1, %v14514_v38 }
 0x78a   : > { %11408 = vmatprep.subr.mxu0 %v14514_v38 }
 0x790   : > { %11406 = vmatmul.mubr.f32.vlgmr.msra.gmra.mrb[10].mxu0 %v6776_v55 }
 0x791   : > { %11409 = vmatpush3.msk.msra.mxu0 %vm12718_vm14, %v14515_v40  ;;  %11410 = vmatprep.mubr.msk.f32.mxu0 %vm12265_vm1, %v14514_v38 }
 0x792   : > { %11503 = vmatprep.subr.mxu0 %v14514_v38 }
 0x798   : > { %11411 = vmatmul.mubr.f32.vlgmr.msra.gmra.mrb[10].mxu0 %v6776_v55 }
 0x799   : > { %11504 = vmatpush3.msk.msra.mxu0 %vm12713_vm13, %v14515_v40  ;;  %11505 = vmatprep.mubr.msk.f32.mxu0 %vm12265_vm1, %v14514_v38 }
 0x79a   : > { %11508 = vmatprep.subr.mxu0 %v14514_v38 }
 0x79c   : > { %11506 = vmatmul.mubr.f32.vlgmr.msra.gmra.mrb[12].mxu0 %v8559_v18 }
 0x79d   : > { %11509 = vmatpush3.msra.mxu0 %v12756_v43  ;;  %11510 = vmatprep.mubr.msk.f32.mxu0 %vm12265_vm1, %v14514_v38 }
 0x79e   : > { %11513 = vmatprep.subr.mxu0 %v14514_v38 }
 0x7a4   : > { %11511 = vmatmul.mubr.f32.vlgmr.msra.gmra.mrb[12].mxu0 %v8555_v54 }
 0x7a5   : > { %11514 = vmatpush3.msra.mxu0 %v12736_v28  ;;  %11515 = vmatprep.mubr.msk.f32.mxu0 %vm12265_vm1, %v14514_v38 }
 0x7a6   : > { %11518 = vmatprep.subr.mxu0 %v14514_v38 }
 0x7ac   : > { %11516 = vmatmul.mubr.f32.vlgmr.msra.gmra.mrb[12].mxu0 %v8556_v51 }
 0x7ad   : > { %11519 = vmatpush3.msk.msra.mxu0 %vm12713_vm13, %v14515_v40  ;;  %11520 = vmatprep.mubr.msk.f32.mxu0 %vm12265_vm1, %v14514_v38 }
 0x7ae   : > { %11523 = vmatprep.subr.mxu0 %v14514_v38 }
 0x7b4   : > { %11521 = vmatmul.mubr.f32.vlgmr.msra.gmra.mrb[12].mxu0 %v8557_v10 }
 0x7b5   : > { %11524 = vmatpush3.msra.mxu0 %v12747_v35  ;;  %11525 = vmatprep.mubr.msk.f32.mxu0 %vm12265_vm1, %v14514_v38 }
 0x7b6   : > { %11528 = vmatprep.subr.mxu0 %v14514_v38 }
 0x7bc   : > { %11526 = vmatmul.mubr.f32.vlgmr.msra.gmra.mrb[12].mxu0 %v8555_v54 }
 0x7bd   : > { %11529 = vmatpush3.msk.msra.mxu0 %vm12713_vm13, %v14515_v40  ;;  %11530 = vmatprep.mubr.msk.f32.mxu0 %vm12265_vm1, %v14514_v38 }
 0x7be   : > { %11533 = vmatprep.subr.mxu0 %v14514_v38 }
 0x7c4   : > { %11531 = vmatmul.mubr.f32.vlgmr.msra.gmra.mrb[12].mxu0 %v8555_v54 }
 0x7c5   : > { %11534 = vmatpush3.msk.msra.mxu0 %vm12718_vm14, %v14515_v40  ;;  %11535 = vmatprep.mubr.msk.f32.mxu0 %vm12265_vm1, %v14514_v38 }
 0x7c6   : > { %11538 = vmatprep.subr.mxu0 %v14514_v38 }
 0x7cc   : > { %11536 = vmatmul.mubr.f32.vlgmr.msra.gmra.mrb[12].mxu0 %v9002_v0 }
 0x7cd   : > { %11539 = vmatpush3.msra.mxu0 %v12758_v45  ;;  %11540 = vmatprep.mubr.msk.f32.mxu0 %vm12265_vm1, %v14514_v38 }
 0x7ce   : > { %11543 = vmatprep.subr.mxu0 %v14514_v38 }
 0x7d4   : > { %11541 = vmatmul.mubr.f32.vlgmr.msra.gmra.mrb[12].mxu0 %v8998_v16 }
 0x7d5   : > { %11544 = vmatpush3.msra.mxu0 %v12740_v30  ;;  %11545 = vmatprep.mubr.msk.f32.mxu0 %vm12265_vm1, %v14514_v38 }
 0x7d6   : > { %11548 = vmatprep.subr.mxu0 %v14514_v38 }
 0x7dc   : > { %11546 = vmatmul.mubr.f32.vlgmr.msra.gmra.mrb[12].mxu0 %v8999_v31 }
 0x7dd   : > { %11549 = vmatpush3.msk.msra.mxu0 %vm12718_vm14, %v14515_v40  ;;  %11550 = vmatprep.mubr.msk.f32.mxu0 %vm12265_vm1, %v14514_v38 }
 0x7de   : > { %11553 = vmatprep.subr.mxu0 %v14514_v38 }
 0x7e4   : > { %11551 = vmatmul.mubr.f32.vlgmr.msra.gmra.mrb[12].mxu0 %v9000_v7 }
 0x7e5   : > { %11554 = vmatpush3.msra.mxu0 %v12750_v37  ;;  %11555 = vmatprep.mubr.msk.f32.mxu0 %vm12265_vm1, %v14514_v38 }
 0x7e6   : > { %11558 = vmatprep.subr.mxu0 %v14514_v38 }
 0x7ec   : > { %11556 = vmatmul.mubr.f32.vlgmr.msra.gmra.mrb[12].mxu0 %v8998_v16 }
 0x7ed   : > { %11559 = vmatpush3.msk.msra.mxu0 %vm12718_vm14, %v14515_v40  ;;  %11560 = vmatprep.mubr.msk.f32.mxu0 %vm12265_vm1, %v14514_v38 }
 0x7ee   : > { %11593 = vmatprep.subr.mxu0 %v14514_v38 }
 0x7f4   : > { %11561 = vmatmul.mubr.f32.vlgmr.msra.gmra.mrb[12].mxu0 %v8998_v16 }
 0x7f5   : > { %11595 = vmatprep.mubr.msk.f32.mxu0 %vm12265_vm1, %v14514_v38 }
 0x86b   : > { %v7147_v15 = vpop.f32.mrb[10].mxu0 }
 0x86c   : > { %v11660_v19 = vadd.f32 %v7147_v15, %v13832_v36  ;;  %v11412_v12 = vpop.f32.mrb[11].mxu0  ;;  %v14518_v36 = vld [vmem:[#allocation38_spill] sm:$0xff] }
 0x86e   : > { %v7153_v8 = vand.u32 4294901760, %v11660_v19 }
 0x870   : > { %v7230_v62 = vsub.f32 %v11660_v19, %v7153_v8  ;;  %11414 = vmatpush3.msra.mxu1 %v7153_v8 }
 0x871   : > { %11416 = vmatmul.mubr.f32.vlgmr.msra.gmra.mrb[12].mxu1 %v14516_v59  ;;  %11418 = vmatprep.subr.mxu1 %v14514_v38 }
 0x872   : > { %v7231_v60 = vand.u32 4294901760, %v7230_v62  ;;  %11420 = vmatprep.mubr.msk.f32.mxu1 %vm12265_vm1, %v14514_v38 }
 0x874   : > { %v7232_v61 = vsub.f32 %v7230_v62, %v7231_v60 }
 0x876   : > { %v7233_v42 = vand.u32 4294901760, %v7232_v61 }
 0x878   : > { %11419 = vmatpush3.msra.mxu1 %v7233_v42 }
 0x879   : > { %11421 = vmatmul.mubr.msk.f32.vlgmr.msra.gmra.mrb[12].mxu1 %vm1625_vm10, %v14517_v20  ;;  %11423 = vmatprep.subr.mxu1 %v14514_v38 }
 0x87a   : > { %11424 = vmatpush3.msra.mxu1 %v7230_v62  ;;  %11425 = vmatprep.mubr.msk.f32.mxu1 %vm12265_vm1, %v14514_v38 }
 0x87b   : > { %11428 = vmatprep.subr.mxu1 %v14514_v38 }
 0x881   : > { %11426 = vmatmul.mubr.f32.vlgmr.msra.gmra.mrb[12].mxu1 %v14518_v36 }
 0x882   : > { %11429 = vmatpush3.msra.mxu1 %v7153_v8  ;;  %11430 = vmatprep.mubr.msk.f32.mxu1 %vm12265_vm1, %v14514_v38 }
 0x883   : > { %11433 = vmatprep.subr.mxu1 %v14514_v38 }
 0x889   : > { %11431 = vmatmul.mubr.f32.vlgmr.msra.gmra.mrb[12].mxu1 %v14519_v1 }
 0x88a   : > { %11434 = vmatpush3.msra.mxu1 %v7231_v60  ;;  %11435 = vmatprep.mubr.msk.f32.mxu1 %vm12265_vm1, %v14514_v38 }
 0x88b   : > { %11438 = vmatprep.subr.mxu1 %v14514_v38 }
 0x891   : > { %11436 = vmatmul.mubr.msk.f32.vlgmr.msra.gmra.mrb[12].mxu1 %vm1625_vm10, %v14517_v20 }
 0x892   : > { %11439 = vmatpush3.msra.mxu1 %v7153_v8  ;;  %11440 = vmatprep.mubr.msk.f32.mxu1 %vm12265_vm1, %v14514_v38 }
 0x893   : > { %11443 = vmatprep.subr.mxu1 %v14514_v38 }
 0x899   : > { %11441 = vmatmul.mubr.msk.f32.vlgmr.msra.gmra.mrb[12].mxu1 %vm1625_vm10, %v14517_v20 }
 0x89a   : > { %11444 = vmatpush3.msk.msra.mxu1 %vm12713_vm13, %v14515_v40  ;;  %11445 = vmatprep.mubr.msk.f32.mxu1 %vm12265_vm1, %v14514_v38 }
 0x89b   : > { %11448 = vmatprep.subr.mxu1 %v14514_v38 }
 0x8a1   : > { %11446 = vmatmul.mubr.f32.vlgmr.msra.gmra.mrb[12].mxu1 %v7671_v48 }
 0x8a2   : > { %11449 = vmatpush3.msra.mxu1 %v12756_v43  ;;  %11450 = vmatprep.mubr.msk.f32.mxu1 %vm12265_vm1, %v14514_v38 }
 0x8a3   : > { %11453 = vmatprep.subr.mxu1 %v14514_v38 }
 0x8a9   : > { %11451 = vmatmul.mubr.f32.vlgmr.msra.gmra.mrb[12].mxu1 %v7667_v9 }
 0x8aa   : > { %11454 = vmatpush3.msra.mxu1 %v12736_v28  ;;  %11455 = vmatprep.mubr.msk.f32.mxu1 %vm12265_vm1, %v14514_v38  ;;  %v8043_v28 = vsel %vm1625_vm10, %v13906_v53, 0  ;;  %v1003_v53 = vsel %vm1002_vm8, 1.0, %v14514_v38 }
 0x8ab   : > { %11458 = vmatprep.subr.mxu1 %v14514_v38  ;;  %v8110_v43 = vand.u32 4294901760, %v8043_v28  ;;  %v9822_v25 = vsel %vm1625_vm10, %v1003_v53, 0 }
 0x8ac   : > { %v9894_v56 = vsub.f32 %v9822_v25, %v9822_v25 }
 0x8ae   : > { %v9895_v4 = vand.u32 4294901760, %v9894_v56 }
 0x8b0   : > { %v9896_v49 = vsub.f32 %v9894_v56, %v9895_v4 }
 0x8b1   : > { %11456 = vmatmul.mubr.f32.vlgmr.msra.gmra.mrb[12].mxu1 %v7668_v63 }
 0x8b2   : > { %11459 = vmatpush3.msk.msra.mxu1 %vm12713_vm13, %v14515_v40  ;;  %11460 = vmatprep.mubr.msk.f32.mxu1 %vm12265_vm1, %v14514_v38  ;;  %v9897_v46 = vand.u32 4294901760, %v9896_v49 }
 0x8b3   : > { %11463 = vmatprep.subr.mxu1 %v14514_v38 }
 0x8b9   : > { %11461 = vmatmul.mubr.f32.vlgmr.msra.gmra.mrb[12].mxu1 %v7669_v11 }
 0x8ba   : > { %11464 = vmatpush3.msra.mxu1 %v12747_v35  ;;  %11465 = vmatprep.mubr.msk.f32.mxu1 %vm12265_vm1, %v14514_v38  ;;  %v8111_v35 = vsub.f32 %v8043_v28, %v8110_v43 }
 0x8bb   : > { %11468 = vmatprep.subr.mxu1 %v14514_v38 }
 0x8bc   : > { %v8112_v21 = vand.u32 4294901760, %v8111_v35 }
 0x8be   : > { %v8113_v23 = vsub.f32 %v8111_v35, %v8112_v21 }
 0x8c0   : > { %v8114_v58 = vand.u32 4294901760, %v8113_v23 }
 0x8c1   : > { %11466 = vmatmul.mubr.f32.vlgmr.msra.gmra.mrb[12].mxu1 %v7667_v9 }
 0x8c2   : > { %11469 = vmatpush3.msk.msra.mxu1 %vm12713_vm13, %v14515_v40  ;;  %11470 = vmatprep.mubr.msk.f32.mxu1 %vm12265_vm1, %v14514_v38 }
 0x8c3   : > { %11473 = vmatprep.subr.mxu1 %v14514_v38 }
 0x8c7   : > { %v9369_v13 = vpop.f32.mrb[12].mxu0 }
 0x8c8   : > { %v11663_v6 = vadd.f32 %v9369_v13, %v13881_v47  ;;  %v11562_v5 = vpop.f32.mrb[13].mxu0 }
 0x8c9   : > { %11471 = vmatmul.mubr.f32.vlgmr.msra.gmra.mrb[12].mxu1 %v7667_v9 }
 0x8ca   : > { %11474 = vmatpush3.msk.msra.mxu1 %vm12718_vm14, %v14515_v40  ;;  %11475 = vmatprep.mubr.msk.f32.mxu1 %vm12265_vm1, %v14514_v38 }
 0x8cb   : > { %11478 = vmatprep.subr.mxu1 %v14514_v38 }
 0x8d1   : > { %11476 = vmatmul.mubr.f32.vlgmr.msra.gmra.mrb[12].mxu1 %v8114_v58 }
 0x8d2   : > { %11479 = vmatpush3.msra.mxu1 %v12758_v45  ;;  %11480 = vmatprep.mubr.msk.f32.mxu1 %vm12265_vm1, %v14514_v38 }
 0x8d3   : > { %11483 = vmatprep.subr.mxu1 %v14514_v38 }
 0x8d9   : > { %11481 = vmatmul.mubr.f32.vlgmr.msra.gmra.mrb[12].mxu1 %v8110_v43 }
 0x8da   : > { %11484 = vmatpush3.msra.mxu1 %v12740_v30  ;;  %11485 = vmatprep.mubr.msk.f32.mxu1 %vm12265_vm1, %v14514_v38  ;;  %v9375_v30 = vand.u32 4294901760, %v11663_v6 }
 0x8db   : > { %11488 = vmatprep.subr.mxu1 %v14514_v38 }
 0x8dc   : > { %v9452_v45 = vsub.f32 %v11663_v6, %v9375_v30 }
 0x8de   : > { %v9453_v47 = vand.u32 4294901760, %v9452_v45 }
 0x8e1   : > { %11486 = vmatmul.mubr.f32.vlgmr.msra.gmra.mrb[12].mxu1 %v8111_v35 }
 0x8e2   : > { %11489 = vmatpush3.msk.msra.mxu1 %vm12718_vm14, %v14515_v40  ;;  %11490 = vmatprep.mubr.msk.f32.mxu1 %vm12265_vm1, %v14514_v38 }
 0x8e3   : > { %11493 = vmatprep.subr.mxu1 %v14514_v38 }
 0x8e9   : > { %11491 = vmatmul.mubr.f32.vlgmr.msra.gmra.mrb[12].mxu1 %v8112_v21 }
 0x8ea   : > { %11494 = vmatpush3.msra.mxu1 %v12750_v37  ;;  %11495 = vmatprep.mubr.msk.f32.mxu1 %vm12265_vm1, %v14514_v38  ;;  %v9454_v37 = vsub.f32 %v9452_v45, %v9453_v47 }
 0x8eb   : > { %11498 = vmatprep.subr.mxu1 %v14514_v38 }
 0x8ec   : > { %v9455_v2 = vand.u32 4294901760, %v9454_v37 }
 0x8f1   : > { %11496 = vmatmul.mubr.f32.vlgmr.msra.gmra.mrb[12].mxu1 %v8110_v43 }
 0x8f2   : > { %11499 = vmatpush3.msk.msra.mxu1 %vm12718_vm14, %v14515_v40  ;;  %11500 = vmatprep.mubr.msk.f32.mxu1 %vm12265_vm1, %v14514_v38  ;;  %v11661_v40 = vadd.f32 %v13917_v14, %v1166_v57 }
 0x8f3   : > { %11563 = vmatprep.subr.mxu1 %v14514_v38 }
 0x8f9   : > { %11501 = vmatmul.mubr.f32.vlgmr.msra.gmra.mrb[12].mxu1 %v8110_v43 }
 0x8fa   : > { %11564 = vmatpush3.msra.mxu1 %v9375_v30  ;;  %11565 = vmatprep.mubr.msk.f32.mxu1 %vm12265_vm1, %v14514_v38 }
 0x8fb   : > { %11568 = vmatprep.subr.mxu1 %v14514_v38 }
 0x901   : > { %11566 = vmatmul.mubr.f32.vlgmr.msra.gmra.mrb[12].mxu1 %v14520_v3 }
 0x902   : > { %11569 = vmatpush3.msra.mxu1 %v9455_v2  ;;  %11570 = vmatprep.mubr.msk.f32.mxu1 %vm12265_vm1, %v14514_v38 }
 0x903   : > { %11573 = vmatprep.subr.mxu1 %v14514_v38 }
 0x909   : > { %11571 = vmatmul.mubr.msk.f32.vlgmr.msra.gmra.mrb[12].mxu1 %vm1625_vm10, %v14521_v24 }
 0x90a   : > { %11574 = vmatpush3.msra.mxu1 %v9452_v45  ;;  %11575 = vmatprep.mubr.msk.f32.mxu1 %vm12265_vm1, %v14514_v38 }
 0x90b   : > { %11578 = vmatprep.subr.mxu1 %v14514_v38 }
 0x911   : > { %11576 = vmatmul.mubr.f32.vlgmr.msra.gmra.mrb[12].mxu1 %v14522_v50 }
 0x912   : > { %11579 = vmatpush3.msra.mxu1 %v9375_v30  ;;  %11580 = vmatprep.mubr.msk.f32.mxu1 %vm12265_vm1, %v14514_v38 }
 0x913   : > { %11583 = vmatprep.subr.mxu1 %v14514_v38 }
 0x919   : > { %11581 = vmatmul.mubr.f32.vlgmr.msra.gmra.mrb[12].mxu1 %v14523_v17 }
 0x91a   : > { %11584 = vmatpush3.msra.mxu1 %v9453_v47  ;;  %11585 = vmatprep.mubr.msk.f32.mxu1 %vm12265_vm1, %v14514_v38 }
 0x91b   : > { %11588 = vmatprep.subr.mxu1 %v14514_v38 }
 0x921   : > { %11586 = vmatmul.mubr.msk.f32.vlgmr.msra.gmra.mrb[12].mxu1 %vm1625_vm10, %v14521_v24 }
 0x922   : > { %11589 = vmatpush3.msra.mxu1 %v9375_v30  ;;  %11590 = vmatprep.mubr.msk.f32.mxu1 %vm12265_vm1, %v14514_v38 }
 0x923   : > { %11598 = vmatprep.subr.mxu1 %v14514_v38 }
 0x929   : > { %11591 = vmatmul.mubr.msk.f32.vlgmr.msra.gmra.mrb[12].mxu1 %vm1625_vm10, %v14521_v24 }
 0x92a   : > { %11600 = vmatprep.mubr.msk.f32.mxu1 %vm12265_vm1, %v14514_v38 }
 0x9fc   : > { %v9816_v39 = vpop.f32.mrb[12].mxu1 }
 0x9fd   : > { %v14156_v55 = vadd.f32 %v11661_v40, %v9816_v39  ;;  %v11592_v52 = vpop.f32.mrb[13].mxu1 }
 0x9ff   : > { %v9825_v27 = vsel %vm1625_vm10, %v14156_v55, 0 }
 0xa00   : > { %v9828_v44 = vand.u32 4294901760, %v9825_v27 }
 0xa02   : > { %v9905_v54 = vsub.f32 %v9825_v27, %v9828_v44  ;;  %11594 = vmatpush3.xpose.msra.mxu0 %v9828_v44 }
 0xa03   : > { %11603 = vmatprep.subr.mxu0 %v14514_v38 }
 0xa04   : > { %v9906_v51 = vand.u32 4294901760, %v9905_v54 }
 0xa05   : > { %11596 = vmatmul.mubr.f32.vlgmr.msra.gmra.mrb[14].mxu0 %v9897_v46 }
 0xa06   : > { %11604 = vmatpush3.xpose.msra.mxu0 %v9905_v54  ;;  %11605 = vmatprep.mubr.msk.f32.mxu0 %vm12265_vm1, %v14514_v38  ;;  %v9907_v14 = vsub.f32 %v9905_v54, %v9906_v51 }
 0xa07   : > { %11613 = vmatprep.subr.mxu0 %v14514_v38 }
 0xa08   : > { %v9908_v10 = vand.u32 4294901760, %v9907_v14 }
 0xa09   : > { %11606 = vmatmul.mubr.f32.vlgmr.msra.gmra.mrb[16].mxu0 %v9894_v56 }
 0xa0a   : > { %11599 = vmatpush3.xpose.msra.mxu1 %v9908_v10  ;;  %11614 = vmatpush3.xpose.msra.mxu0 %v9906_v51 }
 0xa0b   : > { %11608 = vmatprep.subr.mxu1 %v14514_v38  ;;  %11615 = vmatprep.mubr.msk.f32.mxu0 %vm12265_vm1, %v14514_v38 }
 0xa0d   : > { %11601 = vmatmul.mubr.msk.f32.vlgmr.msra.gmra.mrb[14].mxu1 %vm1625_vm10, %v1003_v53  ;;  %11616 = vmatmul.mubr.msk.f32.vlgmr.msra.gmra.mrb[18].mxu0 %vm1625_vm10, %v1003_v53 }
 0xa0e   : > { %11609 = vmatpush3.xpose.msra.mxu1 %v9828_v44  ;;  %11610 = vmatprep.mubr.msk.f32.mxu1 %vm12265_vm1, %v14514_v38 }
 0xa0f   : > { %11618 = vmatprep.subr.mxu1 %v14514_v38 }
 0xa11   : > { %11611 = vmatmul.mubr.f32.vlgmr.msra.gmra.mrb[16].mxu1 %v9895_v4 }
 0xa12   : > { %11619 = vmatpush3.xpose.msra.mxu1 %v9828_v44  ;;  %11620 = vmatprep.mubr.msk.f32.mxu1 %vm12265_vm1, %v14514_v38 }
 0xa15   : > { %11621 = vmatmul.mubr.msk.f32.vlgmr.msra.gmra.mrb[18].mxu1 %vm1625_vm10, %v1003_v53 }
 0xa16   : > { %12130 = shalt.err (!%p12127_p1)
}
 0xa17   : > { %s12131_s14 = scalar_lea.hbm %s14185_s3, 128  ;;  %s12135_s30 = scalar_lea.hbm %s14530_s15, 256 }
 0xa18   : > { %p12132_p6 = scmp.ne.s32.totalorder %s14185_s3, %s12131_s14  ;;  %p12136_p4 = scmp.lt.u32.totalorder %s14185_s3, %s14530_s15 }
 0xa19   : > { %p12137_p10 = scmp.lt.u32.totalorder %s12135_s30, %s12131_s14  ;;  %p12139_p13 = scmp.lt.u32.totalorder %s12131_s14, %s14185_s3 }
 0xa1a   : > { %p12133_p3 = pnand %p12132_p6, %p14532_p7 }
 0xa1b   : > { %p12138_p11 = por %p12137_p10, %p12136_p4 }
 0xa1c   : > { %p12134_p9 = pneg %p12133_p3 }
 0xa1d   : > { %p12140_p8 = por %p12139_p13, %p12138_p11 }
 0xa1f   : > { %p12141_p12 = pnand %p12140_p8, %p12134_p9 }
 0xa21   : > { %12144 = shalt.err (!%p12141_p12)
}
 0xa22   : > { %11883 = dma.vmem_to_hbm [thread:$0]  (%p14532_p7), %s10316_s24, 128, %s14185_s3, %s14191_s8  }
 0xa23   : > { %s14533_s6 = sld [smem:[#allocation71_spill]]  ;;  %s12145_s9 = scalar_lea.vmem %s14189_s12, 128 }
 0xa24   : > { %p12146_p0 = scmp.ne.s32.totalorder %s14189_s12, %s12145_s9  ;;  %s12272_s16 = smov [#allocation16]  }
 0xa25   : > { %s12149_s1 = sshll.u32 %s12272_s16, 4  ;;  %s12150_s1 = int_to_ptr.vmem [resolvable:$false] %s12149_s1 }
 0xa26   : > { %p12147_p2 = pnand %p12146_p0, %p14532_p7  ;;  %s12151_s19 = scalar_lea.vmem %s12150_s1, 256 }
 0xa27   : > { %p12152_p1 = scmp.lt.s32.totalorder %s14189_s12, %s12150_s1  ;;  %p12153_p6 = scmp.lt.s32.totalorder %s12151_s19, %s12145_s9 }
 0xa28   : > { %p12148_p5 = pneg %p12147_p2 }
 0xa29   : > { %s10326_s2 = scalar_lea.hbm %s14533_s6, %s14179_s18  ;;  %p12154_p3 = por %p12153_p6, %p12152_p1 }
 0xa2b   : > { %p12155_p9 = pnand %p12154_p3, %p12148_p5 }
 0xa2d   : > { %12158 = shalt.err (!%p12155_p9)
}
 0xa2e   : > { %s12159_s10 = scalar_lea.hbm %s10326_s2, 128  ;;  %s12163_s28 = scalar_lea.hbm %s14533_s6, 256 }
 0xa2f   : > { %p12160_p4 = scmp.ne.s32.totalorder %s10326_s2, %s12159_s10  ;;  %p12164_p13 = scmp.lt.u32.totalorder %s10326_s2, %s14533_s6 }
 0xa30   : > { %p12165_p8 = scmp.lt.u32.totalorder %s12163_s28, %s12159_s10  ;;  %p12167_p0 = scmp.lt.u32.totalorder %s12159_s10, %s10326_s2 }
 0xa31   : > { %p12161_p10 = pnand %p12160_p4, %p14532_p7 }
 0xa32   : > { %p12166_p12 = por %p12165_p8, %p12164_p13 }
 0xa33   : > { %p12162_p11 = pneg %p12161_p10 }
 0xa34   : > { %p12168_p2 = por %p12167_p0, %p12166_p12 }
 0xa36   : > { %p12169_p5 = pnand %p12168_p2, %p12162_p11 }
 0xa38   : > { %12172 = shalt.err (!%p12169_p5)
}
 0xa39   : > { %11884 = dma.vmem_to_hbm [thread:$0]  (%p14532_p7), %s14189_s12, 128, %s10326_s2, %s14191_s8   ;;  %vm1004_vm1 = vcmp.ne.s32.totalorder %v14525_v34, %v14524_v41 }
 0xa3a   : > { %s14534_s24 = sld [smem:[#allocation32_spill]]  ;;  %s406_s12 = scalar_lea.vmem [#allocation13], %s14526_s5 }
 0xa3b   : > { %s10302_s8 = sshll.u32 %s406_s12, 4  ;;  %s14535_s13 = sld [smem:[#allocation69_spill]]  ;;  %s14242_s8 = int_to_ptr.vmem [resolvable:$true] %s10302_s8 }
 0xa3c   : > { %s12173_s29 = scalar_lea.vmem %s14242_s8, 128  ;;  %s12273_s5 = smov [#allocation13]  }
 0xa3d   : > { %p12174_p1 = scmp.ne.s32.totalorder %s14242_s8, %s12173_s29  ;;  %s12177_s30 = sshll.u32 %s12273_s5, 4  ;;  %s12178_s30 = int_to_ptr.vmem [resolvable:$false] %s12177_s30 }
 0xa3e   : > { %s12179_s26 = scalar_lea.vmem %s12178_s30, 256  ;;  %p12180_p9 = scmp.lt.s32.totalorder %s14242_s8, %s12178_s30 }
 0xa3f   : > { %p12175_p6 = pnand %p12174_p1, %p14532_p7  ;;  %p12181_p4 = scmp.lt.s32.totalorder %s12179_s26, %s12173_s29 }
 0xa40   : > { %s10279_s17 = scalar_lea.sflag [#allocation5], %s14534_s24 }
 0xa41   : > { %s14536_s20 = smov %s14535_s13  ;;  %s14240_s14 = scalar_lea.hbm %s14535_s13, %s14179_s18 }
 0xa42   : > { %p12176_p3 = pneg %p12175_p6  ;;  %p12182_p10 = por %p12181_p4, %p12180_p9 }
 0xa44   : > { %p12183_p11 = pnand %p12182_p10, %p12176_p3 }
 0xad8   : > { %v9899_v38 = vpop.f32.mrb[14].mxu0 }
 0xad9   : > { %v11597_v22 = vpop.f32.mrb[15].mxu0 }
 0xadc   : > { %v10049_v18 = vpop.f32.mrb[16].mxu0 }
 0xadd   : > { %v11607_v26 = vpop.f32.mrb[17].mxu0 }
 0xae0   : > { %v9975_v16 = vpop.f32.mrb[14].mxu1  ;;  %v10197_v31 = vpop.f32.mrb[18].mxu0 }
 0xae1   : > { %v9976_v7 = vadd.f32 %v9975_v16, %v9899_v38  ;;  %v11602_v29 = vpop.f32.mrb[15].mxu1  ;;  %v11617_v0 = vpop.f32.mrb[19].mxu0 }
 0xae3   : > { %v10050_v15 = vadd.f32 %v10049_v18, %v9976_v7 }
 0xae4   : > { %v10123_v19 = vpop.f32.mrb[16].mxu1 }
 0xae5   : > { %v10124_v12 = vadd.f32 %v10123_v19, %v10050_v15  ;;  %v11612_v8 = vpop.f32.mrb[17].mxu1 }
 0xae7   : > { %v10198_v62 = vadd.f32 %v10197_v31, %v10124_v12 }
 0xae8   : > { %v10269_v59 = vpop.f32.mrb[18].mxu1 }
 0xae9   : > { %v10270_v60 = vadd.f32 %v10269_v59, %v10198_v62  ;;  %v11622_v61 = vpop.f32.mrb[19].mxu1 }
 0xaeb   : > { %v10273_v42 = vadd.f32 %v14156_v55, %v10270_v60 }
 0xaed   : > { %vm10274_vm9 = vcmp.ge.f32.partialorder %v10273_v42, 0.0 }
 0xaee   : > { %vm10275_vm11 = vmand %vm1004_vm1, %vm10274_vm9 }
 0xaef   : > { %v10276_v20 = vsel %vm10275_vm11, %v10273_v42, 0.0 }
 0xaf0   : > { %10277 = vst.msk [vmem:[%s406_s12] sm:$0xff] %vm1625_vm10, %v10276_v20 }
 0xaf1   : > { %12186 = shalt.err (!%p12183_p11)
}
 0xaf2   : > { %s12187_s18 = scalar_lea.hbm %s14240_s14, 128  ;;  %s12191_s23 = scalar_lea.hbm %s14536_s20, 256 }
 0xaf3   : > { %p12188_p13 = scmp.ne.s32.totalorder %s14240_s14, %s12187_s18  ;;  %p12192_p0 = scmp.lt.u32.totalorder %s14240_s14, %s14536_s20 }
 0xaf4   : > { %p12193_p2 = scmp.lt.u32.totalorder %s12191_s23, %s12187_s18  ;;  %p12195_p1 = scmp.lt.u32.totalorder %s12187_s18, %s14240_s14 }
 0xaf5   : > { %p12189_p8 = pnand %p12188_p13, %p14532_p7 }
 0xaf6   : > { %p12194_p5 = por %p12193_p2, %p12192_p0 }
 0xaf7   : > { %p12190_p12 = pneg %p12189_p8 }
 0xaf8   : > { %p12196_p6 = por %p12195_p1, %p12194_p5 }
 0xafa   : > { %p12197_p3 = pnand %p12196_p6, %p12190_p12 }
 0xafc   : > { %12200 = shalt.err (!%p12197_p3)
}
 0xafd   : > { %11882 = dma.vmem_to_hbm [thread:$0]  (%p14532_p7), %s14242_s8, 128, %s14240_s14, %s10279_s17  }
 0xafe PF: > { %s14537_s16 = sld [smem:[#allocation23_spill]]  ;;  %s14538_s1 = sld [smem:[#allocation31_spill]] }
 0xaff   : > { %s14539_s19 = sld [smem:[#allocation26_spill]] }
 0xb04   : > { %s10340_s10 = sand.u32 1, %s14537_s16   ;;  %p14540_p9 = scmp.ne.s32.totalorder %s14538_s1, 0 }
 0xb05   : > { %p14541_p4 = scmp.ge.s32.totalorder %s14539_s19, 2  ;;  %s10341_s27 = scalar_lea.sflag [#allocation5], %s10340_s10 }
 0xb07   : > { %p11906_p10 = pnand %p14541_p4, %p14540_p9 }
 0xb09   : > { %12234 = dma.done.wait (!%p11906_p10), %s10341_s27, 128  }
 0xb0a   : > { %12236 = vsyncadd (!%p11906_p10), %s10341_s27, 4294967168  ;;  %s14542_s25 = sadd.s32 4294967294, %s14539_s19  }
 0xb0b   : > { %s10349_s28 = sand.u32 1, %s14542_s25  }
 0xb0c   : > { %s10350_s3 = scalar_lea.sflag [#allocation15], %s10349_s28 }
 0xb0d   : > { %12238 = dma.done.wait (!%p11906_p10), %s10350_s3, 256  }
 0xb0e   : > { %12240 = vsyncadd (!%p11906_p10), %s10350_s3, 4294967040  ;;  %s14543_s14 = sld [smem:[#allocation28_spill]]  ;;  %s14544_s11 = sld [smem:[#allocation24_spill]] }
 0xb0f   : > { %s14545_s12 = sld [smem:[#allocation25_spill]]  ;;  %s14546_s13 = sld [smem:[#allocation29_spill]] }
 0xb14   : > { %p30_p7 = scmp.ge.s32.totalorder %s14543_s14, 4  }
 0xb16   :  { %32 = sbr.rel (!%p30_p7) target bundleno = 21 (0x15), region = 142 }
 0xb1d   :  { %10364 = vsyncpa [#allocation4], 1 }
 0xb1e   :  { %10366 = vsyncpa [#allocation4 + $0x1], 1 }
 0xb1f   :  { %10367 = vsyncpa [#allocation8], 1 }
 0xb20   :  { %10368 = vsyncpa [#allocation5], 1 }
 0xb21   :  { %10370 = vsyncpa [#allocation5 + $0x1], 1 }
 0xb22   :  { %10371 = vsyncpa [#allocation15], 1 }
 0xb23   :  { %10373 = vsyncpa [#allocation15 + $0x1], 1 }
 0xb24   :  { %10374 = vsyncpa [#allocation6], 1 }
 0xb25   :  { %10376 = vsyncpa [#allocation6 + $0x1], 1 }
 0xb26   :  { %10377 = vsyncpa [#allocation11], 1 }

</bundles_post_ra>
